<compile_context>
chip_gen: v5e
topology: v5e:2x2
jax: 0.10.0
libtpu: 0.0.40
codegen_flags: <defaults>
</compile_context>

<pallas_src>
import jax
import jax.numpy as jnp
from jax.experimental import pallas as pl
from jax.experimental.pallas import tpu as pltpu


# ---------------------------------------------------------------------------
# Kernel A: tiled matmul + bias + ReLU  (conv1 via im2col, K=9, Cout=32)
# ---------------------------------------------------------------------------

def _matmul_bias_relu_kernel(x_ref, w_ref, b_ref, o_ref):
    acc = jnp.dot(x_ref[...], w_ref[...], preferred_element_type=jnp.float32)
    o_ref[...] = jnp.maximum(acc + b_ref[...], 0.0)


def matmul_bias_relu(x, w, b, *, tm=512):
    M, K = x.shape
    K2, N = w.shape
    assert K == K2
    n_blk = pl.cdiv(M, tm)
    Mp = n_blk * tm
    if Mp != M:
        x = jnp.pad(x, ((0, Mp - M), (0, 0)))
    out = pl.pallas_call(
        _matmul_bias_relu_kernel,
        out_shape=jax.ShapeDtypeStruct((Mp, N), jnp.float32),
        grid=(n_blk,),
        in_specs=[
            pl.BlockSpec((tm, K), lambda i: (i, 0)),
            pl.BlockSpec((K, N), lambda i: (0, 0)),
            pl.BlockSpec((1, N), lambda i: (0, 0)),
        ],
        out_specs=pl.BlockSpec((tm, N), lambda i: (i, 0)),
        compiler_params=pltpu.CompilerParams(
            dimension_semantics=("parallel",)),
    )(x, w, b.reshape(1, N))
    return out[:M]


# ---------------------------------------------------------------------------
# Kernel B: fused conv2 (as matmul) + bias + ReLU + 2x2 maxpool, per image.
# Patch rows are ordered  row = phase*144 + hi*12 + wi  with phase = hp*2+wp,
# (h, w) = (2*hi+hp, 2*wi+wp), so the pool is a max over 4 static row slabs.
# ---------------------------------------------------------------------------

def _conv2_relu_pool_kernel(p_ref, w_ref, b_ref, o_ref):
    # p_ref: (1, 576, 288)   w_ref: (288, 64)   b_ref: (1, 64)   o_ref: (1, 144, 64)
    s = jnp.dot(p_ref[0], w_ref[...], preferred_element_type=jnp.float32)   # (576, 64)
    s = jnp.maximum(s + b_ref[...], 0.0)                                     # bias + ReLU
    o_ref[0] = jnp.maximum(jnp.maximum(s[0:144], s[144:288]),
                           jnp.maximum(s[288:432], s[432:576]))              # 2x2 maxpool


def conv2_relu_pool(p2, w2, b2):
    N = p2.shape[0]
    return pl.pallas_call(
        _conv2_relu_pool_kernel,
        out_shape=jax.ShapeDtypeStruct((N, 144, 64), jnp.float32),
        grid=(N,),
        in_specs=[
            pl.BlockSpec((1, 576, 288), lambda n: (n, 0, 0)),
            pl.BlockSpec((288, 64), lambda n: (0, 0)),
            pl.BlockSpec((1, 64), lambda n: (0, 0)),
        ],
        out_specs=pl.BlockSpec((1, 144, 64), lambda n: (n, 0, 0)),
        compiler_params=pltpu.CompilerParams(
            dimension_semantics=("parallel",)),
    )(p2, w2, b2.reshape(1, 64))


# ---------------------------------------------------------------------------
# Kernel C: fused fc1 + ReLU + fc2 + log_softmax, tiled over (batch, K=9216).
# ---------------------------------------------------------------------------

def _fc_head_kernel(x_ref, w1_ref, b1_ref, w2_ref, b2_ref, o_ref, acc_ref):
    k = pl.program_id(1)

    @pl.when(k == 0)
    def _():
        acc_ref[...] = jnp.zeros_like(acc_ref)

    acc_ref[...] += jnp.dot(x_ref[...], w1_ref[...],
                            preferred_element_type=jnp.float32)

    @pl.when(k == pl.num_programs(1) - 1)
    def _():
        h = jnp.maximum(acc_ref[...] + b1_ref[...], 0.0)                 # fc1 + ReLU
        logits = jnp.dot(h, w2_ref[...],
                         preferred_element_type=jnp.float32) + b2_ref[...]  # fc2
        z = logits - jnp.max(logits, axis=1, keepdims=True)
        lse = jnp.log(jnp.sum(jnp.exp(z), axis=1, keepdims=True))
        o_ref[...] = z - lse                                             # log_softmax


def fc_head(x, w1, b1, w2, b2, *, tk=1024):
    M, K = x.shape
    K2, H = w1.shape
    H2, C = w2.shape
    assert K == K2 and H == H2 and K % tk == 0
    tb = min(pl.cdiv(M, 8) * 8, 256)
    n_m = pl.cdiv(M, tb)
    Mp = n_m * tb
    if Mp != M:
        x = jnp.pad(x, ((0, Mp - M), (0, 0)))
    out = pl.pallas_call(
        _fc_head_kernel,
        out_shape=jax.ShapeDtypeStruct((Mp, C), jnp.float32),
        grid=(n_m, K // tk),
        in_specs=[
            pl.BlockSpec((tb, tk), lambda m, k: (m, k)),
            pl.BlockSpec((tk, H), lambda m, k: (k, 0)),
            pl.BlockSpec((1, H), lambda m, k: (0, 0)),
            pl.BlockSpec((H, C), lambda m, k: (0, 0)),
            pl.BlockSpec((1, C), lambda m, k: (0, 0)),
        ],
        out_specs=pl.BlockSpec((tb, C), lambda m, k: (m, 0)),
        scratch_shapes=[pltpu.VMEM((tb, H), jnp.float32)],
        compiler_params=pltpu.CompilerParams(
            dimension_semantics=("parallel", "arbitrary")),
    )(x, w1, b1.reshape(1, H), w2, b2.reshape(1, C))
    return out[:M]


# ---------------------------------------------------------------------------
# Plain-JAX glue (layout only, no math)
# ---------------------------------------------------------------------------

def _im2col_patches(x, k=3):
    """x: (N,H,W,C) -> (N,Ho,Wo,k*k,C) patches, tap-major / channel-minor."""
    N, H, W, C = x.shape
    Ho, Wo = H - k + 1, W - k + 1
    cols = [x[:, kh:kh + Ho, kw:kw + Wo, :] for kh in range(k) for kw in range(k)]
    return jnp.stack(cols, axis=3), (Ho, Wo)


def init_params(key, num_classes=10):
    ks = jax.random.split(key, 8)

    def init(k, shape, fan_in):
        return jax.random.normal(k, shape, jnp.float32) / jnp.sqrt(fan_in)

    return {
        # conv weights stored as (kh, kw, Cin, Cout)  (== torch (Cout,Cin,kh,kw) permuted)
        "w_conv1": init(ks[0], (3, 3, 1, 32), 9.0),
        "b_conv1": init(ks[1], (32,), 9.0),
        "w_conv2": init(ks[2], (3, 3, 32, 64), 288.0),
        "b_conv2": init(ks[3], (64,), 288.0),
        # linear weights stored as (in, out) with torch's CHW flatten row order
        "w_fc1": init(ks[4], (9216, 128), 9216.0),
        "b_fc1": init(ks[5], (128,), 9216.0),
        "w_fc2": init(ks[6], (128, num_classes), 128.0),
        "b_fc2": init(ks[7], (num_classes,), 128.0),
    }


def net_forward(params, x_nchw):
    """x_nchw: (N, 1, 28, 28) float32 (PyTorch layout)."""
    N = x_nchw.shape[0]
    x = jnp.transpose(x_nchw, (0, 2, 3, 1))                       # (N, 28, 28, 1)

    # ---- conv1 (3x3 valid) + ReLU : XLA im2col + tiled Pallas matmul ----
    p1, (H1, W1) = _im2col_patches(x)                             # (N,26,26,9,1)
    p1 = p1.reshape(N * H1 * W1, 9)
    y1 = matmul_bias_relu(p1, params["w_conv1"].reshape(9, 32),
                          params["b_conv1"])
    y1 = y1.reshape(N, H1, W1, 32)

    # ---- conv2 + ReLU + maxpool(2) : fused Pallas kernel ----
    p2, (H2, W2) = _im2col_patches(y1)                            # (N,24,24,9,32)
    Hp, Wp = H2 // 2, W2 // 2
    # phase-major row order: row = (hp*2+wp)*144 + hi*12 + wi   (layout glue)
    p2 = p2.reshape(N, Hp, 2, Wp, 2, 9 * 32)
    p2 = p2.transpose(0, 2, 4, 1, 3, 5).reshape(N, 4 * Hp * Wp, 9 * 32)
    pooled = conv2_relu_pool(p2, params["w_conv2"].reshape(9 * 32, 64),
                             params["b_conv2"])                    # (N, 144, 64)

    # dropout1 / dropout2 are identity at inference (PyTorch eval semantics)

    # ---- flatten + fc1 + ReLU + fc2 + log_softmax : fused Pallas kernel ----
    flat = pooled.reshape(N, Hp * Wp * 64)                         # HWC flatten
    # permute fc1 weight rows from torch's CHW flatten order to HWC order
    w_fc1 = params["w_fc1"].reshape(64, Hp, Wp, 128).transpose(1, 2, 0, 3)
    w_fc1 = w_fc1.reshape(Hp * Wp * 64, 128)
    return fc_head(flat, w_fc1, params["b_fc1"],
                   params["w_fc2"], params["b_fc2"])


def net_forward_ref(params, x_nchw):
    """Pure-JAX reference with identical weight conventions (for checking)."""
    N = x_nchw.shape[0]
    x = jnp.transpose(x_nchw, (0, 2, 3, 1))
    dn = ("NHWC", "HWIO", "NHWC")
    y1 = jax.lax.conv_general_dilated(x, params["w_conv1"], (1, 1), "VALID",
                                      dimension_numbers=dn)
    y1 = jax.nn.relu(y1 + params["b_conv1"])
    y2 = jax.lax.conv_general_dilated(y1, params["w_conv2"], (1, 1), "VALID",
                                      dimension_numbers=dn)
    y2 = jax.nn.relu(y2 + params["b_conv2"])
    yp = jax.lax.reduce_window(y2, -jnp.inf, jax.lax.max,
                               (1, 2, 2, 1), (1, 2, 2, 1), "VALID")
    flat = jnp.transpose(yp, (0, 3, 1, 2)).reshape(N, -1)          # torch flatten
    h = jax.nn.relu(flat @ params["w_fc1"] + params["b_fc1"])
    logits = h @ params["w_fc2"] + params["b_fc2"]
    return jax.nn.log_softmax(logits, axis=-1)


if __name__ == "__main__":
    key = jax.random.PRNGKey(0)
    k_params, k_x = jax.random.split(key)
    params = init_params(k_params, num_classes=10)
    x = jax.random.normal(k_x, (2, 1, 28, 28), jnp.float32)

    out = jax.block_until_ready(jax.jit(net_forward)(params, x))

    assert out.shape == (2, 10), out.shape
    # rows of log_softmax must exp-sum to 1
    assert jnp.allclose(jnp.sum(jnp.exp(out), axis=1), 1.0, atol=1e-3)
    # cross-check vs pure-JAX reference (loose tol: MXU vs XLA matmul precision)
    ref = jax.jit(net_forward_ref)(params, x)
    err = float(jnp.max(jnp.abs(out - ref)))
    assert err < 1e-1, err
    print("KERNEL_OK")
</pallas_src>

<mosaic_0001>
module attributes {stable_mosaic.version = 11 : i64} {
  func.func @_matmul_bias_relu_kernel(%arg0: i32, %arg1: memref<512x9xf32, #tpu.memory_space<vmem>>, %arg2: memref<9x32xf32, #tpu.memory_space<vmem>>, %arg3: memref<1x32xf32, #tpu.memory_space<vmem>>, %arg4: memref<512x32xf32, #tpu.memory_space<vmem>>) attributes {dimension_semantics = [#tpu.dimension_semantics<parallel>], iteration_bounds = array<i64: 3>, scalar_prefetch = 0 : i64, scratch_operands = 0 : i64, tpu.core_type = #tpu.core_type<tc>, window_params = [{transform_indices = @transform_0, window_bounds = array<i64: 512, 9>}, {pipeline_mode = #tpu.pipeline_mode<synchronous>, transform_indices = @transform_1, window_bounds = array<i64: 9, 32>}, {pipeline_mode = #tpu.pipeline_mode<synchronous>, transform_indices = @transform_2, window_bounds = array<i64: 1, 32>}, {transform_indices = @transform_3, window_bounds = array<i64: 512, 32>}]} {
    %c0 = arith.constant 0 : index
    %c0_0 = arith.constant 0 : index
    %0 = vector.load %arg1[%c0, %c0_0] : memref<512x9xf32, #tpu.memory_space<vmem>>, vector<512x9xf32>
    %c0_1 = arith.constant 0 : index
    %c0_2 = arith.constant 0 : index
    %1 = vector.load %arg2[%c0_1, %c0_2] : memref<9x32xf32, #tpu.memory_space<vmem>>, vector<9x32xf32>
    %cst = arith.constant dense<0.000000e+00> : vector<512x32xf32>
    %2 = tpu.matmul %0, %1, %cst {dimension_numbers = #tpu.dot_dimension_numbers<[1], [0], [0], [1], [0, 0, 1, 1], [], []>} : vector<512x9xf32>, vector<9x32xf32>, vector<512x32xf32> -> vector<512x32xf32>
    %c0_3 = arith.constant 0 : index
    %c0_4 = arith.constant 0 : index
    %3 = vector.load %arg3[%c0_3, %c0_4] : memref<1x32xf32, #tpu.memory_space<vmem>>, vector<1x32xf32>
    %4 = vector.broadcast %3 : vector<1x32xf32> to vector<512x32xf32>
    %5 = arith.addf %2, %4 : vector<512x32xf32>
    %cst_5 = arith.constant 0.000000e+00 : f32
    %6 = vector.broadcast %cst_5 : f32 to vector<512x32xf32>
    %7 = arith.maximumf %5, %6 : vector<512x32xf32>
    %c0_6 = arith.constant 0 : index
    %c0_7 = arith.constant 0 : index
    %8 = vector.load %arg4[%c0_6, %c0_7] : memref<512x32xf32, #tpu.memory_space<vmem>>, vector<512x32xf32>
    tpu.vector_store %arg4[%c0_6, %c0_7], %7 {strides = array<i32>} : memref<512x32xf32, #tpu.memory_space<vmem>>, vector<512x32xf32>,
    return
  }
  func.func @transform_0(%arg0: i32) -> (i32, i32) {
    %c0_i32 = arith.constant 0 : i32
    %c0_i32_0 = arith.constant 0 : i32
    return %arg0, %c0_i32 : i32, i32
  }
  func.func @transform_1(%arg0: i32) -> (i32, i32) {
    %c0_i32 = arith.constant 0 : i32
    %c0_i32_0 = arith.constant 0 : i32
    %c0_i32_1 = arith.constant 0 : i32
    return %c0_i32, %c0_i32_0 : i32, i32
  }
  func.func @transform_2(%arg0: i32) -> (i32, i32) {
    %c0_i32 = arith.constant 0 : i32
    %c0_i32_0 = arith.constant 0 : i32
    %c0_i32_1 = arith.constant 0 : i32
    return %c0_i32, %c0_i32_0 : i32, i32
  }
  func.func @transform_3(%arg0: i32) -> (i32, i32) {
    %c0_i32 = arith.constant 0 : i32
    %c0_i32_0 = arith.constant 0 : i32
    return %arg0, %c0_i32 : i32, i32
  }
}

module attributes {stable_mosaic.version = 11 : i64} {
  func.func @_conv2_relu_pool_kernel(%arg0: i32, %arg1: memref<1x576x288xf32, #tpu.memory_space<vmem>>, %arg2: memref<288x64xf32, #tpu.memory_space<vmem>>, %arg3: memref<1x64xf32, #tpu.memory_space<vmem>>, %arg4: memref<1x144x64xf32, #tpu.memory_space<vmem>>) attributes {dimension_semantics = [#tpu.dimension_semantics<parallel>], iteration_bounds = array<i64: 2>, scalar_prefetch = 0 : i64, scratch_operands = 0 : i64, tpu.core_type = #tpu.core_type<tc>, window_params = [{transform_indices = @transform_0, window_bounds = array<i64: 1, 576, 288>}, {pipeline_mode = #tpu.pipeline_mode<synchronous>, transform_indices = @transform_1, window_bounds = array<i64: 288, 64>}, {pipeline_mode = #tpu.pipeline_mode<synchronous>, transform_indices = @transform_2, window_bounds = array<i64: 1, 64>}, {transform_indices = @transform_3, window_bounds = array<i64: 1, 144, 64>}]} {
    %c0 = arith.constant 0 : index
    %c0_0 = arith.constant 0 : index
    %c0_1 = arith.constant 0 : index
    %0 = vector.load %arg1[%c0, %c0_0, %c0_1] : memref<1x576x288xf32, #tpu.memory_space<vmem>>, vector<1x576x288xf32>
    %1 = vector.shape_cast %0 : vector<1x576x288xf32> to vector<576x288xf32>
    %c0_2 = arith.constant 0 : index
    %c0_3 = arith.constant 0 : index
    %2 = vector.load %arg2[%c0_2, %c0_3] : memref<288x64xf32, #tpu.memory_space<vmem>>, vector<288x64xf32>
    %cst = arith.constant dense<0.000000e+00> : vector<576x64xf32>
    %3 = tpu.matmul %1, %2, %cst {dimension_numbers = #tpu.dot_dimension_numbers<[1], [0], [0], [1], [0, 0, 1, 1], [], []>} : vector<576x288xf32>, vector<288x64xf32>, vector<576x64xf32> -> vector<576x64xf32>
    %c0_4 = arith.constant 0 : index
    %c0_5 = arith.constant 0 : index
    %4 = vector.load %arg3[%c0_4, %c0_5] : memref<1x64xf32, #tpu.memory_space<vmem>>, vector<1x64xf32>
    %5 = vector.broadcast %4 : vector<1x64xf32> to vector<576x64xf32>
    %6 = arith.addf %3, %5 : vector<576x64xf32>
    %cst_6 = arith.constant 0.000000e+00 : f32
    %7 = vector.broadcast %cst_6 : f32 to vector<576x64xf32>
    %8 = arith.maximumf %6, %7 : vector<576x64xf32>
    %9 = vector.extract_strided_slice %8 {offsets = [0, 0], sizes = [144, 64], strides = [1, 1]} : vector<576x64xf32> to vector<144x64xf32>
    %10 = vector.extract_strided_slice %8 {offsets = [144, 0], sizes = [144, 64], strides = [1, 1]} : vector<576x64xf32> to vector<144x64xf32>
    %11 = arith.maximumf %9, %10 : vector<144x64xf32>
    %12 = vector.extract_strided_slice %8 {offsets = [288, 0], sizes = [144, 64], strides = [1, 1]} : vector<576x64xf32> to vector<144x64xf32>
    %13 = vector.extract_strided_slice %8 {offsets = [432, 0], sizes = [144, 64], strides = [1, 1]} : vector<576x64xf32> to vector<144x64xf32>
    %14 = arith.maximumf %12, %13 : vector<144x64xf32>
    %15 = arith.maximumf %11, %14 : vector<144x64xf32>
    %c0_7 = arith.constant 0 : index
    %c0_8 = arith.constant 0 : index
    %c0_9 = arith.constant 0 : index
    %16 = vector.load %arg4[%c0_7, %c0_8, %c0_9] : memref<1x144x64xf32, #tpu.memory_space<vmem>>, vector<1x144x64xf32>
    %17 = vector.shape_cast %16 : vector<1x144x64xf32> to vector<144x64xf32>
    %18 = vector.shape_cast %15 : vector<144x64xf32> to vector<1x144x64xf32>
    tpu.vector_store %arg4[%c0_7, %c0_8, %c0_9], %18 {strides = array<i32>} : memref<1x144x64xf32, #tpu.memory_space<vmem>>, vector<1x144x64xf32>,
    return
  }
  func.func @transform_0(%arg0: i32) -> (i32, i32, i32) {
    %c0_i32 = arith.constant 0 : i32
    %c0_i32_0 = arith.constant 0 : i32
    %c0_i32_1 = arith.constant 0 : i32
    return %arg0, %c0_i32, %c0_i32_0 : i32, i32, i32
  }
  func.func @transform_1(%arg0: i32) -> (i32, i32) {
    %c0_i32 = arith.constant 0 : i32
    %c0_i32_0 = arith.constant 0 : i32
    %c0_i32_1 = arith.constant 0 : i32
    return %c0_i32, %c0_i32_0 : i32, i32
  }
  func.func @transform_2(%arg0: i32) -> (i32, i32) {
    %c0_i32 = arith.constant 0 : i32
    %c0_i32_0 = arith.constant 0 : i32
    %c0_i32_1 = arith.constant 0 : i32
    return %c0_i32, %c0_i32_0 : i32, i32
  }
  func.func @transform_3(%arg0: i32) -> (i32, i32, i32) {
    %c0_i32 = arith.constant 0 : i32
    %c0_i32_0 = arith.constant 0 : i32
    %c0_i32_1 = arith.constant 0 : i32
    return %arg0, %c0_i32, %c0_i32_0 : i32, i32, i32
  }
}

module attributes {stable_mosaic.version = 11 : i64} {
  func.func @_fc_head_kernel(%arg0: i32, %arg1: i32, %arg2: memref<8x1024xf32, #tpu.memory_space<vmem>>, %arg3: memref<1024x128xf32, #tpu.memory_space<vmem>>, %arg4: memref<1x128xf32, #tpu.memory_space<vmem>>, %arg5: memref<128x10xf32, #tpu.memory_space<vmem>>, %arg6: memref<1x10xf32, #tpu.memory_space<vmem>>, %arg7: memref<8x10xf32, #tpu.memory_space<vmem>>, %arg8: memref<8x128xf32, #tpu.memory_space<vmem>>) attributes {dimension_semantics = [#tpu.dimension_semantics<parallel>, #tpu.dimension_semantics<arbitrary>], iteration_bounds = array<i64: 1, 9>, scalar_prefetch = 0 : i64, scratch_operands = 1 : i64, tpu.core_type = #tpu.core_type<tc>, window_params = [{transform_indices = @transform_0, window_bounds = array<i64: 8, 1024>}, {transform_indices = @transform_1, window_bounds = array<i64: 1024, 128>}, {pipeline_mode = #tpu.pipeline_mode<synchronous>, transform_indices = @transform_2, window_bounds = array<i64: 1, 128>}, {pipeline_mode = #tpu.pipeline_mode<synchronous>, transform_indices = @transform_3, window_bounds = array<i64: 128, 10>}, {pipeline_mode = #tpu.pipeline_mode<synchronous>, transform_indices = @transform_4, window_bounds = array<i64: 1, 10>}, {transform_indices = @transform_5, window_bounds = array<i64: 8, 10>}]} {
    %c0_i32 = arith.constant 0 : i32
    %0 = arith.cmpi eq, %arg1, %c0_i32 : i32
    %1 = arith.extui %0 : i1 to i32
    %c0_i32_0 = arith.constant 0 : i32
    %2 = arith.cmpi ne, %1, %c0_i32_0 : i32
    scf.if %2 {
      %cst_9 = arith.constant 0.000000e+00 : f32
      %12 = vector.broadcast %cst_9 : f32 to vector<8x128xf32>
      %c0_10 = arith.constant 0 : index
      %c0_11 = arith.constant 0 : index
      %13 = vector.load %arg8[%c0_10, %c0_11] : memref<8x128xf32, #tpu.memory_space<vmem>>, vector<8x128xf32>
      tpu.vector_store %arg8[%c0_10, %c0_11], %12 {strides = array<i32>} : memref<8x128xf32, #tpu.memory_space<vmem>>, vector<8x128xf32>,
    } else {
    }
    %c0 = arith.constant 0 : index
    %c0_1 = arith.constant 0 : index
    %3 = vector.load %arg8[%c0, %c0_1] : memref<8x128xf32, #tpu.memory_space<vmem>>, vector<8x128xf32>
    %c0_2 = arith.constant 0 : index
    %c0_3 = arith.constant 0 : index
    %4 = vector.load %arg2[%c0_2, %c0_3] : memref<8x1024xf32, #tpu.memory_space<vmem>>, vector<8x1024xf32>
    %c0_4 = arith.constant 0 : index
    %c0_5 = arith.constant 0 : index
    %5 = vector.load %arg3[%c0_4, %c0_5] : memref<1024x128xf32, #tpu.memory_space<vmem>>, vector<1024x128xf32>
    %cst = arith.constant dense<0.000000e+00> : vector<8x128xf32>
    %6 = tpu.matmul %4, %5, %cst {dimension_numbers = #tpu.dot_dimension_numbers<[1], [0], [0], [1], [0, 0, 1, 1], [], []>} : vector<8x1024xf32>, vector<1024x128xf32>, vector<8x128xf32> -> vector<8x128xf32>
    %7 = arith.addf %3, %6 : vector<8x128xf32>
    %c0_6 = arith.constant 0 : index
    %c0_7 = arith.constant 0 : index
    %8 = vector.load %arg8[%c0_6, %c0_7] : memref<8x128xf32, #tpu.memory_space<vmem>>, vector<8x128xf32>
    tpu.vector_store %arg8[%c0_6, %c0_7], %7 {strides = array<i32>} : memref<8x128xf32, #tpu.memory_space<vmem>>, vector<8x128xf32>,
    %c8_i32 = arith.constant 8 : i32
    %9 = arith.cmpi eq, %arg1, %c8_i32 : i32
    %10 = arith.extui %9 : i1 to i32
    %c0_i32_8 = arith.constant 0 : i32
    %11 = arith.cmpi ne, %10, %c0_i32_8 : i32
    scf.if %11 {
      %c0_9 = arith.constant 0 : index
      %c0_10 = arith.constant 0 : index
      %12 = vector.load %arg8[%c0_9, %c0_10] : memref<8x128xf32, #tpu.memory_space<vmem>>, vector<8x128xf32>
      %c0_11 = arith.constant 0 : index
      %c0_12 = arith.constant 0 : index
      %13 = vector.load %arg4[%c0_11, %c0_12] : memref<1x128xf32, #tpu.memory_space<vmem>>, vector<1x128xf32>
      %14 = vector.broadcast %13 : vector<1x128xf32> to vector<8x128xf32>
      %15 = arith.addf %12, %14 : vector<8x128xf32>
      %cst_13 = arith.constant 0.000000e+00 : f32
      %16 = vector.broadcast %cst_13 : f32 to vector<8x128xf32>
      %17 = arith.maximumf %15, %16 : vector<8x128xf32>
      %c0_14 = arith.constant 0 : index
      %c0_15 = arith.constant 0 : index
      %18 = vector.load %arg5[%c0_14, %c0_15] : memref<128x10xf32, #tpu.memory_space<vmem>>, vector<128x10xf32>
      %cst_16 = arith.constant dense<0.000000e+00> : vector<8x10xf32>
      %19 = tpu.matmul %17, %18, %cst_16 {dimension_numbers = #tpu.dot_dimension_numbers<[1], [0], [0], [1], [0, 0, 1, 1], [], []>} : vector<8x128xf32>, vector<128x10xf32>, vector<8x10xf32> -> vector<8x10xf32>
      %c0_17 = arith.constant 0 : index
      %c0_18 = arith.constant 0 : index
      %20 = vector.load %arg6[%c0_17, %c0_18] : memref<1x10xf32, #tpu.memory_space<vmem>>, vector<1x10xf32>
      %21 = vector.broadcast %20 : vector<1x10xf32> to vector<8x10xf32>
      %22 = arith.addf %19, %21 : vector<8x10xf32>
      %cst_19 = arith.constant dense<0xFF800000> : vector<8xf32>
      %23 = vector.multi_reduction <maximumf>, %22, %cst_19 [1] : vector<8x10xf32> to vector<8xf32>
      %24 = vector.shape_cast %23 : vector<8xf32> to vector<8x1xf32>
      %25 = vector.broadcast %24 : vector<8x1xf32> to vector<8x10xf32>
      %26 = arith.subf %22, %25 : vector<8x10xf32>
      %27 = math.exp %26 : vector<8x10xf32>
      %cst_20 = arith.constant dense<0.000000e+00> : vector<8xf32>
      %28 = vector.multi_reduction <add>, %27, %cst_20 [1] : vector<8x10xf32> to vector<8xf32>
      %29 = vector.shape_cast %28 : vector<8xf32> to vector<8x1xf32>
      %30 = math.log %29 : vector<8x1xf32>
      %31 = vector.broadcast %30 : vector<8x1xf32> to vector<8x10xf32>
      %32 = arith.subf %26, %31 : vector<8x10xf32>
      %c0_21 = arith.constant 0 : index
      %c0_22 = arith.constant 0 : index
      %33 = vector.load %arg7[%c0_21, %c0_22] : memref<8x10xf32, #tpu.memory_space<vmem>>, vector<8x10xf32>
      tpu.vector_store %arg7[%c0_21, %c0_22], %32 {strides = array<i32>} : memref<8x10xf32, #tpu.memory_space<vmem>>, vector<8x10xf32>,
    } else {
    }
    return
  }
  func.func @transform_0(%arg0: i32, %arg1: i32) -> (i32, i32) {
    %c0_i32 = arith.constant 0 : i32
    return %arg0, %arg1 : i32, i32
  }
  func.func @transform_1(%arg0: i32, %arg1: i32) -> (i32, i32) {
    %c0_i32 = arith.constant 0 : i32
    %c0_i32_0 = arith.constant 0 : i32
    return %arg1, %c0_i32 : i32, i32
  }
  func.func @transform_2(%arg0: i32, %arg1: i32) -> (i32, i32) {
    %c0_i32 = arith.constant 0 : i32
    %c0_i32_0 = arith.constant 0 : i32
    %c0_i32_1 = arith.constant 0 : i32
    return %c0_i32, %c0_i32_0 : i32, i32
  }
  func.func @transform_3(%arg0: i32, %arg1: i32) -> (i32, i32) {
    %c0_i32 = arith.constant 0 : i32
    %c0_i32_0 = arith.constant 0 : i32
    %c0_i32_1 = arith.constant 0 : i32
    return %c0_i32, %c0_i32_0 : i32, i32
  }
  func.func @transform_4(%arg0: i32, %arg1: i32) -> (i32, i32) {
    %c0_i32 = arith.constant 0 : i32
    %c0_i32_0 = arith.constant 0 : i32
    %c0_i32_1 = arith.constant 0 : i32
    return %c0_i32, %c0_i32_0 : i32, i32
  }
  func.func @transform_5(%arg0: i32, %arg1: i32) -> (i32, i32) {
    %c0_i32 = arith.constant 0 : i32
    %c0_i32_0 = arith.constant 0 : i32
    return %arg0, %c0_i32 : i32, i32
  }
}

</mosaic_0001>

<bundles_post_ra>
// kernel: net_forward.3
= control target key start
LH: loop header
LB: loop body
LE: loop exit
PB: predicated region body
PF: predicated region fallthrough
CT: control target
= control target key end

     0   :  { %8 = vsyncpa [#allocation3], 0  ;;  %s1029_s12 = smov 0   ;;  %s1388_s0 = inlined_call_operand.vmem [shape: f32[1536,9], index: 0, kind: input, shape index: {}]   ;;  %s1389_s1 = inlined_call_operand.vmem [shape: f32[9,32], index: 1, kind: input, shape index: {}]   ;;  %s1390_s2 = inlined_call_operand.hbm [shape: f32[1,32], index: 2, kind: input, shape index: {}]   ;;  %s1391_s3 = inlined_call_operand.vmem [shape: f32[1536,32], index: 3, kind: output, shape index: {}]  }
   0x1 LB: > { %s862_s13 = sadd.s32 4294967295, %s1006_s12   ;;  %p864_p0 = scmp.ge.s32.totalorder %s1006_s12, 1  ;;  %s1006_s12 = sphi %s1029_s12, %s14_s12  }
   0x2   : > { %p113_p1 = scmp.lt.s32.totalorder %s1006_s12, 4  ;;  %s128_s16 = sshll.u32 %s1390_s2, 4  ;;  %s129_s16 = int_to_ptr.hbm [resolvable:$true] %s128_s16 }
   0x3   : > { %p954_p3 = scmp.eq.s32.totalorder %s862_s13, 0  ;;  %s1008_s17 = smov [#allocation2]  }
   0x4   : > { %p114_p2 = pnand %p864_p0, %p113_p1  ;;  %s130_s18 = sshll.u32 %s1008_s17, 4  ;;  %s131_s18 = int_to_ptr.vmem [resolvable:$true] %s130_s18 }
   0x6   : > { %p950_p4 = pneg %p114_p2  ;;  %152 = sbr.rel (%p114_p2) target bundleno = 277 (0x115), region = 32 }
   0x8   : > { %p951_p5 = pnand %p954_p3, %p950_p4 }
   0xa   : > { %953 = dma.hbm_to_vmem [thread:$0]  (!%p951_p5), %s129_s16, 16, %s131_s18, [#allocation3]  }
   0xb   : > { %1001 = dma.done.wait (%p954_p3), [#allocation3], 16  }
   0xc   : > { %1003 = vsyncadd (%p954_p3), [#allocation3], 4294967280  ;;  %s869_s19 = sshll.u32 %s862_s13, 6  ;;  %vm452_vm0 = vcmask 1040384   ;;  %v254_v0 = vld [vmem:[%s1389_s1 + $0x8] sm:$0x1] }
   0xd   : > { %p178_p6 = scmp.lt.s32.totalorder %s869_s19, 191  ;;  %v253_v1 = vld [vmem:[%s1389_s1] sm:$0xff]  ;;  %941 = vmatpush.msk.msra.mxu2 %vm452_vm0, %v254_v0  ;;  %942 = vmatpush.msk.msra.mxu3 %vm452_vm0, %v254_v0  ;;  %vm259_vm1 = vcmask 72704   ;;  %vm729_vm2 = vcmask 261120  }
   0xe   : > { %873 = vmatpush.msk.msra.mxu0 %vm452_vm0, %v254_v0  ;;  %940 = vmatpush.msk.msra.mxu1 %vm452_vm0, %v254_v0 }
   0xf   : > { %s1393_s19 = smov (!%p178_p6, %s869_s19), 191  ;;  %944 = vmatpush.msra.mxu2 %v253_v1  ;;  %945 = vmatpush.msra.mxu3 %v253_v1 }
  0x10   : > { %s870_s20 = sshll.u32 %s1393_s19, 3  ;;  %471 = vmatpush.msra.mxu0 %v253_v1  ;;  %943 = vmatpush.msra.mxu1 %v253_v1 }
  0x11   : > { %s1048_s23 = scalar_lea.vmem %s1388_s0, %s870_s20  ;;  %s1193_s30 = scalar_lea.vmem %s1391_s3, %s870_s20 }
  0x12   : > { %v221_v2 = vld [vmem:[%s1048_s23 + $0x100] sm:$0xff]  ;;  %v222_v6 = vld [vmem:[%s1048_s23 + $0x108] sm:$0xff]  ;;  %v223_v10 = vld [vmem:[%s1048_s23 + $0x110] sm:$0xff] }
  0x13   : > { %v237_v3 = vld [vmem:[%s1048_s23 + $0x180] sm:$0xff]  ;;  %906 = vmatmul.msk.f32.vlgmr.msra.gmra.mxu2 %vm259_vm1, %v221_v2  ;;  %v238_v7 = vld [vmem:[%s1048_s23 + $0x188] sm:$0xff]  ;;  %v239_v11 = vld [vmem:[%s1048_s23 + $0x190] sm:$0xff] }
  0x14   : > { %v189_v4 = vld [vmem:[%s1048_s23] sm:$0xff]  ;;  %922 = vmatmul.msk.f32.vlgmr.msra.gmra.mxu3 %vm259_vm1, %v237_v3  ;;  %v190_v8 = vld [vmem:[%s1048_s23 + $0x8] sm:$0xff]  ;;  %v191_v12 = vld [vmem:[%s1048_s23 + $0x10] sm:$0xff] }
  0x15   : > { %v205_v5 = vld [vmem:[%s1048_s23 + $0x80] sm:$0xff]  ;;  %874 = vmatmul.msk.f32.vlgmr.msra.gmra.mxu0 %vm259_vm1, %v189_v4  ;;  %v206_v9 = vld [vmem:[%s1048_s23 + $0x88] sm:$0xff]  ;;  %v207_v13 = vld [vmem:[%s1048_s23 + $0x90] sm:$0xff] }
  0x16   : > { %890 = vmatmul.msk.f32.vlgmr.msra.gmra.mxu1 %vm259_vm1, %v205_v5  ;;  %v224_v14 = vld [vmem:[%s1048_s23 + $0x118] sm:$0xff]  ;;  %v225_v18 = vld [vmem:[%s1048_s23 + $0x120] sm:$0xff]  ;;  %v226_v22 = vld [vmem:[%s1048_s23 + $0x128] sm:$0xff] }
  0x17   : > { %v240_v15 = vld [vmem:[%s1048_s23 + $0x198] sm:$0xff]  ;;  %v241_v19 = vld [vmem:[%s1048_s23 + $0x1a0] sm:$0xff]  ;;  %v242_v23 = vld [vmem:[%s1048_s23 + $0x1a8] sm:$0xff] }
  0x18   : > { %v192_v16 = vld [vmem:[%s1048_s23 + $0x18] sm:$0xff]  ;;  %v193_v20 = vld [vmem:[%s1048_s23 + $0x20] sm:$0xff]  ;;  %v194_v24 = vld [vmem:[%s1048_s23 + $0x28] sm:$0xff] }
  0x19   : > { %v208_v17 = vld [vmem:[%s1048_s23 + $0x98] sm:$0xff]  ;;  %v209_v21 = vld [vmem:[%s1048_s23 + $0xa0] sm:$0xff]  ;;  %v210_v25 = vld [vmem:[%s1048_s23 + $0xa8] sm:$0xff] }
  0x1a   : > { %v227_v26 = vld [vmem:[%s1048_s23 + $0x130] sm:$0xff]  ;;  %v228_v30 = vld [vmem:[%s1048_s23 + $0x138] sm:$0xff]  ;;  %v229_v34 = vld [vmem:[%s1048_s23 + $0x140] sm:$0xff] }
  0x1b   : > { %907 = vmatmul.msk.f32.gmra.mxu2 %vm259_vm1, %v222_v6  ;;  %v243_v27 = vld [vmem:[%s1048_s23 + $0x1b0] sm:$0xff]  ;;  %v244_v31 = vld [vmem:[%s1048_s23 + $0x1b8] sm:$0xff]  ;;  %v245_v35 = vld [vmem:[%s1048_s23 + $0x1c0] sm:$0xff] }
  0x1c   : > { %923 = vmatmul.msk.f32.gmra.mxu3 %vm259_vm1, %v238_v7  ;;  %v195_v28 = vld [vmem:[%s1048_s23 + $0x30] sm:$0xff]  ;;  %v196_v32 = vld [vmem:[%s1048_s23 + $0x38] sm:$0xff]  ;;  %v197_v36 = vld [vmem:[%s1048_s23 + $0x40] sm:$0xff] }
  0x1d   : > { %875 = vmatmul.msk.f32.gmra.mxu0 %vm259_vm1, %v190_v8  ;;  %v211_v29 = vld [vmem:[%s1048_s23 + $0xb0] sm:$0xff]  ;;  %v212_v33 = vld [vmem:[%s1048_s23 + $0xb8] sm:$0xff]  ;;  %v213_v37 = vld [vmem:[%s1048_s23 + $0xc0] sm:$0xff] }
  0x1e   : > { %891 = vmatmul.msk.f32.gmra.mxu1 %vm259_vm1, %v206_v9  ;;  %v230_v38 = vld [vmem:[%s1048_s23 + $0x148] sm:$0xff]  ;;  %v231_v42 = vld [vmem:[%s1048_s23 + $0x150] sm:$0xff]  ;;  %v232_v46 = vld [vmem:[%s1048_s23 + $0x158] sm:$0xff] }
  0x1f   : > { %v246_v39 = vld [vmem:[%s1048_s23 + $0x1c8] sm:$0xff]  ;;  %v247_v43 = vld [vmem:[%s1048_s23 + $0x1d0] sm:$0xff]  ;;  %v248_v47 = vld [vmem:[%s1048_s23 + $0x1d8] sm:$0xff] }
  0x20   : > { %v198_v40 = vld [vmem:[%s1048_s23 + $0x48] sm:$0xff]  ;;  %v199_v44 = vld [vmem:[%s1048_s23 + $0x50] sm:$0xff]  ;;  %v200_v48 = vld [vmem:[%s1048_s23 + $0x58] sm:$0xff] }
  0x21   : > { %v214_v41 = vld [vmem:[%s1048_s23 + $0xc8] sm:$0xff]  ;;  %v215_v45 = vld [vmem:[%s1048_s23 + $0xd0] sm:$0xff]  ;;  %v216_v49 = vld [vmem:[%s1048_s23 + $0xd8] sm:$0xff] }
  0x22   : > { %v233_v50 = vld [vmem:[%s1048_s23 + $0x160] sm:$0xff]  ;;  %v234_v54 = vld [vmem:[%s1048_s23 + $0x168] sm:$0xff]  ;;  %v235_v58 = vld [vmem:[%s1048_s23 + $0x170] sm:$0xff] }
  0x23   : > { %908 = vmatmul.msk.f32.gmra.mxu2 %vm259_vm1, %v223_v10  ;;  %v249_v51 = vld [vmem:[%s1048_s23 + $0x1e0] sm:$0xff]  ;;  %v250_v55 = vld [vmem:[%s1048_s23 + $0x1e8] sm:$0xff]  ;;  %v251_v59 = vld [vmem:[%s1048_s23 + $0x1f0] sm:$0xff] }
  0x24   : > { %924 = vmatmul.msk.f32.gmra.mxu3 %vm259_vm1, %v239_v11  ;;  %v201_v52 = vld [vmem:[%s1048_s23 + $0x60] sm:$0xff]  ;;  %v202_v56 = vld [vmem:[%s1048_s23 + $0x68] sm:$0xff]  ;;  %v203_v60 = vld [vmem:[%s1048_s23 + $0x70] sm:$0xff] }
  0x25   : > { %876 = vmatmul.msk.f32.gmra.mxu0 %vm259_vm1, %v191_v12  ;;  %v217_v53 = vld [vmem:[%s1048_s23 + $0xe0] sm:$0xff]  ;;  %v218_v57 = vld [vmem:[%s1048_s23 + $0xe8] sm:$0xff]  ;;  %v219_v61 = vld [vmem:[%s1048_s23 + $0xf0] sm:$0xff] }
  0x26   : > { %892 = vmatmul.msk.f32.gmra.mxu1 %vm259_vm1, %v207_v13  ;;  %v236_v62 = vld [vmem:[%s1048_s23 + $0x178] sm:$0xff]  ;;  %v1184_v2 = vld [vmem:[#allocation2] ss:$0 sm:$0xff] }
  0x27   : > { %v252_v63 = vld [vmem:[%s1048_s23 + $0x1f8] sm:$0xff] }
  0x28   : > { %v204_v0 = vld [vmem:[%s1048_s23 + $0x78] sm:$0xff] }
  0x29   : > { %v220_v1 = vld [vmem:[%s1048_s23 + $0xf8] sm:$0xff] }
  0x2b   : > { %909 = vmatmul.msk.f32.gmra.mxu2 %vm259_vm1, %v224_v14 }
  0x2c   : > { %925 = vmatmul.msk.f32.gmra.mxu3 %vm259_vm1, %v240_v15 }
  0x2d   : > { %877 = vmatmul.msk.f32.gmra.mxu0 %vm259_vm1, %v192_v16 }
  0x2e   : > { %893 = vmatmul.msk.f32.gmra.mxu1 %vm259_vm1, %v208_v17 }
  0x33   : > { %910 = vmatmul.msk.f32.gmra.mxu2 %vm259_vm1, %v225_v18 }
  0x34   : > { %926 = vmatmul.msk.f32.gmra.mxu3 %vm259_vm1, %v241_v19 }
  0x35   : > { %878 = vmatmul.msk.f32.gmra.mxu0 %vm259_vm1, %v193_v20 }
  0x36   : > { %894 = vmatmul.msk.f32.gmra.mxu1 %vm259_vm1, %v209_v21 }
  0x3b   : > { %911 = vmatmul.msk.f32.gmra.mxu2 %vm259_vm1, %v226_v22 }
  0x3c   : > { %927 = vmatmul.msk.f32.gmra.mxu3 %vm259_vm1, %v242_v23 }
  0x3d   : > { %879 = vmatmul.msk.f32.gmra.mxu0 %vm259_vm1, %v194_v24 }
  0x3e   : > { %895 = vmatmul.msk.f32.gmra.mxu1 %vm259_vm1, %v210_v25 }
  0x43   : > { %912 = vmatmul.msk.f32.gmra.mxu2 %vm259_vm1, %v227_v26 }
  0x44   : > { %928 = vmatmul.msk.f32.gmra.mxu3 %vm259_vm1, %v243_v27 }
  0x45   : > { %880 = vmatmul.msk.f32.gmra.mxu0 %vm259_vm1, %v195_v28 }
  0x46   : > { %896 = vmatmul.msk.f32.gmra.mxu1 %vm259_vm1, %v211_v29 }
  0x4b   : > { %913 = vmatmul.msk.f32.gmra.mxu2 %vm259_vm1, %v228_v30 }
  0x4c   : > { %929 = vmatmul.msk.f32.gmra.mxu3 %vm259_vm1, %v244_v31 }
  0x4d   : > { %881 = vmatmul.msk.f32.gmra.mxu0 %vm259_vm1, %v196_v32 }
  0x4e   : > { %897 = vmatmul.msk.f32.gmra.mxu1 %vm259_vm1, %v212_v33 }
  0x53   : > { %914 = vmatmul.msk.f32.gmra.mxu2 %vm259_vm1, %v229_v34 }
  0x54   : > { %930 = vmatmul.msk.f32.gmra.mxu3 %vm259_vm1, %v245_v35 }
  0x55   : > { %882 = vmatmul.msk.f32.gmra.mxu0 %vm259_vm1, %v197_v36 }
  0x56   : > { %898 = vmatmul.msk.f32.gmra.mxu1 %vm259_vm1, %v213_v37 }
  0x5b   : > { %915 = vmatmul.msk.f32.gmra.mxu2 %vm259_vm1, %v230_v38 }
  0x5c   : > { %931 = vmatmul.msk.f32.gmra.mxu3 %vm259_vm1, %v246_v39 }
  0x5d   : > { %883 = vmatmul.msk.f32.gmra.mxu0 %vm259_vm1, %v198_v40 }
  0x5e   : > { %899 = vmatmul.msk.f32.gmra.mxu1 %vm259_vm1, %v214_v41 }
  0x63   : > { %916 = vmatmul.msk.f32.gmra.mxu2 %vm259_vm1, %v231_v42 }
  0x64   : > { %932 = vmatmul.msk.f32.gmra.mxu3 %vm259_vm1, %v247_v43 }
  0x65   : > { %884 = vmatmul.msk.f32.gmra.mxu0 %vm259_vm1, %v199_v44 }
  0x66   : > { %900 = vmatmul.msk.f32.gmra.mxu1 %vm259_vm1, %v215_v45 }
  0x6b   : > { %917 = vmatmul.msk.f32.gmra.mxu2 %vm259_vm1, %v232_v46 }
  0x6c   : > { %933 = vmatmul.msk.f32.gmra.mxu3 %vm259_vm1, %v248_v47 }
  0x6d   : > { %885 = vmatmul.msk.f32.gmra.mxu0 %vm259_vm1, %v200_v48 }
  0x6e   : > { %901 = vmatmul.msk.f32.gmra.mxu1 %vm259_vm1, %v216_v49 }
  0x73   : > { %918 = vmatmul.msk.f32.gmra.mxu2 %vm259_vm1, %v233_v50 }
  0x74   : > { %934 = vmatmul.msk.f32.gmra.mxu3 %vm259_vm1, %v249_v51 }
  0x75   : > { %886 = vmatmul.msk.f32.gmra.mxu0 %vm259_vm1, %v201_v52 }
  0x76   : > { %902 = vmatmul.msk.f32.gmra.mxu1 %vm259_vm1, %v217_v53 }
  0x7b   : > { %919 = vmatmul.msk.f32.gmra.mxu2 %vm259_vm1, %v234_v54 }
  0x7c   : > { %935 = vmatmul.msk.f32.gmra.mxu3 %vm259_vm1, %v250_v55 }
  0x7d   : > { %887 = vmatmul.msk.f32.gmra.mxu0 %vm259_vm1, %v202_v56 }
  0x7e   : > { %903 = vmatmul.msk.f32.gmra.mxu1 %vm259_vm1, %v218_v57 }
  0x83   : > { %920 = vmatmul.msk.f32.gmra.mxu2 %vm259_vm1, %v235_v58 }
  0x84   : > { %936 = vmatmul.msk.f32.gmra.mxu3 %vm259_vm1, %v251_v59 }
  0x85   : > { %888 = vmatmul.msk.f32.gmra.mxu0 %vm259_vm1, %v203_v60 }
  0x86   : > { %904 = vmatmul.msk.f32.gmra.mxu1 %vm259_vm1, %v219_v61 }
  0x8b   : > { %921 = vmatmul.msk.f32.gmra.mxu2 %vm259_vm1, %v236_v62 }
  0x8c   : > { %937 = vmatmul.msk.f32.gmra.mxu3 %vm259_vm1, %v252_v63 }
  0x8d   : > { %889 = vmatmul.msk.f32.gmra.mxu0 %vm259_vm1, %v204_v0 }
  0x8e   : > { %905 = vmatmul.msk.f32.gmra.mxu1 %vm259_vm1, %v220_v1 }
  0x92   : > { %v473_v3 = vpop.f32.mrf.mxu0 }
  0x93   : > { %v521_v4 = vpop.f32.mrf.mxu1  ;;  %v474_v5 = vadd.f32 %v1184_v2, %v473_v3 }
  0x94   : > { %v522_v6 = vadd.f32 %v1184_v2, %v521_v4 }
  0x95   : > { %v665_v7 = vmax.f32 %v474_v5, 0.0 }
  0x96   : > { %v681_v8 = vmax.f32 %v522_v6, 0.0  ;;  %v569_v9 = vpop.f32.mrf.mxu2 }
  0x97   : > { %v617_v10 = vpop.f32.mrf.mxu3  ;;  %730 = vst.msk [vmem:[%s1193_s30] sm:$0xff] %vm729_vm2, %v665_v7  ;;  %v570_v11 = vadd.f32 %v1184_v2, %v569_v9 }
  0x98   : > { %v618_v12 = vadd.f32 %v1184_v2, %v617_v10  ;;  %746 = vst.msk [vmem:[%s1193_s30 + $0x80] sm:$0xff] %vm729_vm2, %v681_v8 }
  0x99   : > { %v697_v13 = vmax.f32 %v570_v11, 0.0 }
  0x9a   : > { %v713_v14 = vmax.f32 %v618_v12, 0.0  ;;  %v476_v15 = vpop.f32.mrf.mxu0 }
  0x9b   : > { %v524_v16 = vpop.f32.mrf.mxu1  ;;  %762 = vst.msk [vmem:[%s1193_s30 + $0x100] sm:$0xff] %vm729_vm2, %v697_v13  ;;  %v477_v17 = vadd.f32 %v1184_v2, %v476_v15 }
  0x9c   : > { %v525_v18 = vadd.f32 %v1184_v2, %v524_v16  ;;  %778 = vst.msk [vmem:[%s1193_s30 + $0x180] sm:$0xff] %vm729_vm2, %v713_v14 }
  0x9d   : > { %v666_v19 = vmax.f32 %v477_v17, 0.0 }
  0x9e   : > { %v682_v20 = vmax.f32 %v525_v18, 0.0  ;;  %v572_v21 = vpop.f32.mrf.mxu2 }
  0x9f   : > { %v620_v22 = vpop.f32.mrf.mxu3  ;;  %731 = vst.msk [vmem:[%s1193_s30 + $0x8] sm:$0xff] %vm729_vm2, %v666_v19  ;;  %v573_v23 = vadd.f32 %v1184_v2, %v572_v21 }
  0xa0   : > { %v621_v24 = vadd.f32 %v1184_v2, %v620_v22  ;;  %747 = vst.msk [vmem:[%s1193_s30 + $0x88] sm:$0xff] %vm729_vm2, %v682_v20 }
  0xa1   : > { %v698_v25 = vmax.f32 %v573_v23, 0.0 }
  0xa2   : > { %v714_v26 = vmax.f32 %v621_v24, 0.0  ;;  %v479_v27 = vpop.f32.mrf.mxu0 }
  0xa3   : > { %v527_v28 = vpop.f32.mrf.mxu1  ;;  %763 = vst.msk [vmem:[%s1193_s30 + $0x108] sm:$0xff] %vm729_vm2, %v698_v25  ;;  %v480_v29 = vadd.f32 %v1184_v2, %v479_v27 }
  0xa4   : > { %v528_v30 = vadd.f32 %v1184_v2, %v527_v28  ;;  %779 = vst.msk [vmem:[%s1193_s30 + $0x188] sm:$0xff] %vm729_vm2, %v714_v26 }
  0xa5   : > { %v667_v31 = vmax.f32 %v480_v29, 0.0 }
  0xa6   : > { %v683_v32 = vmax.f32 %v528_v30, 0.0  ;;  %v575_v33 = vpop.f32.mrf.mxu2 }
  0xa7   : > { %v623_v34 = vpop.f32.mrf.mxu3  ;;  %732 = vst.msk [vmem:[%s1193_s30 + $0x10] sm:$0xff] %vm729_vm2, %v667_v31  ;;  %v576_v35 = vadd.f32 %v1184_v2, %v575_v33 }
  0xa8   : > { %v624_v36 = vadd.f32 %v1184_v2, %v623_v34  ;;  %748 = vst.msk [vmem:[%s1193_s30 + $0x90] sm:$0xff] %vm729_vm2, %v683_v32 }
  0xa9   : > { %v699_v37 = vmax.f32 %v576_v35, 0.0 }
  0xaa   : > { %v715_v38 = vmax.f32 %v624_v36, 0.0  ;;  %v482_v39 = vpop.f32.mrf.mxu0 }
  0xab   : > { %v530_v40 = vpop.f32.mrf.mxu1  ;;  %764 = vst.msk [vmem:[%s1193_s30 + $0x110] sm:$0xff] %vm729_vm2, %v699_v37  ;;  %v483_v41 = vadd.f32 %v1184_v2, %v482_v39 }
  0xac   : > { %v531_v42 = vadd.f32 %v1184_v2, %v530_v40  ;;  %780 = vst.msk [vmem:[%s1193_s30 + $0x190] sm:$0xff] %vm729_vm2, %v715_v38 }
  0xad   : > { %v668_v43 = vmax.f32 %v483_v41, 0.0 }
  0xae   : > { %v684_v44 = vmax.f32 %v531_v42, 0.0  ;;  %v578_v45 = vpop.f32.mrf.mxu2 }
  0xaf   : > { %v626_v46 = vpop.f32.mrf.mxu3  ;;  %733 = vst.msk [vmem:[%s1193_s30 + $0x18] sm:$0xff] %vm729_vm2, %v668_v43  ;;  %v579_v47 = vadd.f32 %v1184_v2, %v578_v45 }
  0xb0   : > { %v627_v48 = vadd.f32 %v1184_v2, %v626_v46  ;;  %749 = vst.msk [vmem:[%s1193_s30 + $0x98] sm:$0xff] %vm729_vm2, %v684_v44 }
  0xb1   : > { %v700_v49 = vmax.f32 %v579_v47, 0.0 }
  0xb2   : > { %v716_v50 = vmax.f32 %v627_v48, 0.0  ;;  %v485_v51 = vpop.f32.mrf.mxu0 }
  0xb3   : > { %v533_v52 = vpop.f32.mrf.mxu1  ;;  %765 = vst.msk [vmem:[%s1193_s30 + $0x118] sm:$0xff] %vm729_vm2, %v700_v49  ;;  %v486_v53 = vadd.f32 %v1184_v2, %v485_v51 }
  0xb4   : > { %v534_v54 = vadd.f32 %v1184_v2, %v533_v52  ;;  %781 = vst.msk [vmem:[%s1193_s30 + $0x198] sm:$0xff] %vm729_vm2, %v716_v50 }
  0xb5   : > { %v669_v55 = vmax.f32 %v486_v53, 0.0 }
  0xb6   : > { %v685_v56 = vmax.f32 %v534_v54, 0.0  ;;  %v581_v57 = vpop.f32.mrf.mxu2 }
  0xb7   : > { %v629_v58 = vpop.f32.mrf.mxu3  ;;  %734 = vst.msk [vmem:[%s1193_s30 + $0x20] sm:$0xff] %vm729_vm2, %v669_v55  ;;  %v582_v59 = vadd.f32 %v1184_v2, %v581_v57 }
  0xb8   : > { %v630_v60 = vadd.f32 %v1184_v2, %v629_v58  ;;  %750 = vst.msk [vmem:[%s1193_s30 + $0xa0] sm:$0xff] %vm729_vm2, %v685_v56 }
  0xb9   : > { %v701_v61 = vmax.f32 %v582_v59, 0.0 }
  0xba   : > { %v717_v62 = vmax.f32 %v630_v60, 0.0  ;;  %v488_v63 = vpop.f32.mrf.mxu0 }
  0xbb   : > { %v536_v0 = vpop.f32.mrf.mxu1  ;;  %766 = vst.msk [vmem:[%s1193_s30 + $0x120] sm:$0xff] %vm729_vm2, %v701_v61  ;;  %v489_v1 = vadd.f32 %v1184_v2, %v488_v63 }
  0xbc   : > { %v537_v3 = vadd.f32 %v1184_v2, %v536_v0  ;;  %782 = vst.msk [vmem:[%s1193_s30 + $0x1a0] sm:$0xff] %vm729_vm2, %v717_v62 }
  0xbd   : > { %v670_v4 = vmax.f32 %v489_v1, 0.0 }
  0xbe   : > { %v686_v5 = vmax.f32 %v537_v3, 0.0  ;;  %v584_v6 = vpop.f32.mrf.mxu2 }
  0xbf   : > { %v632_v7 = vpop.f32.mrf.mxu3  ;;  %735 = vst.msk [vmem:[%s1193_s30 + $0x28] sm:$0xff] %vm729_vm2, %v670_v4  ;;  %v585_v8 = vadd.f32 %v1184_v2, %v584_v6 }
  0xc0   : > { %v633_v9 = vadd.f32 %v1184_v2, %v632_v7  ;;  %751 = vst.msk [vmem:[%s1193_s30 + $0xa8] sm:$0xff] %vm729_vm2, %v686_v5 }
  0xc1   : > { %v702_v10 = vmax.f32 %v585_v8, 0.0 }
  0xc2   : > { %v718_v11 = vmax.f32 %v633_v9, 0.0  ;;  %v491_v12 = vpop.f32.mrf.mxu0 }
  0xc3   : > { %v539_v13 = vpop.f32.mrf.mxu1  ;;  %767 = vst.msk [vmem:[%s1193_s30 + $0x128] sm:$0xff] %vm729_vm2, %v702_v10  ;;  %v492_v14 = vadd.f32 %v1184_v2, %v491_v12 }
  0xc4   : > { %v540_v15 = vadd.f32 %v1184_v2, %v539_v13  ;;  %783 = vst.msk [vmem:[%s1193_s30 + $0x1a8] sm:$0xff] %vm729_vm2, %v718_v11 }
  0xc5   : > { %v671_v16 = vmax.f32 %v492_v14, 0.0 }
  0xc6   : > { %v687_v17 = vmax.f32 %v540_v15, 0.0  ;;  %v587_v18 = vpop.f32.mrf.mxu2 }
  0xc7   : > { %v635_v19 = vpop.f32.mrf.mxu3  ;;  %736 = vst.msk [vmem:[%s1193_s30 + $0x30] sm:$0xff] %vm729_vm2, %v671_v16  ;;  %v588_v20 = vadd.f32 %v1184_v2, %v587_v18 }
  0xc8   : > { %v636_v21 = vadd.f32 %v1184_v2, %v635_v19  ;;  %752 = vst.msk [vmem:[%s1193_s30 + $0xb0] sm:$0xff] %vm729_vm2, %v687_v17 }
  0xc9   : > { %v703_v22 = vmax.f32 %v588_v20, 0.0 }
  0xca   : > { %v719_v23 = vmax.f32 %v636_v21, 0.0  ;;  %v494_v24 = vpop.f32.mrf.mxu0 }
  0xcb   : > { %v542_v25 = vpop.f32.mrf.mxu1  ;;  %768 = vst.msk [vmem:[%s1193_s30 + $0x130] sm:$0xff] %vm729_vm2, %v703_v22  ;;  %v495_v26 = vadd.f32 %v1184_v2, %v494_v24 }
  0xcc   : > { %v543_v27 = vadd.f32 %v1184_v2, %v542_v25  ;;  %784 = vst.msk [vmem:[%s1193_s30 + $0x1b0] sm:$0xff] %vm729_vm2, %v719_v23 }
  0xcd   : > { %v672_v28 = vmax.f32 %v495_v26, 0.0 }
  0xce   : > { %v688_v29 = vmax.f32 %v543_v27, 0.0  ;;  %v590_v30 = vpop.f32.mrf.mxu2 }
  0xcf   : > { %v638_v31 = vpop.f32.mrf.mxu3  ;;  %737 = vst.msk [vmem:[%s1193_s30 + $0x38] sm:$0xff] %vm729_vm2, %v672_v28  ;;  %v591_v32 = vadd.f32 %v1184_v2, %v590_v30 }
  0xd0   : > { %v639_v33 = vadd.f32 %v1184_v2, %v638_v31  ;;  %753 = vst.msk [vmem:[%s1193_s30 + $0xb8] sm:$0xff] %vm729_vm2, %v688_v29 }
  0xd1   : > { %v704_v34 = vmax.f32 %v591_v32, 0.0 }
  0xd2   : > { %v720_v35 = vmax.f32 %v639_v33, 0.0  ;;  %v497_v36 = vpop.f32.mrf.mxu0 }
  0xd3   : > { %v545_v37 = vpop.f32.mrf.mxu1  ;;  %769 = vst.msk [vmem:[%s1193_s30 + $0x138] sm:$0xff] %vm729_vm2, %v704_v34  ;;  %v498_v38 = vadd.f32 %v1184_v2, %v497_v36 }
  0xd4   : > { %v546_v39 = vadd.f32 %v1184_v2, %v545_v37  ;;  %785 = vst.msk [vmem:[%s1193_s30 + $0x1b8] sm:$0xff] %vm729_vm2, %v720_v35 }
  0xd5   : > { %v673_v40 = vmax.f32 %v498_v38, 0.0 }
  0xd6   : > { %v689_v41 = vmax.f32 %v546_v39, 0.0  ;;  %v593_v42 = vpop.f32.mrf.mxu2 }
  0xd7   : > { %v641_v43 = vpop.f32.mrf.mxu3  ;;  %738 = vst.msk [vmem:[%s1193_s30 + $0x40] sm:$0xff] %vm729_vm2, %v673_v40  ;;  %v594_v44 = vadd.f32 %v1184_v2, %v593_v42 }
  0xd8   : > { %v642_v45 = vadd.f32 %v1184_v2, %v641_v43  ;;  %754 = vst.msk [vmem:[%s1193_s30 + $0xc0] sm:$0xff] %vm729_vm2, %v689_v41 }
  0xd9   : > { %v705_v46 = vmax.f32 %v594_v44, 0.0 }
  0xda   : > { %v721_v47 = vmax.f32 %v642_v45, 0.0  ;;  %v500_v48 = vpop.f32.mrf.mxu0 }
  0xdb   : > { %v548_v49 = vpop.f32.mrf.mxu1  ;;  %770 = vst.msk [vmem:[%s1193_s30 + $0x140] sm:$0xff] %vm729_vm2, %v705_v46  ;;  %v501_v50 = vadd.f32 %v1184_v2, %v500_v48 }
  0xdc   : > { %v549_v51 = vadd.f32 %v1184_v2, %v548_v49  ;;  %786 = vst.msk [vmem:[%s1193_s30 + $0x1c0] sm:$0xff] %vm729_vm2, %v721_v47 }
  0xdd   : > { %v674_v52 = vmax.f32 %v501_v50, 0.0 }
  0xde   : > { %v690_v53 = vmax.f32 %v549_v51, 0.0  ;;  %v596_v54 = vpop.f32.mrf.mxu2 }
  0xdf   : > { %v644_v55 = vpop.f32.mrf.mxu3  ;;  %739 = vst.msk [vmem:[%s1193_s30 + $0x48] sm:$0xff] %vm729_vm2, %v674_v52  ;;  %v597_v56 = vadd.f32 %v1184_v2, %v596_v54 }
  0xe0   : > { %v645_v57 = vadd.f32 %v1184_v2, %v644_v55  ;;  %755 = vst.msk [vmem:[%s1193_s30 + $0xc8] sm:$0xff] %vm729_vm2, %v690_v53 }
  0xe1   : > { %v706_v58 = vmax.f32 %v597_v56, 0.0 }
  0xe2   : > { %v722_v59 = vmax.f32 %v645_v57, 0.0  ;;  %v503_v60 = vpop.f32.mrf.mxu0 }
  0xe3   : > { %v551_v61 = vpop.f32.mrf.mxu1  ;;  %771 = vst.msk [vmem:[%s1193_s30 + $0x148] sm:$0xff] %vm729_vm2, %v706_v58  ;;  %v504_v62 = vadd.f32 %v1184_v2, %v503_v60 }
  0xe4   : > { %v552_v63 = vadd.f32 %v1184_v2, %v551_v61  ;;  %787 = vst.msk [vmem:[%s1193_s30 + $0x1c8] sm:$0xff] %vm729_vm2, %v722_v59 }
  0xe5   : > { %v675_v0 = vmax.f32 %v504_v62, 0.0 }
  0xe6   : > { %v691_v1 = vmax.f32 %v552_v63, 0.0  ;;  %v599_v3 = vpop.f32.mrf.mxu2 }
  0xe7   : > { %v647_v4 = vpop.f32.mrf.mxu3  ;;  %740 = vst.msk [vmem:[%s1193_s30 + $0x50] sm:$0xff] %vm729_vm2, %v675_v0  ;;  %v600_v5 = vadd.f32 %v1184_v2, %v599_v3 }
  0xe8   : > { %v648_v6 = vadd.f32 %v1184_v2, %v647_v4  ;;  %756 = vst.msk [vmem:[%s1193_s30 + $0xd0] sm:$0xff] %vm729_vm2, %v691_v1 }
  0xe9   : > { %v707_v7 = vmax.f32 %v600_v5, 0.0 }
  0xea   : > { %v723_v8 = vmax.f32 %v648_v6, 0.0  ;;  %v506_v9 = vpop.f32.mrf.mxu0 }
  0xeb   : > { %v554_v10 = vpop.f32.mrf.mxu1  ;;  %772 = vst.msk [vmem:[%s1193_s30 + $0x150] sm:$0xff] %vm729_vm2, %v707_v7  ;;  %v507_v11 = vadd.f32 %v1184_v2, %v506_v9 }
  0xec   : > { %v555_v12 = vadd.f32 %v1184_v2, %v554_v10  ;;  %788 = vst.msk [vmem:[%s1193_s30 + $0x1d0] sm:$0xff] %vm729_vm2, %v723_v8 }
  0xed   : > { %v676_v13 = vmax.f32 %v507_v11, 0.0 }
  0xee   : > { %v692_v14 = vmax.f32 %v555_v12, 0.0  ;;  %v602_v15 = vpop.f32.mrf.mxu2 }
  0xef   : > { %v650_v16 = vpop.f32.mrf.mxu3  ;;  %741 = vst.msk [vmem:[%s1193_s30 + $0x58] sm:$0xff] %vm729_vm2, %v676_v13  ;;  %v603_v17 = vadd.f32 %v1184_v2, %v602_v15 }
  0xf0   : > { %v651_v18 = vadd.f32 %v1184_v2, %v650_v16  ;;  %757 = vst.msk [vmem:[%s1193_s30 + $0xd8] sm:$0xff] %vm729_vm2, %v692_v14 }
  0xf1   : > { %v708_v19 = vmax.f32 %v603_v17, 0.0 }
  0xf2   : > { %v724_v20 = vmax.f32 %v651_v18, 0.0  ;;  %v509_v21 = vpop.f32.mrf.mxu0 }
  0xf3   : > { %v557_v22 = vpop.f32.mrf.mxu1  ;;  %773 = vst.msk [vmem:[%s1193_s30 + $0x158] sm:$0xff] %vm729_vm2, %v708_v19  ;;  %v510_v23 = vadd.f32 %v1184_v2, %v509_v21 }
  0xf4   : > { %v558_v24 = vadd.f32 %v1184_v2, %v557_v22  ;;  %789 = vst.msk [vmem:[%s1193_s30 + $0x1d8] sm:$0xff] %vm729_vm2, %v724_v20 }
  0xf5   : > { %v677_v25 = vmax.f32 %v510_v23, 0.0 }
  0xf6   : > { %v693_v26 = vmax.f32 %v558_v24, 0.0  ;;  %v605_v27 = vpop.f32.mrf.mxu2 }
  0xf7   : > { %v653_v28 = vpop.f32.mrf.mxu3  ;;  %742 = vst.msk [vmem:[%s1193_s30 + $0x60] sm:$0xff] %vm729_vm2, %v677_v25  ;;  %v606_v29 = vadd.f32 %v1184_v2, %v605_v27 }
  0xf8   : > { %v654_v30 = vadd.f32 %v1184_v2, %v653_v28  ;;  %758 = vst.msk [vmem:[%s1193_s30 + $0xe0] sm:$0xff] %vm729_vm2, %v693_v26 }
  0xf9   : > { %v709_v31 = vmax.f32 %v606_v29, 0.0 }
  0xfa   : > { %v725_v32 = vmax.f32 %v654_v30, 0.0  ;;  %v512_v33 = vpop.f32.mrf.mxu0 }
  0xfb   : > { %v560_v34 = vpop.f32.mrf.mxu1  ;;  %774 = vst.msk [vmem:[%s1193_s30 + $0x160] sm:$0xff] %vm729_vm2, %v709_v31  ;;  %v513_v35 = vadd.f32 %v1184_v2, %v512_v33 }
  0xfc   : > { %v561_v36 = vadd.f32 %v1184_v2, %v560_v34  ;;  %790 = vst.msk [vmem:[%s1193_s30 + $0x1e0] sm:$0xff] %vm729_vm2, %v725_v32 }
  0xfd   : > { %v678_v37 = vmax.f32 %v513_v35, 0.0 }
  0xfe   : > { %v694_v38 = vmax.f32 %v561_v36, 0.0  ;;  %v608_v39 = vpop.f32.mrf.mxu2 }
  0xff   : > { %v656_v40 = vpop.f32.mrf.mxu3  ;;  %743 = vst.msk [vmem:[%s1193_s30 + $0x68] sm:$0xff] %vm729_vm2, %v678_v37  ;;  %v609_v41 = vadd.f32 %v1184_v2, %v608_v39 }
 0x100   : > { %v657_v42 = vadd.f32 %v1184_v2, %v656_v40  ;;  %759 = vst.msk [vmem:[%s1193_s30 + $0xe8] sm:$0xff] %vm729_vm2, %v694_v38 }
 0x101   : > { %v710_v43 = vmax.f32 %v609_v41, 0.0 }
 0x102   : > { %v726_v44 = vmax.f32 %v657_v42, 0.0  ;;  %v515_v45 = vpop.f32.mrf.mxu0 }
 0x103   : > { %v563_v46 = vpop.f32.mrf.mxu1  ;;  %775 = vst.msk [vmem:[%s1193_s30 + $0x168] sm:$0xff] %vm729_vm2, %v710_v43  ;;  %v516_v47 = vadd.f32 %v1184_v2, %v515_v45 }
 0x104   : > { %v564_v48 = vadd.f32 %v1184_v2, %v563_v46  ;;  %791 = vst.msk [vmem:[%s1193_s30 + $0x1e8] sm:$0xff] %vm729_vm2, %v726_v44 }
 0x105   : > { %v679_v49 = vmax.f32 %v516_v47, 0.0 }
 0x106   : > { %v695_v50 = vmax.f32 %v564_v48, 0.0  ;;  %v611_v51 = vpop.f32.mrf.mxu2 }
 0x107   : > { %v659_v52 = vpop.f32.mrf.mxu3  ;;  %744 = vst.msk [vmem:[%s1193_s30 + $0x70] sm:$0xff] %vm729_vm2, %v679_v49  ;;  %v612_v53 = vadd.f32 %v1184_v2, %v611_v51 }
 0x108   : > { %v660_v54 = vadd.f32 %v1184_v2, %v659_v52  ;;  %760 = vst.msk [vmem:[%s1193_s30 + $0xf0] sm:$0xff] %vm729_vm2, %v695_v50 }
 0x109   : > { %v711_v55 = vmax.f32 %v612_v53, 0.0 }
 0x10a   : > { %v727_v56 = vmax.f32 %v660_v54, 0.0  ;;  %v518_v57 = vpop.f32.mrf.mxu0 }
 0x10b   : > { %v566_v58 = vpop.f32.mrf.mxu1  ;;  %776 = vst.msk [vmem:[%s1193_s30 + $0x170] sm:$0xff] %vm729_vm2, %v711_v55  ;;  %v519_v59 = vadd.f32 %v1184_v2, %v518_v57 }
 0x10c   : > { %v567_v60 = vadd.f32 %v1184_v2, %v566_v58  ;;  %792 = vst.msk [vmem:[%s1193_s30 + $0x1f0] sm:$0xff] %vm729_vm2, %v727_v56 }
 0x10d   : > { %v680_v61 = vmax.f32 %v519_v59, 0.0 }
 0x10e   : > { %v696_v62 = vmax.f32 %v567_v60, 0.0  ;;  %v614_v63 = vpop.f32.mrf.mxu2 }
 0x10f   : > { %v662_v0 = vpop.f32.mrf.mxu3  ;;  %745 = vst.msk [vmem:[%s1193_s30 + $0x78] sm:$0xff] %vm729_vm2, %v680_v61  ;;  %v615_v1 = vadd.f32 %v1184_v2, %v614_v63 }
 0x110   : > { %v663_v3 = vadd.f32 %v1184_v2, %v662_v0  ;;  %761 = vst.msk [vmem:[%s1193_s30 + $0xf8] sm:$0xff] %vm729_vm2, %v696_v62 }
 0x111   : > { %v712_v4 = vmax.f32 %v615_v1, 0.0 }
 0x112   : > { %v728_v5 = vmax.f32 %v663_v3, 0.0 }
 0x113   : > { %777 = vst.msk [vmem:[%s1193_s30 + $0x178] sm:$0xff] %vm729_vm2, %v712_v4 }
 0x114   : > { %793 = vst.msk [vmem:[%s1193_s30 + $0x1f8] sm:$0xff] %vm729_vm2, %v728_v5 }
 0x115 PF: > { %s14_s12 = sadd.s32 1, %s1006_s12  }
 0x116   : > { %p11_p7 = scmp.ge.s32.totalorder %s14_s12, 5  }
 0x118   :  { %13 = sbr.rel (!%p11_p7) target bundleno = 1 (0x1), region = 67 }
 0x11d   :  { %816 = vsyncpa [#allocation3], 1 }
 0x11e   :  { %818 = vsyncpa [#allocation3 + $0x1], 1 }

// kernel: net_forward.4
= control target key start
LH: loop header
LB: loop body
LE: loop exit
PB: predicated region body
PF: predicated region fallthrough
CT: control target
= control target key end

     0   :  { %s1700_s12 = smov 0   ;;  %s2685_s0 = inlined_call_operand.vmem [shape: f32[2,576,288], index: 0, kind: input, shape index: {}]   ;;  %s2686_s1 = inlined_call_operand.vmem [shape: f32[288,64], index: 1, kind: input, shape index: {}]   ;;  %s2687_s2 = inlined_call_operand.vmem [shape: f32[1,64], index: 2, kind: input, shape index: {}]   ;;  %s2688_s3 = inlined_call_operand.vmem [shape: f32[2,144,64], index: 3, kind: output, shape index: {}]  }
   0x1 LB: > { %s1543_s13 = sadd.s32 4294967295, %s1678_s12   ;;  %p1547_p0 = scmp.ge.s32.totalorder %s1678_s12, 1  ;;  %s1678_s12 = sphi %s1700_s12, %s13_s12  }
   0x2   : > { %p137_p1 = scmp.lt.s32.totalorder %s1678_s12, 3 }
   0x4   : > { %p138_p2 = pnand %p1547_p0, %p137_p1 }
   0x6   : > { %141 = sbr.rel (%p138_p2) target bundleno = 610 (0x262), region = 32 }
   0xb   : > { %v402_v0 = vld [vmem:[%s2686_s1 + $0x78] sm:$0xff]  ;;  %v401_v2 = vld [vmem:[%s2686_s1 + $0x70] sm:$0xff]  ;;  %p161_p3 = scmp.lt.s32.totalorder %s1543_s13, 1  ;;  %v400_v5 = vld [vmem:[%s2686_s1 + $0x68] sm:$0xff]  ;;  %vm427_vm0 = vcmask 261120   ;;  %vm1469_vm1 = vcmask 523264  }
   0xc   : > { %v1714_v1 = vld [vmem:[%s2686_s1 + $0x118] sm:$0xff]  ;;  %644 = vmatpush.msra.mxu0 %v402_v0  ;;  %1624 = vmatpush.msra.mxu3 %v402_v0  ;;  %v1727_v4 = vld [vmem:[%s2686_s1 + $0x110] sm:$0xff]  ;;  %v1744_v7 = vld [vmem:[%s2686_s1 + $0x108] sm:$0xff] }
   0xd   : > { %v1722_v3 = vld [vmem:[%s2686_s1 + $0xf8] sm:$0xff]  ;;  %1122 = vmatpush.msra.mxu2 %v1714_v1  ;;  %v1737_v6 = vld [vmem:[%s2686_s1 + $0xf0] sm:$0xff]  ;;  %s2742_s13 = smov (!%p161_p3, %s1543_s13), 1  ;;  %v1749_v8 = vld [vmem:[%s2686_s1 + $0xe8] sm:$0xff] }
   0xe   : > { %877 = vmatpush.msra.mxu1 %v1722_v3  ;;  %645 = vmatpush.msra.mxu0 %v401_v2  ;;  %v399_v9 = vld [vmem:[%s2686_s1 + $0x60] sm:$0xff]  ;;  %s1660_s7 = smul.u32 1728, %s2742_s13  ;;  %v398_v12 = vld [vmem:[%s2686_s1 + $0x58] sm:$0xff]  ;;  %v397_v15 = vld [vmem:[%s2686_s1 + $0x50] sm:$0xff] }
   0xf   : > { %1625 = vmatpush.msra.mxu3 %v401_v2  ;;  %1123 = vmatpush.msra.mxu2 %v1727_v4  ;;  %v1760_v10 = vld [vmem:[%s2686_s1 + $0x100] sm:$0xff]  ;;  %v1781_v14 = vld [vmem:[%s2686_s1 + $0xd8] sm:$0xff]  ;;  %v1792_v16 = vld [vmem:[%s2686_s1 + $0xd0] sm:$0xff] }
  0x10   : > { %878 = vmatpush.msra.mxu1 %v1737_v6  ;;  %646 = vmatpush.msra.mxu0 %v400_v5  ;;  %v1765_v11 = vld [vmem:[%s2686_s1 + $0xe0] sm:$0xff]  ;;  %s1772_s16 = scalar_lea.vmem %s2685_s0, %s1660_s7  ;;  %v396_v17 = vld [vmem:[%s2686_s1 + $0x48] sm:$0xff]  ;;  %v394_v22 = vld [vmem:[%s2686_s1 + $0x38] sm:$0xff] }
  0x11   : > { %1626 = vmatpush.msra.mxu3 %v400_v5  ;;  %1124 = vmatpush.msra.mxu2 %v1744_v7  ;;  %v173_v13 = vld [vmem:[%s1772_s16 + $0x10] sm:$0xff]  ;;  %v1801_v18 = vld [vmem:[%s2686_s1 + $0xc8] sm:$0xff]  ;;  %v395_v19 = vld [vmem:[%s2686_s1 + $0x40] sm:$0xff] }
  0x12   : > { %879 = vmatpush.msra.mxu1 %v1749_v8  ;;  %647 = vmatpush.msra.mxu0 %v399_v9  ;;  %v1810_v20 = vld [vmem:[%s2686_s1 + $0xc0] sm:$0xff]  ;;  %v176_v21 = vld [vmem:[%s1772_s16 + $0x28] sm:$0xff]  ;;  %v1820_v23 = vld [vmem:[%s2686_s1 + $0xb8] sm:$0xff] }
  0x13   : > { %1627 = vmatpush.msra.mxu3 %v399_v9  ;;  %1125 = vmatpush.msra.mxu2 %v1760_v10  ;;  %v393_v24 = vld [vmem:[%s2686_s1 + $0x30] sm:$0xff]  ;;  %v392_v26 = vld [vmem:[%s2686_s1 + $0x28] sm:$0xff]  ;;  %v391_v28 = vld [vmem:[%s2686_s1 + $0x20] sm:$0xff] }
  0x14   : > { %880 = vmatpush.msra.mxu1 %v1765_v11  ;;  %1550 = vmatmul.msk.f32.vlgmr.msra.gmra.mxu2 %vm427_vm0, %v173_v13  ;;  %v1830_v25 = vld [vmem:[%s2686_s1 + $0xb0] sm:$0xff]  ;;  %v1839_v27 = vld [vmem:[%s2686_s1 + $0xa8] sm:$0xff]  ;;  %v1848_v29 = vld [vmem:[%s2686_s1 + $0xa0] sm:$0xff] }
  0x15   : > { %648 = vmatpush.msra.mxu0 %v398_v12  ;;  %1628 = vmatpush.msra.mxu3 %v398_v12  ;;  %v179_v30 = vld [vmem:[%s1772_s16 + $0x40] sm:$0xff]  ;;  %v390_v31 = vld [vmem:[%s2686_s1 + $0x18] sm:$0xff]  ;;  %v389_v33 = vld [vmem:[%s2686_s1 + $0x10] sm:$0xff] }
  0x16   : > { %881 = vmatpush.msra.mxu1 %v1781_v14  ;;  %v1858_v32 = vld [vmem:[%s2686_s1 + $0x98] sm:$0xff]  ;;  %v405_v34 = vld [vmem:[%s2686_s1 + $0x90] sm:$0xff]  ;;  %v388_v35 = vld [vmem:[%s2686_s1 + $0x8] sm:$0xff] }
  0x17   : > { %649 = vmatpush.msra.mxu0 %v397_v15  ;;  %1629 = vmatpush.msra.mxu3 %v397_v15  ;;  %v404_v36 = vld [vmem:[%s2686_s1 + $0x88] sm:$0xff]  ;;  %v387_v37 = vld [vmem:[%s2686_s1] sm:$0xff]  ;;  %v333_v39 = vld [vmem:[%s1772_s16 + $0x510] sm:$0xff] }
  0x18   : > { %882 = vmatpush.msra.mxu1 %v1792_v16  ;;  %v171_v38 = vld [vmem:[%s1772_s16] sm:$0xff]  ;;  %v182_v40 = vld [vmem:[%s1772_s16 + $0x58] sm:$0xff]  ;;  %v172_v42 = vld [vmem:[%s1772_s16 + $0x8] sm:$0xff] }
  0x19   : > { %650 = vmatpush.msra.mxu0 %v396_v17  ;;  %1630 = vmatpush.msra.mxu3 %v396_v17  ;;  %v403_v41 = vld [vmem:[%s2686_s1 + $0x80] sm:$0xff]  ;;  %v174_v43 = vld [vmem:[%s1772_s16 + $0x18] sm:$0xff]  ;;  %v336_v44 = vld [vmem:[%s1772_s16 + $0x528] sm:$0xff] }
  0x1a   : > { %883 = vmatpush.msra.mxu1 %v1801_v18  ;;  %v185_v45 = vld [vmem:[%s1772_s16 + $0x70] sm:$0xff]  ;;  %v175_v46 = vld [vmem:[%s1772_s16 + $0x20] sm:$0xff]  ;;  %v188_v49 = vld [vmem:[%s1772_s16 + $0x88] sm:$0xff] }
  0x1b   : > { %651 = vmatpush.msra.mxu0 %v395_v19  ;;  %1631 = vmatpush.msra.mxu3 %v395_v19  ;;  %v177_v47 = vld [vmem:[%s1772_s16 + $0x30] sm:$0xff]  ;;  %v339_v48 = vld [vmem:[%s1772_s16 + $0x540] sm:$0xff]  ;;  %v178_v50 = vld [vmem:[%s1772_s16 + $0x38] sm:$0xff] }
  0x1c   : > { %884 = vmatpush.msra.mxu1 %v1810_v20  ;;  %1551 = vmatmul.msk.f32.gmra.mxu2 %vm427_vm0, %v176_v21  ;;  %v180_v51 = vld [vmem:[%s1772_s16 + $0x48] sm:$0xff]  ;;  %v342_v52 = vld [vmem:[%s1772_s16 + $0x558] sm:$0xff]  ;;  %v191_v53 = vld [vmem:[%s1772_s16 + $0xa0] sm:$0xff] }
  0x1d   : > { %652 = vmatpush.msra.mxu0 %v394_v22  ;;  %1632 = vmatpush.msra.mxu3 %v394_v22  ;;  %v181_v54 = vld [vmem:[%s1772_s16 + $0x50] sm:$0xff]  ;;  %v183_v55 = vld [vmem:[%s1772_s16 + $0x60] sm:$0xff]  ;;  %v194_v57 = vld [vmem:[%s1772_s16 + $0xb8] sm:$0xff] }
  0x1e   : > { %885 = vmatpush.msra.mxu1 %v1820_v23  ;;  %v345_v56 = vld [vmem:[%s1772_s16 + $0x570] sm:$0xff]  ;;  %v184_v58 = vld [vmem:[%s1772_s16 + $0x68] sm:$0xff]  ;;  %v186_v59 = vld [vmem:[%s1772_s16 + $0x78] sm:$0xff] }
  0x1f   : > { %653 = vmatpush.msra.mxu0 %v393_v24  ;;  %1633 = vmatpush.msra.mxu3 %v393_v24  ;;  %v348_v60 = vld [vmem:[%s1772_s16 + $0x588] sm:$0xff]  ;;  %v197_v61 = vld [vmem:[%s1772_s16 + $0xd0] sm:$0xff]  ;;  %v187_v62 = vld [vmem:[%s1772_s16 + $0x80] sm:$0xff] }
  0x20   : > { %886 = vmatpush.msra.mxu1 %v1830_v25  ;;  %v189_v63 = vld [vmem:[%s1772_s16 + $0x90] sm:$0xff]  ;;  %v351_v0 = vld [vmem:[%s1772_s16 + $0x5a0] sm:$0xff]  ;;  %v190_v2 = vld [vmem:[%s1772_s16 + $0x98] sm:$0xff] }
  0x21   : > { %654 = vmatpush.msra.mxu0 %v392_v26  ;;  %1634 = vmatpush.msra.mxu3 %v392_v26  ;;  %v203_v5 = vld [vmem:[%s1772_s16 + $0x100] sm:$0xff]  ;;  %v206_v9 = vld [vmem:[%s1772_s16 + $0x118] sm:$0xff]  ;;  %v360_v12 = vld [vmem:[%s1772_s16 + $0x5e8] sm:$0xff] }
  0x22   : > { %887 = vmatpush.msra.mxu1 %v1839_v27  ;;  %v209_v13 = vld [vmem:[%s1772_s16 + $0x130] sm:$0xff]  ;;  %v212_v17 = vld [vmem:[%s1772_s16 + $0x148] sm:$0xff]  ;;  %v215_v21 = vld [vmem:[%s1772_s16 + $0x160] sm:$0xff] }
  0x23   : > { %655 = vmatpush.msra.mxu0 %v391_v28  ;;  %1635 = vmatpush.msra.mxu3 %v391_v28  ;;  %v201_v15 = vld [vmem:[%s1772_s16 + $0xf0] sm:$0xff]  ;;  %v204_v19 = vld [vmem:[%s1772_s16 + $0x108] sm:$0xff] }
  0x24   : > { %888 = vmatpush.msra.mxu1 %v1848_v29  ;;  %1552 = vmatmul.msk.f32.gmra.mxu2 %vm427_vm0, %v179_v30  ;;  %v205_v22 = vld [vmem:[%s1772_s16 + $0x110] sm:$0xff]  ;;  %v208_v26 = vld [vmem:[%s1772_s16 + $0x128] sm:$0xff]  ;;  %v211_v30 = vld [vmem:[%s1772_s16 + $0x140] sm:$0xff] }
  0x25   : > { %656 = vmatpush.msra.mxu0 %v390_v31  ;;  %1636 = vmatpush.msra.mxu3 %v390_v31  ;;  %v369_v24 = vld [vmem:[%s1772_s16 + $0x630] sm:$0xff]  ;;  %v372_v28 = vld [vmem:[%s1772_s16 + $0x648] sm:$0xff] }
  0x26   : > { %889 = vmatpush.msra.mxu1 %v1858_v32 }
  0x27   : > { %657 = vmatpush.msra.mxu0 %v389_v33  ;;  %1637 = vmatpush.msra.mxu3 %v389_v33  ;;  %v375_v33 = vld [vmem:[%s1772_s16 + $0x660] sm:$0xff] }
  0x28   : > { %890 = vmatpush.msra.mxu1 %v405_v34 }
  0x29   : > { %658 = vmatpush.msra.mxu0 %v388_v35  ;;  %1638 = vmatpush.msra.mxu3 %v388_v35  ;;  %v214_v35 = vld [vmem:[%s1772_s16 + $0x158] sm:$0xff] }
  0x2a   : > { %891 = vmatpush.msra.mxu1 %v404_v36 }
  0x2b   : > { %659 = vmatpush.msra.mxu0 %v387_v37  ;;  %1639 = vmatpush.msra.mxu3 %v387_v37  ;;  %v216_v37 = vld [vmem:[%s1772_s16 + $0x168] sm:$0xff] }
  0x2c   : > { %660 = vmatmul.f32.vlgmr.msra.gmra.mxu0 %v171_v38  ;;  %822 = vmatmul.f32.vlgmr.msra.gmra.mxu3 %v333_v39  ;;  %v378_v38 = vld [vmem:[%s1772_s16 + $0x678] sm:$0xff]  ;;  %v227_v39 = vld [vmem:[%s1772_s16 + $0x1c0] sm:$0xff] }
  0x2d   : > { %1553 = vmatmul.msk.f32.gmra.mxu2 %vm427_vm0, %v182_v40  ;;  %892 = vmatpush.msra.mxu1 %v403_v41  ;;  %v217_v40 = vld [vmem:[%s1772_s16 + $0x170] sm:$0xff] }
  0x2e   : > { %1640 = vmatpush.msrb.mxu3 %v1722_v3  ;;  %893 = vmatmul.f32.vlgmr.msra.gmra.mxu1 %v172_v42  ;;  %v192_v3 = vld [vmem:[%s1772_s16 + $0xa8] sm:$0xff] }
  0x30   : > { %1641 = vmatpush.msrb.mxu3 %v1737_v6  ;;  %v193_v6 = vld [vmem:[%s1772_s16 + $0xb0] sm:$0xff] }
  0x32   : > { %1642 = vmatpush.msrb.mxu3 %v1749_v8  ;;  %v357_v8 = vld [vmem:[%s1772_s16 + $0x5d0] sm:$0xff] }
  0x34   : > { %663 = vmatmul.f32.gmra.mxu0 %v174_v43  ;;  %1643 = vmatpush.msrb.mxu3 %v1765_v11  ;;  %v198_v11 = vld [vmem:[%s1772_s16 + $0xd8] sm:$0xff]  ;;  %v219_v43 = vld [vmem:[%s1772_s16 + $0x180] sm:$0xff] }
  0x35   : > { %825 = vmatmul.f32.gmra.mxu3 %v336_v44  ;;  %1554 = vmatmul.msk.f32.gmra.mxu2 %vm427_vm0, %v185_v45  ;;  %v381_v44 = vld [vmem:[%s1772_s16 + $0x690] sm:$0xff]  ;;  %v230_v45 = vld [vmem:[%s1772_s16 + $0x1d8] sm:$0xff] }
  0x36   : > { %1644 = vmatpush.msrb.mxu3 %v1781_v14  ;;  %896 = vmatmul.f32.gmra.mxu1 %v175_v46  ;;  %v199_v14 = vld [vmem:[%s1772_s16 + $0xe0] sm:$0xff] }
  0x38   : > { %1645 = vmatpush.msrb.mxu3 %v1792_v16  ;;  %v363_v16 = vld [vmem:[%s1772_s16 + $0x600] sm:$0xff] }
  0x3a   : > { %1646 = vmatpush.msrb.mxu3 %v1801_v18  ;;  %v202_v18 = vld [vmem:[%s1772_s16 + $0xf8] sm:$0xff] }
  0x3c   : > { %666 = vmatmul.f32.gmra.mxu0 %v177_v47  ;;  %1647 = vmatpush.msrb.mxu3 %v1810_v20  ;;  %v366_v20 = vld [vmem:[%s1772_s16 + $0x618] sm:$0xff]  ;;  %v220_v47 = vld [vmem:[%s1772_s16 + $0x188] sm:$0xff] }
  0x3d   : > { %828 = vmatmul.f32.gmra.mxu3 %v339_v48  ;;  %1555 = vmatmul.msk.f32.gmra.mxu2 %vm427_vm0, %v188_v49 }
  0x3e   : > { %1648 = vmatpush.msrb.mxu3 %v1820_v23  ;;  %899 = vmatmul.f32.gmra.mxu1 %v178_v50  ;;  %v207_v23 = vld [vmem:[%s1772_s16 + $0x120] sm:$0xff] }
  0x40   : > { %1649 = vmatpush.msrb.mxu3 %v1830_v25  ;;  %v218_v25 = vld [vmem:[%s1772_s16 + $0x178] sm:$0xff] }
  0x42   : > { %1650 = vmatpush.msrb.mxu3 %v1839_v27  ;;  %v210_v27 = vld [vmem:[%s1772_s16 + $0x138] sm:$0xff] }
  0x44   : > { %669 = vmatmul.f32.gmra.mxu0 %v180_v51  ;;  %1651 = vmatpush.msrb.mxu3 %v1848_v29  ;;  %v221_v29 = vld [vmem:[%s1772_s16 + $0x190] sm:$0xff]  ;;  %v222_v51 = vld [vmem:[%s1772_s16 + $0x198] sm:$0xff] }
  0x45   : > { %831 = vmatmul.f32.gmra.mxu3 %v342_v52  ;;  %1556 = vmatmul.msk.f32.gmra.mxu2 %vm427_vm0, %v191_v53  ;;  %v384_v52 = vld [vmem:[%s1772_s16 + $0x6a8] sm:$0xff]  ;;  %v233_v53 = vld [vmem:[%s1772_s16 + $0x1f0] sm:$0xff] }
  0x46   : > { %1652 = vmatpush.msrb.mxu3 %v1858_v32  ;;  %902 = vmatmul.f32.gmra.mxu1 %v181_v54  ;;  %v213_v32 = vld [vmem:[%s1772_s16 + $0x150] sm:$0xff] }
  0x48   : > { %1653 = vmatpush.msrb.mxu3 %v405_v34  ;;  %v224_v34 = vld [vmem:[%s1772_s16 + $0x1a8] sm:$0xff] }
  0x4a   : > { %1654 = vmatpush.msrb.mxu3 %v404_v36 }
  0x4c   : > { %672 = vmatmul.f32.gmra.mxu0 %v183_v55  ;;  %1655 = vmatpush.msrb.mxu3 %v403_v41  ;;  %v223_v55 = vld [vmem:[%s1772_s16 + $0x1a0] sm:$0xff] }
  0x4d   : > { %834 = vmatmul.f32.gmra.mxu3 %v345_v56  ;;  %1557 = vmatmul.msk.f32.gmra.mxu2 %vm427_vm0, %v194_v57 }
  0x4e   : > { %1656 = vmatpush.msra.mxu3 %v1714_v1  ;;  %905 = vmatmul.f32.gmra.mxu1 %v184_v58  ;;  %v200_v1 = vld [vmem:[%s1772_s16 + $0xe8] sm:$0xff] }
  0x50   : > { %1657 = vmatpush.msra.mxu3 %v1727_v4  ;;  %v354_v4 = vld [vmem:[%s1772_s16 + $0x5b8] sm:$0xff] }
  0x52   : > { %1658 = vmatpush.msra.mxu3 %v1744_v7  ;;  %v195_v7 = vld [vmem:[%s1772_s16 + $0xc0] sm:$0xff] }
  0x54   : > { %675 = vmatmul.f32.gmra.mxu0 %v186_v59  ;;  %1659 = vmatpush.msra.mxu3 %v1760_v10  ;;  %v196_v10 = vld [vmem:[%s1772_s16 + $0xc8] sm:$0xff]  ;;  %v225_v59 = vld [vmem:[%s1772_s16 + $0x1b0] sm:$0xff] }
  0x55   : > { %837 = vmatmul.f32.gmra.mxu3 %v348_v60  ;;  %1558 = vmatmul.msk.f32.gmra.mxu2 %vm427_vm0, %v197_v61  ;;  %v334_v60 = vld [vmem:[%s1772_s16 + $0x518] sm:$0xff]  ;;  %v236_v61 = vld [vmem:[%s1772_s16 + $0x208] sm:$0xff] }
  0x56   : > { %908 = vmatmul.f32.gmra.mxu1 %v187_v62 }
  0x5c   : > { %678 = vmatmul.f32.gmra.mxu0 %v189_v63  ;;  %v226_v63 = vld [vmem:[%s1772_s16 + $0x1b8] sm:$0xff] }
  0x5d   : > { %840 = vmatmul.f32.gmra.mxu3 %v351_v0  ;;  %1559 = vmatmul.msk.f32.gmra.mxu2 %vm427_vm0, %v200_v1 }
  0x5e   : > { %911 = vmatmul.f32.gmra.mxu1 %v190_v2 }
  0x64   : > { %681 = vmatmul.f32.gmra.mxu0 %v192_v3  ;;  %v228_v3 = vld [vmem:[%s1772_s16 + $0x1c8] sm:$0xff] }
  0x65   : > { %843 = vmatmul.f32.gmra.mxu3 %v354_v4  ;;  %1560 = vmatmul.msk.f32.gmra.mxu2 %vm427_vm0, %v203_v5  ;;  %v337_v4 = vld [vmem:[%s1772_s16 + $0x530] sm:$0xff]  ;;  %v239_v5 = vld [vmem:[%s1772_s16 + $0x220] sm:$0xff] }
  0x66   : > { %914 = vmatmul.f32.gmra.mxu1 %v193_v6 }
  0x6c   : > { %684 = vmatmul.f32.gmra.mxu0 %v195_v7  ;;  %v229_v7 = vld [vmem:[%s1772_s16 + $0x1d0] sm:$0xff] }
  0x6d   : > { %846 = vmatmul.f32.gmra.mxu3 %v357_v8  ;;  %1561 = vmatmul.msk.f32.gmra.mxu2 %vm427_vm0, %v206_v9 }
  0x6e   : > { %917 = vmatmul.f32.gmra.mxu1 %v196_v10 }
  0x74   : > { %687 = vmatmul.f32.gmra.mxu0 %v198_v11  ;;  %v231_v11 = vld [vmem:[%s1772_s16 + $0x1e0] sm:$0xff] }
  0x75   : > { %849 = vmatmul.f32.gmra.mxu3 %v360_v12  ;;  %1562 = vmatmul.msk.f32.gmra.mxu2 %vm427_vm0, %v209_v13  ;;  %v340_v12 = vld [vmem:[%s1772_s16 + $0x548] sm:$0xff]  ;;  %v242_v13 = vld [vmem:[%s1772_s16 + $0x238] sm:$0xff] }
  0x76   : > { %920 = vmatmul.f32.gmra.mxu1 %v199_v14 }
  0x7c   : > { %690 = vmatmul.f32.gmra.mxu0 %v201_v15  ;;  %v232_v15 = vld [vmem:[%s1772_s16 + $0x1e8] sm:$0xff] }
  0x7d   : > { %852 = vmatmul.f32.gmra.mxu3 %v363_v16  ;;  %1563 = vmatmul.msk.f32.gmra.mxu2 %vm427_vm0, %v212_v17 }
  0x7e   : > { %923 = vmatmul.f32.gmra.mxu1 %v202_v18 }
  0x84   : > { %693 = vmatmul.f32.gmra.mxu0 %v204_v19  ;;  %v234_v19 = vld [vmem:[%s1772_s16 + $0x1f8] sm:$0xff] }
  0x85   : > { %855 = vmatmul.f32.gmra.mxu3 %v366_v20  ;;  %1564 = vmatmul.msk.f32.gmra.mxu2 %vm427_vm0, %v215_v21  ;;  %v343_v20 = vld [vmem:[%s1772_s16 + $0x560] sm:$0xff]  ;;  %v245_v21 = vld [vmem:[%s1772_s16 + $0x250] sm:$0xff] }
  0x86   : > { %926 = vmatmul.f32.gmra.mxu1 %v205_v22 }
  0x8c   : > { %696 = vmatmul.f32.gmra.mxu0 %v207_v23  ;;  %v235_v23 = vld [vmem:[%s1772_s16 + $0x200] sm:$0xff] }
  0x8d   : > { %858 = vmatmul.f32.gmra.mxu3 %v369_v24  ;;  %1565 = vmatmul.msk.f32.gmra.mxu2 %vm427_vm0, %v218_v25 }
  0x8e   : > { %929 = vmatmul.f32.gmra.mxu1 %v208_v26 }
  0x94   : > { %699 = vmatmul.f32.gmra.mxu0 %v210_v27  ;;  %v237_v27 = vld [vmem:[%s1772_s16 + $0x210] sm:$0xff] }
  0x95   : > { %861 = vmatmul.f32.gmra.mxu3 %v372_v28  ;;  %1566 = vmatmul.msk.f32.gmra.mxu2 %vm427_vm0, %v221_v29  ;;  %v346_v28 = vld [vmem:[%s1772_s16 + $0x578] sm:$0xff]  ;;  %v248_v29 = vld [vmem:[%s1772_s16 + $0x268] sm:$0xff] }
  0x96   : > { %932 = vmatmul.f32.gmra.mxu1 %v211_v30 }
  0x97   : > { %v1968_v31 = vpop.f32.mrf.mxu2 }
  0x9c   : > { %702 = vmatmul.f32.gmra.mxu0 %v213_v32  ;;  %v238_v32 = vld [vmem:[%s1772_s16 + $0x218] sm:$0xff] }
  0x9d   : > { %864 = vmatmul.f32.gmra.mxu3 %v375_v33  ;;  %1567 = vmatmul.msk.f32.gmra.mxu2 %vm427_vm0, %v224_v34 }
  0x9e   : > { %935 = vmatmul.f32.gmra.mxu1 %v214_v35 }
  0x9f   : > { %v1975_v36 = vpop.f32.mrf.mxu2 }
  0xa4   : > { %705 = vmatmul.f32.gmra.mxu0 %v216_v37  ;;  %v240_v37 = vld [vmem:[%s1772_s16 + $0x228] sm:$0xff] }
  0xa5   : > { %867 = vmatmul.f32.gmra.mxu3 %v378_v38  ;;  %1568 = vmatmul.msk.f32.gmra.mxu2 %vm427_vm0, %v227_v39  ;;  %v349_v38 = vld [vmem:[%s1772_s16 + $0x590] sm:$0xff]  ;;  %v251_v39 = vld [vmem:[%s1772_s16 + $0x280] sm:$0xff] }
  0xa6   : > { %938 = vmatmul.f32.gmra.mxu1 %v217_v40 }
  0xa7   : > { %v1982_v41 = vpop.f32.mrf.mxu2 }
  0xa9   : > { %v1984_v42 = vpop.f32.mrf.mxu0 }
  0xab   : > { %v1989_v46 = vpop.f32.mrf.mxu1 }
  0xac   : > { %708 = vmatmul.f32.gmra.mxu0 %v219_v43  ;;  %v241_v43 = vld [vmem:[%s1772_s16 + $0x230] sm:$0xff] }
  0xad   : > { %870 = vmatmul.f32.gmra.mxu3 %v381_v44  ;;  %1569 = vmatmul.msk.f32.gmra.mxu2 %vm427_vm0, %v230_v45 }
  0xae   : > { %941 = vmatmul.f32.gmra.mxu1 %v220_v47 }
  0xaf   : > { %v1993_v48 = vpop.f32.mrf.mxu3 }
  0xb0   : > { %v1995_v49 = vpop.f32.mrf.mxu2 }
  0xb1   : > { %v1997_v50 = vpop.f32.mrf.mxu0 }
  0xb3   : > { %v2002_v54 = vpop.f32.mrf.mxu1 }
  0xb4   : > { %711 = vmatmul.f32.gmra.mxu0 %v222_v51  ;;  %v243_v51 = vld [vmem:[%s1772_s16 + $0x240] sm:$0xff] }
  0xb5   : > { %873 = vmatmul.f32.gmra.mxu3 %v384_v52  ;;  %1570 = vmatmul.msk.f32.gmra.mxu2 %vm427_vm0, %v233_v53  ;;  %v352_v52 = vld [vmem:[%s1772_s16 + $0x5a8] sm:$0xff]  ;;  %v254_v53 = vld [vmem:[%s1772_s16 + $0x298] sm:$0xff] }
  0xb6   : > { %944 = vmatmul.f32.gmra.mxu1 %v223_v55 }
  0xb8   : > { %v2006_v56 = vpop.f32.mrf.mxu3  ;;  %v2008_v57 = vpop.f32.mrf.mxu2 }
  0xb9   : > { %v2010_v58 = vpop.f32.mrf.mxu0 }
  0xbb   : > { %v2015_v62 = vpop.f32.mrf.mxu1 }
  0xbc   : > { %714 = vmatmul.f32.gmra.mxu0 %v225_v59  ;;  %v244_v59 = vld [vmem:[%s1772_s16 + $0x248] sm:$0xff] }
  0xbd   : > { %1055 = vmatmul.f32.vlgmr.msrb.gmra.mxu3 %v334_v60  ;;  %1571 = vmatmul.msk.f32.gmra.mxu2 %vm427_vm0, %v236_v61 }
  0xbe   : > { %947 = vmatmul.f32.gmra.mxu1 %v226_v63 }
  0xc0   : > { %v2019_v0 = vpop.f32.mrf.mxu3  ;;  %v2021_v1 = vpop.f32.mrf.mxu2 }
  0xc1   : > { %v2023_v2 = vpop.f32.mrf.mxu0 }
  0xc3   : > { %v2028_v6 = vpop.f32.mrf.mxu1 }
  0xc4   : > { %717 = vmatmul.f32.gmra.mxu0 %v228_v3  ;;  %v246_v3 = vld [vmem:[%s1772_s16 + $0x258] sm:$0xff] }
  0xc5   : > { %1058 = vmatmul.f32.gmra.mxu3 %v337_v4  ;;  %1572 = vmatmul.msk.f32.gmra.mxu2 %vm427_vm0, %v239_v5  ;;  %v355_v4 = vld [vmem:[%s1772_s16 + $0x5c0] sm:$0xff]  ;;  %v257_v5 = vld [vmem:[%s1772_s16 + $0x2b0] sm:$0xff] }
  0xc6   : > { %950 = vmatmul.f32.gmra.mxu1 %v229_v7 }
  0xc8   : > { %v2032_v8 = vpop.f32.mrf.mxu3  ;;  %v2034_v9 = vpop.f32.mrf.mxu2 }
  0xc9   : > { %v2036_v10 = vpop.f32.mrf.mxu0 }
  0xcb   : > { %v2041_v14 = vpop.f32.mrf.mxu1 }
  0xcc   : > { %720 = vmatmul.f32.gmra.mxu0 %v231_v11  ;;  %v247_v11 = vld [vmem:[%s1772_s16 + $0x260] sm:$0xff] }
  0xcd   : > { %1061 = vmatmul.f32.gmra.mxu3 %v340_v12  ;;  %1573 = vmatmul.msk.f32.gmra.mxu2 %vm427_vm0, %v242_v13 }
  0xce   : > { %953 = vmatmul.f32.gmra.mxu1 %v232_v15 }
  0xd0   : > { %v2045_v16 = vpop.f32.mrf.mxu3  ;;  %v2047_v17 = vpop.f32.mrf.mxu2 }
  0xd1   : > { %v2049_v18 = vpop.f32.mrf.mxu0 }
  0xd3   : > { %v2054_v22 = vpop.f32.mrf.mxu1 }
  0xd4   : > { %723 = vmatmul.f32.gmra.mxu0 %v234_v19  ;;  %v249_v19 = vld [vmem:[%s1772_s16 + $0x270] sm:$0xff] }
  0xd5   : > { %1064 = vmatmul.f32.gmra.mxu3 %v343_v20  ;;  %1574 = vmatmul.msk.f32.gmra.mxu2 %vm427_vm0, %v245_v21  ;;  %v358_v20 = vld [vmem:[%s1772_s16 + $0x5d8] sm:$0xff]  ;;  %v260_v21 = vld [vmem:[%s1772_s16 + $0x2c8] sm:$0xff] }
  0xd6   : > { %956 = vmatmul.f32.gmra.mxu1 %v235_v23 }
  0xd8   : > { %v2058_v24 = vpop.f32.mrf.mxu3  ;;  %v2060_v25 = vpop.f32.mrf.mxu2 }
  0xd9   : > { %v2062_v26 = vpop.f32.mrf.mxu0 }
  0xdb   : > { %v2067_v30 = vpop.f32.mrf.mxu1 }
  0xdc   : > { %726 = vmatmul.f32.gmra.mxu0 %v237_v27  ;;  %v250_v27 = vld [vmem:[%s1772_s16 + $0x278] sm:$0xff] }
  0xdd   : > { %1067 = vmatmul.f32.gmra.mxu3 %v346_v28  ;;  %1575 = vmatmul.msk.f32.gmra.mxu2 %vm427_vm0, %v248_v29 }
  0xde   : > { %959 = vmatmul.f32.gmra.mxu1 %v238_v32 }
  0xe0   : > { %v2071_v33 = vpop.f32.mrf.mxu3  ;;  %v2073_v34 = vpop.f32.mrf.mxu2 }
  0xe1   : > { %v2075_v35 = vpop.f32.mrf.mxu0 }
  0xe3   : > { %v2080_v40 = vpop.f32.mrf.mxu1 }
  0xe4   : > { %729 = vmatmul.f32.gmra.mxu0 %v240_v37  ;;  %v252_v37 = vld [vmem:[%s1772_s16 + $0x288] sm:$0xff] }
  0xe5   : > { %1070 = vmatmul.f32.gmra.mxu3 %v349_v38  ;;  %1576 = vmatmul.msk.f32.gmra.mxu2 %vm427_vm0, %v251_v39  ;;  %v361_v38 = vld [vmem:[%s1772_s16 + $0x5f0] sm:$0xff]  ;;  %v263_v39 = vld [vmem:[%s1772_s16 + $0x2e0] sm:$0xff] }
  0xe6   : > { %962 = vmatmul.f32.gmra.mxu1 %v241_v43 }
  0xe8   : > { %v2084_v44 = vpop.f32.mrf.mxu3  ;;  %v2086_v45 = vpop.f32.mrf.mxu2 }
  0xe9   : > { %v2088_v47 = vpop.f32.mrf.mxu0 }
  0xeb   : > { %v2093_v55 = vpop.f32.mrf.mxu1 }
  0xec   : > { %732 = vmatmul.f32.gmra.mxu0 %v243_v51  ;;  %v253_v51 = vld [vmem:[%s1772_s16 + $0x290] sm:$0xff] }
  0xed   : > { %1073 = vmatmul.f32.gmra.mxu3 %v352_v52  ;;  %1577 = vmatmul.msk.f32.gmra.mxu2 %vm427_vm0, %v254_v53 }
  0xee   : > { %965 = vmatmul.f32.gmra.mxu1 %v244_v59 }
  0xf0   : > { %v2097_v60 = vpop.f32.mrf.mxu3  ;;  %v2099_v61 = vpop.f32.mrf.mxu2 }
  0xf1   : > { %2689 = vst [vmem:[#allocation2_spill] sm:$0xff] %v2099_v61  ;;  %v2101_v63 = vpop.f32.mrf.mxu0 }
  0xf3   : > { %v2106_v7 = vpop.f32.mrf.mxu1 }
  0xf4   : > { %735 = vmatmul.f32.gmra.mxu0 %v246_v3  ;;  %v255_v3 = vld [vmem:[%s1772_s16 + $0x2a0] sm:$0xff] }
  0xf5   : > { %1076 = vmatmul.f32.gmra.mxu3 %v355_v4  ;;  %1578 = vmatmul.msk.f32.gmra.mxu2 %vm427_vm0, %v257_v5  ;;  %v364_v4 = vld [vmem:[%s1772_s16 + $0x608] sm:$0xff]  ;;  %v266_v5 = vld [vmem:[%s1772_s16 + $0x2f8] sm:$0xff] }
  0xf6   : > { %968 = vmatmul.f32.gmra.mxu1 %v247_v11 }
  0xf8   : > { %v2110_v12 = vpop.f32.mrf.mxu3  ;;  %v2112_v13 = vpop.f32.mrf.mxu2 }
  0xf9   : > { %2690 = vst [vmem:[#allocation3_spill] sm:$0xff] %v2112_v13  ;;  %v2114_v15 = vpop.f32.mrf.mxu0  ;;  %v273_v13 = vld [vmem:[%s1772_s16 + $0x330] sm:$0xff] }
  0xfb   : > { %v2119_v23 = vpop.f32.mrf.mxu1 }
  0xfc   : > { %738 = vmatmul.f32.gmra.mxu0 %v249_v19  ;;  %v256_v19 = vld [vmem:[%s1772_s16 + $0x2a8] sm:$0xff] }
  0xfd   : > { %1079 = vmatmul.f32.gmra.mxu3 %v358_v20  ;;  %1579 = vmatmul.msk.f32.gmra.mxu2 %vm427_vm0, %v260_v21 }
  0xfe   : > { %971 = vmatmul.f32.gmra.mxu1 %v250_v27 }
 0x100   : > { %v2123_v28 = vpop.f32.mrf.mxu3  ;;  %v2125_v29 = vpop.f32.mrf.mxu2 }
 0x101   : > { %2691 = vst [vmem:[#allocation4_spill] sm:$0xff] %v2125_v29  ;;  %v2127_v32 = vpop.f32.mrf.mxu0  ;;  %v272_v29 = vld [vmem:[%s1772_s16 + $0x328] sm:$0xff] }
 0x103   : > { %v2132_v43 = vpop.f32.mrf.mxu1 }
 0x104   : > { %741 = vmatmul.f32.gmra.mxu0 %v252_v37  ;;  %v258_v37 = vld [vmem:[%s1772_s16 + $0x2b8] sm:$0xff] }
 0x105   : > { %1082 = vmatmul.f32.gmra.mxu3 %v361_v38  ;;  %1580 = vmatmul.msk.f32.gmra.mxu2 %vm427_vm0, %v263_v39  ;;  %v367_v38 = vld [vmem:[%s1772_s16 + $0x620] sm:$0xff]  ;;  %v269_v39 = vld [vmem:[%s1772_s16 + $0x310] sm:$0xff] }
 0x106   : > { %974 = vmatmul.f32.gmra.mxu1 %v253_v51 }
 0x108   : > { %v2136_v52 = vpop.f32.mrf.mxu3  ;;  %v2138_v53 = vpop.f32.mrf.mxu2 }
 0x109   : > { %2692 = vst [vmem:[#allocation5_spill] sm:$0xff] %v2136_v52  ;;  %v2140_v59 = vpop.f32.mrf.mxu0 }
 0x10a   : > { %2693 = vst [vmem:[#allocation6_spill] sm:$0xff] %v2138_v53  ;;  %v370_v53 = vld [vmem:[%s1772_s16 + $0x638] sm:$0xff] }
 0x10b   : > { %2694 = vst [vmem:[#allocation7_spill] sm:$0xff] %v2140_v59  ;;  %v2145_v11 = vpop.f32.mrf.mxu1  ;;  %v274_v59 = vld [vmem:[%s1772_s16 + $0x338] sm:$0xff] }
 0x10c   : > { %2695 = vst [vmem:[#allocation8_spill] sm:$0xff] %v2145_v11  ;;  %744 = vmatmul.f32.gmra.mxu0 %v255_v3  ;;  %v259_v3 = vld [vmem:[%s1772_s16 + $0x2c0] sm:$0xff] }
 0x10d   : > { %1085 = vmatmul.f32.gmra.mxu3 %v364_v4  ;;  %1581 = vmatmul.msk.f32.gmra.mxu2 %vm427_vm0, %v266_v5 }
 0x10e   : > { %977 = vmatmul.f32.gmra.mxu1 %v256_v19 }
 0x110   : > { %v2149_v20 = vpop.f32.mrf.mxu3  ;;  %v2151_v21 = vpop.f32.mrf.mxu2 }
 0x111   : > { %2696 = vst [vmem:[#allocation9_spill] sm:$0xff] %v2149_v20  ;;  %v2153_v27 = vpop.f32.mrf.mxu0 }
 0x112   : > { %2697 = vst [vmem:[#allocation10_spill] sm:$0xff] %v2151_v21  ;;  %v261_v21 = vld [vmem:[%s1772_s16 + $0x2d0] sm:$0xff] }
 0x113   : > { %2698 = vst [vmem:[#allocation11_spill] sm:$0xff] %v2153_v27  ;;  %v2158_v51 = vpop.f32.mrf.mxu1 }
 0x114   : > { %2699 = vst [vmem:[#allocation12_spill] sm:$0xff] %v2158_v51  ;;  %747 = vmatmul.f32.gmra.mxu0 %v258_v37  ;;  %v262_v37 = vld [vmem:[%s1772_s16 + $0x2d8] sm:$0xff] }
 0x115   : > { %1088 = vmatmul.f32.gmra.mxu3 %v367_v38  ;;  %1582 = vmatmul.msk.f32.gmra.mxu2 %vm427_vm0, %v269_v39 }
 0x116   : > { %980 = vmatmul.f32.gmra.mxu1 %v259_v3 }
 0x118   : > { %v2162_v4 = vpop.f32.mrf.mxu3  ;;  %v2164_v5 = vpop.f32.mrf.mxu2 }
 0x119   : > { %2700 = vst [vmem:[#allocation13_spill] sm:$0xff] %v2162_v4  ;;  %v2166_v19 = vpop.f32.mrf.mxu0  ;;  %v373_v4 = vld [vmem:[%s1772_s16 + $0x650] sm:$0xff] }
 0x11a   : > { %2701 = vst [vmem:[#allocation14_spill] sm:$0xff] %v2164_v5  ;;  %v264_v5 = vld [vmem:[%s1772_s16 + $0x2e8] sm:$0xff] }
 0x11b   : > { %2702 = vst [vmem:[#allocation15_spill] sm:$0xff] %v2166_v19  ;;  %v2171_v51 = vpop.f32.mrf.mxu1  ;;  %v275_v19 = vld [vmem:[%s1772_s16 + $0x340] sm:$0xff] }
 0x11c   : > { %2703 = vst [vmem:[#allocation16_spill] sm:$0xff] %v2171_v51  ;;  %750 = vmatmul.f32.gmra.mxu0 %v261_v21 }
 0x11d   : > { %1091 = vmatmul.f32.gmra.mxu3 %v370_v53  ;;  %1583 = vmatmul.msk.f32.gmra.mxu2 %vm427_vm0, %v272_v29  ;;  %v265_v53 = vld [vmem:[%s1772_s16 + $0x2f0] sm:$0xff] }
 0x11e   : > { %983 = vmatmul.f32.gmra.mxu1 %v262_v37 }
 0x120   : > { %v2175_v38 = vpop.f32.mrf.mxu3  ;;  %v2177_v39 = vpop.f32.mrf.mxu2 }
 0x121   : > { %2704 = vst [vmem:[#allocation17_spill] sm:$0xff] %v2175_v38  ;;  %v2179_v3 = vpop.f32.mrf.mxu0  ;;  %v376_v38 = vld [vmem:[%s1772_s16 + $0x668] sm:$0xff] }
 0x122   : > { %2705 = vst [vmem:[#allocation18_spill] sm:$0xff] %v2177_v39  ;;  %v267_v39 = vld [vmem:[%s1772_s16 + $0x300] sm:$0xff] }
 0x123   : > { %2706 = vst [vmem:[#allocation19_spill] sm:$0xff] %v2179_v3  ;;  %v2184_v51 = vpop.f32.mrf.mxu1  ;;  %v278_v3 = vld [vmem:[%s1772_s16 + $0x358] sm:$0xff] }
 0x124   : > { %2707 = vst [vmem:[#allocation20_spill] sm:$0xff] %v2184_v51  ;;  %753 = vmatmul.f32.gmra.mxu0 %v264_v5  ;;  %v268_v5 = vld [vmem:[%s1772_s16 + $0x308] sm:$0xff] }
 0x125   : > { %1094 = vmatmul.f32.gmra.mxu3 %v373_v4  ;;  %1584 = vmatmul.msk.f32.gmra.mxu2 %vm427_vm0, %v275_v19 }
 0x126   : > { %986 = vmatmul.f32.gmra.mxu1 %v265_v53  ;;  %v2204_v53 = vld [vmem:[%s2687_s2] ss:$0 sm:$0xff] }
 0x128   : > { %v2188_v29 = vpop.f32.mrf.mxu3  ;;  %v1181_v21 = vpop.f32.mrf.mxu2 }
 0x129   : > { %2708 = vst [vmem:[#allocation21_spill] sm:$0xff] %v2188_v29  ;;  %v2190_v37 = vpop.f32.mrf.mxu0 }
 0x12a   : > { %2709 = vst [vmem:[#allocation22_spill] sm:$0xff] %v2190_v37  ;;  %v270_v37 = vld [vmem:[%s1772_s16 + $0x318] sm:$0xff] }
 0x12b   : > { %v2195_v20 = vpop.f32.mrf.mxu1 }
 0x12c   : > { %2710 = vst [vmem:[#allocation23_spill] sm:$0xff] %v2195_v20  ;;  %756 = vmatmul.f32.gmra.mxu0 %v267_v39  ;;  %v379_v20 = vld [vmem:[%s1772_s16 + $0x680] sm:$0xff]  ;;  %v281_v39 = vld [vmem:[%s1772_s16 + $0x370] sm:$0xff] }
 0x12d   : > { %1097 = vmatmul.f32.gmra.mxu3 %v376_v38  ;;  %1585 = vmatmul.msk.f32.gmra.mxu2 %vm427_vm0, %v278_v3  ;;  %v271_v3 = vld [vmem:[%s1772_s16 + $0x320] sm:$0xff] }
 0x12e   : > { %989 = vmatmul.f32.gmra.mxu1 %v268_v5  ;;  %v662_v5 = vadd.f32 %v2204_v53, %v1984_v42 }
 0x130   : > { %v2199_v4 = vpop.f32.mrf.mxu3  ;;  %v1184_v19 = vpop.f32.mrf.mxu2  ;;  %v895_v51 = vadd.f32 %v1989_v46, %v662_v5  ;;  %v824_v46 = vadd.f32 %v2204_v53, %v1993_v48 }
 0x131   : > { %2711 = vst [vmem:[#allocation24_spill] sm:$0xff] %v2199_v4  ;;  %v2206_v29 = vpop.f32.mrf.mxu0 }
 0x132   : > { %2712 = vst [vmem:[#allocation25_spill] sm:$0xff] %v2206_v29  ;;  %v1128_v42 = vadd.f32 %v1968_v31, %v895_v51 }
 0x133   : > { %v2211_v38 = vpop.f32.mrf.mxu1 }
 0x134   : > { %2713 = vst [vmem:[#allocation26_spill] sm:$0xff] %v2211_v38  ;;  %759 = vmatmul.f32.gmra.mxu0 %v270_v37  ;;  %v382_v38 = vld [vmem:[%s1772_s16 + $0x698] sm:$0xff]  ;;  %v284_v37 = vld [vmem:[%s1772_s16 + $0x388] sm:$0xff]  ;;  %v1343_v5 = vmax.f32 %v1128_v42, 0.0 }
 0x135   : > { %1100 = vmatmul.f32.gmra.mxu3 %v379_v20  ;;  %1586 = vmatmul.msk.f32.gmra.mxu2 %vm427_vm0, %v281_v39  ;;  %v665_v20 = vadd.f32 %v2204_v53, %v1997_v50 }
 0x136   : > { %992 = vmatmul.f32.gmra.mxu1 %v271_v3 }
 0x137   : > { %v898_v31 = vadd.f32 %v2002_v54, %v665_v20  ;;  %v668_v54 = vadd.f32 %v2204_v53, %v2010_v58  ;;  %v827_v20 = vadd.f32 %v2204_v53, %v2006_v56 }
 0x138   : > { %v2217_v4 = vpop.f32.mrf.mxu3  ;;  %v1187_v29 = vpop.f32.mrf.mxu2 }
 0x139   : > { %2714 = vst [vmem:[#allocation27_spill] sm:$0xff] %v2217_v4  ;;  %v715_v27 = vpop.f32.mrf.mxu0  ;;  %v287_v4 = vld [vmem:[%s1772_s16 + $0x3a0] sm:$0xff] }
 0x13a   : > { %v716_v11 = vadd.f32 %v2204_v53, %v715_v27 }
 0x13b   : > { %v948_v52 = vpop.f32.mrf.mxu1 }
 0x13c   : > { %762 = vmatmul.f32.gmra.mxu0 %v273_v13  ;;  %v949_v39 = vadd.f32 %v948_v52, %v716_v11  ;;  %v276_v11 = vld [vmem:[%s1772_s16 + $0x348] sm:$0xff] }
 0x13d   : > { %1103 = vmatmul.f32.gmra.mxu3 %v382_v38  ;;  %1587 = vmatmul.msk.f32.gmra.mxu2 %vm427_vm0, %v284_v37  ;;  %v385_v37 = vld [vmem:[%s1772_s16 + $0x6b0] sm:$0xff] }
 0x13e   : > { %v1182_v27 = vadd.f32 %v1181_v21, %v949_v39  ;;  %995 = vmatmul.f32.gmra.mxu1 %v274_v59  ;;  %v277_v59 = vld [vmem:[%s1772_s16 + $0x350] sm:$0xff]  ;;  %v1131_v21 = vadd.f32 %v1975_v36, %v898_v31  ;;  %v901_v36 = vadd.f32 %v2015_v62, %v668_v54  ;;  %v671_v62 = vadd.f32 %v2204_v53, %v2023_v2 }
 0x140   : > { %v1056_v13 = vpop.f32.mrf.mxu3  ;;  %v2231_v3 = vpop.f32.mrf.mxu2  ;;  %v1361_v51 = vmax.f32 %v1182_v27, 0.0 }
 0x141   : > { %v2234_v50 = vadd.f32 %v1056_v13, %v824_v46  ;;  %v718_v52 = vpop.f32.mrf.mxu0  ;;  %v1344_v13 = vmax.f32 %v1131_v21, 0.0 }
 0x142   : > { %v719_v38 = vadd.f32 %v2204_v53, %v718_v52  ;;  %v2240_v61 = vmax.f32 %v1343_v5, %v1361_v51  ;;  %v279_v51 = vld [vmem:[%s1772_s16 + $0x360] sm:$0xff] }
 0x143   : > { %v951_v48 = vpop.f32.mrf.mxu1 }
 0x144   : > { %765 = vmatmul.f32.gmra.mxu0 %v276_v11  ;;  %v952_v42 = vadd.f32 %v951_v48, %v719_v38  ;;  %v344_v11 = vld [vmem:[%s1772_s16 + $0x568] sm:$0xff] }
 0x145   : > { %1106 = vmatmul.f32.gmra.mxu3 %v385_v37  ;;  %1588 = vmatmul.msk.f32.gmra.mxu2 %vm427_vm0, %v287_v4  ;;  %v290_v4 = vld [vmem:[%s1772_s16 + $0x3b8] sm:$0xff]  ;;  %v1134_v37 = vadd.f32 %v1982_v41, %v901_v36 }
 0x146   : > { %v1185_v39 = vadd.f32 %v1184_v19, %v952_v42  ;;  %998 = vmatmul.f32.gmra.mxu1 %v277_v59  ;;  %v280_v19 = vld [vmem:[%s1772_s16 + $0x368] sm:$0xff]  ;;  %v830_v59 = vadd.f32 %v2204_v53, %v2019_v0 }
 0x147   : > { %v1345_v41 = vmax.f32 %v1134_v37, 0.0 }
 0x148   : > { %v1059_v46 = vpop.f32.mrf.mxu3  ;;  %v2249_v27 = vpop.f32.mrf.mxu2  ;;  %v1362_v5 = vmax.f32 %v1185_v39, 0.0 }
 0x149   : > { %v2252_v58 = vadd.f32 %v1059_v46, %v827_v20  ;;  %v721_v31 = vpop.f32.mrf.mxu0  ;;  %v904_v20 = vadd.f32 %v2028_v6, %v671_v62  ;;  %v674_v6 = vadd.f32 %v2204_v53, %v2036_v10 }
 0x14a   : > { %v722_v52 = vadd.f32 %v2204_v53, %v721_v31  ;;  %v2258_v38 = vmax.f32 %v1344_v13, %v1362_v5  ;;  %v282_v13 = vld [vmem:[%s1772_s16 + $0x378] sm:$0xff]  ;;  %v293_v5 = vld [vmem:[%s1772_s16 + $0x3d0] sm:$0xff]  ;;  %v347_v31 = vld [vmem:[%s1772_s16 + $0x580] sm:$0xff] }
 0x14b   : > { %v954_v56 = vpop.f32.mrf.mxu1  ;;  %v907_v10 = vadd.f32 %v2041_v14, %v674_v6  ;;  %v677_v14 = vadd.f32 %v2204_v53, %v2049_v18 }
 0x14c   : > { %768 = vmatmul.f32.gmra.mxu0 %v279_v51  ;;  %v955_v48 = vadd.f32 %v954_v56, %v722_v52  ;;  %v1137_v52 = vadd.f32 %v1995_v49, %v904_v20  ;;  %v350_v20 = vld [vmem:[%s1772_s16 + $0x598] sm:$0xff] }
 0x14d   : > { %1589 = vmatmul.msk.f32.gmra.mxu2 %vm427_vm0, %v290_v4  ;;  %1607 = vmatmul.msk.f32.vlgmr.msra.gmra.mxu3 %vm427_vm0, %v344_v11  ;;  %v833_v11 = vadd.f32 %v2204_v53, %v2032_v8  ;;  %v910_v18 = vadd.f32 %v2054_v22, %v677_v14  ;;  %v680_v22 = vadd.f32 %v2204_v53, %v2062_v26 }
 0x14e   : > { %v1188_v21 = vadd.f32 %v1187_v29, %v955_v48  ;;  %1001 = vmatmul.f32.gmra.mxu1 %v280_v19  ;;  %v283_v29 = vld [vmem:[%s1772_s16 + $0x380] sm:$0xff]  ;;  %v1346_v49 = vmax.f32 %v1137_v52, 0.0 }
 0x14f   : > { %v913_v26 = vadd.f32 %v2067_v30, %v680_v22  ;;  %v683_v30 = vadd.f32 %v2204_v53, %v2075_v35  ;;  %v359_v22 = vld [vmem:[%s1772_s16 + $0x5e0] sm:$0xff] }
 0x150   : > { %v1062_v54 = vpop.f32.mrf.mxu3  ;;  %v2268_v42 = vpop.f32.mrf.mxu2  ;;  %v1363_v2 = vmax.f32 %v1188_v21, 0.0  ;;  %v285_v21 = vld [vmem:[%s1772_s16 + $0x390] sm:$0xff] }
 0x151   : > { %v2271_v39 = vadd.f32 %v1062_v54, %v830_v59  ;;  %v724_v46 = vpop.f32.mrf.mxu0  ;;  %v916_v35 = vadd.f32 %v2080_v40, %v683_v30  ;;  %v686_v40 = vadd.f32 %v2204_v53, %v2088_v47 }
 0x152   : > { %v725_v36 = vadd.f32 %v2204_v53, %v724_v46  ;;  %v2277_v51 = vmax.f32 %v1345_v41, %v1363_v2  ;;  %v296_v41 = vld [vmem:[%s1772_s16 + $0x3e8] sm:$0xff]  ;;  %v286_v2 = vld [vmem:[%s1772_s16 + $0x398] sm:$0xff]  ;;  %v1140_v46 = vadd.f32 %v2008_v57, %v907_v10  ;;  %v1143_v10 = vadd.f32 %v2021_v1, %v910_v18 }
 0x153   : > { %v957_v0 = vpop.f32.mrf.mxu1  ;;  %v842_v18 = vadd.f32 %v2204_v53, %v2071_v33  ;;  %v919_v47 = vadd.f32 %v2093_v55, %v686_v40  ;;  %v689_v55 = vadd.f32 %v2204_v53, %v2101_v63  ;;  %v851_v40 = vadd.f32 %v2204_v53, %v2110_v12 }
 0x154   : > { %771 = vmatmul.f32.gmra.mxu0 %v282_v13  ;;  %v958_v4 = vadd.f32 %v957_v0, %v725_v36  ;;  %v836_v36 = vadd.f32 %v2204_v53, %v2045_v16  ;;  %v1347_v57 = vmax.f32 %v1140_v46, 0.0  ;;  %v1348_v1 = vmax.f32 %v1143_v10, 0.0  ;;  %v291_v46 = vld [vmem:[%s1772_s16 + $0x3c0] sm:$0xff]  ;;  %v305_v10 = vld [vmem:[%s1772_s16 + $0x430] sm:$0xff] }
 0x155   : > { %1590 = vmatmul.msk.f32.gmra.mxu2 %vm427_vm0, %v293_v5  ;;  %1608 = vmatmul.msk.f32.gmra.mxu3 %vm427_vm0, %v347_v31  ;;  %v1152_v30 = vadd.f32 %v2060_v25, %v919_v47  ;;  %v922_v63 = vadd.f32 %v2106_v7, %v689_v55  ;;  %v692_v7 = vadd.f32 %v2204_v53, %v2114_v15 }
 0x156   : > { %v1191_v56 = vadd.f32 %v2231_v3, %v958_v4  ;;  %1004 = vmatmul.f32.gmra.mxu1 %v283_v29  ;;  %v288_v4 = vld [vmem:[%s1772_s16 + $0x3a8] sm:$0xff] }
 0x157   : > { %v1351_v25 = vmax.f32 %v1152_v30, 0.0  ;;  %v925_v15 = vadd.f32 %v2119_v23, %v692_v7  ;;  %v695_v23 = vadd.f32 %v2204_v53, %v2127_v32 }
 0x158   : > { %v1065_v19 = vpop.f32.mrf.mxu3  ;;  %v2288_v37 = vpop.f32.mrf.mxu2  ;;  %v1364_v62 = vmax.f32 %v1191_v56, 0.0  ;;  %v299_v56 = vld [vmem:[%s1772_s16 + $0x400] sm:$0xff] }
 0x159   : > { %v2291_v48 = vadd.f32 %v1065_v19, %v833_v11  ;;  %v727_v59 = vpop.f32.mrf.mxu0  ;;  %v353_v19 = vld [vmem:[%s1772_s16 + $0x5b0] sm:$0xff]  ;;  %v928_v32 = vadd.f32 %v2132_v43, %v695_v23 }
 0x15a   : > { %v728_v54 = vadd.f32 %v2204_v53, %v727_v59  ;;  %v2297_v8 = vmax.f32 %v1346_v49, %v1364_v62  ;;  %v289_v49 = vld [vmem:[%s1772_s16 + $0x3b0] sm:$0xff]  ;;  %v839_v59 = vadd.f32 %v2204_v53, %v2058_v24 }
 0x15b   : > { %v960_v3 = vpop.f32.mrf.mxu1 }
 0x15c   : > { %774 = vmatmul.f32.gmra.mxu0 %v285_v21  ;;  %v961_v13 = vadd.f32 %v960_v3, %v728_v54 }
 0x15d   : > { %1591 = vmatmul.msk.f32.gmra.mxu2 %vm427_vm0, %v296_v41  ;;  %1609 = vmatmul.msk.f32.gmra.mxu3 %vm427_vm0, %v350_v20 }
 0x15e   : > { %v1194_v5 = vadd.f32 %v2249_v27, %v961_v13  ;;  %1007 = vmatmul.f32.gmra.mxu1 %v286_v2  ;;  %v302_v13 = vld [vmem:[%s1772_s16 + $0x418] sm:$0xff] }
 0x160   : > { %v1068_v31 = vpop.f32.mrf.mxu3  ;;  %v2308_v0 = vpop.f32.mrf.mxu2  ;;  %v1365_v29 = vmax.f32 %v1194_v5, 0.0  ;;  %v292_v5 = vld [vmem:[%s1772_s16 + $0x3c8] sm:$0xff] }
 0x161   : > { %v2311_v52 = vadd.f32 %v1068_v31, %v836_v36  ;;  %v730_v6 = vpop.f32.mrf.mxu0  ;;  %v356_v36 = vld [vmem:[%s1772_s16 + $0x5c8] sm:$0xff]  ;;  %v1146_v31 = vadd.f32 %v2034_v9, %v913_v26 }
 0x162   : > { %v731_v11 = vadd.f32 %v2204_v53, %v730_v6  ;;  %v2317_v16 = vmax.f32 %v1347_v57, %v1365_v29 }
 0x163   : > { %v963_v27 = vpop.f32.mrf.mxu1  ;;  %v1349_v9 = vmax.f32 %v1146_v31, 0.0  ;;  %v298_v31 = vld [vmem:[%s1772_s16 + $0x3f8] sm:$0xff] }
 0x164   : > { %777 = vmatmul.f32.gmra.mxu0 %v288_v4  ;;  %v964_v62 = vadd.f32 %v963_v27, %v731_v11  ;;  %v294_v27 = vld [vmem:[%s1772_s16 + $0x3d8] sm:$0xff] }
 0x165   : > { %1592 = vmatmul.msk.f32.gmra.mxu2 %vm427_vm0, %v299_v56  ;;  %1610 = vmatmul.msk.f32.gmra.mxu3 %vm427_vm0, %v353_v19 }
 0x166   : > { %v1197_v21 = vadd.f32 %v2268_v42, %v964_v62  ;;  %1010 = vmatmul.f32.gmra.mxu1 %v289_v49  ;;  %v295_v62 = vld [vmem:[%s1772_s16 + $0x3e0] sm:$0xff] }
 0x168   : > { %v1071_v54 = vpop.f32.mrf.mxu3  ;;  %v2328_v41 = vpop.f32.mrf.mxu2  ;;  %v1366_v20 = vmax.f32 %v1197_v21, 0.0 }
 0x169   : > { %v2331_v3 = vadd.f32 %v1071_v54, %v839_v59  ;;  %v733_v2 = vpop.f32.mrf.mxu0  ;;  %v1149_v59 = vadd.f32 %v2047_v17, %v916_v35  ;;  %v845_v54 = vadd.f32 %v2204_v53, %v2084_v44 }
 0x16a   : > { %v734_v14 = vadd.f32 %v2204_v53, %v733_v2  ;;  %v2337_v24 = vmax.f32 %v1348_v1, %v1366_v20 }
 0x16b   : > { %v966_v42 = vpop.f32.mrf.mxu1  ;;  %v1350_v17 = vmax.f32 %v1149_v59, 0.0 }
 0x16c   : > { %780 = vmatmul.f32.gmra.mxu0 %v291_v46  ;;  %v967_v57 = vadd.f32 %v966_v42, %v734_v14  ;;  %v308_v42 = vld [vmem:[%s1772_s16 + $0x448] sm:$0xff] }
 0x16d   : > { %1593 = vmatmul.msk.f32.gmra.mxu2 %vm427_vm0, %v302_v13  ;;  %1611 = vmatmul.msk.f32.gmra.mxu3 %vm427_vm0, %v356_v36  ;;  %v297_v13 = vld [vmem:[%s1772_s16 + $0x3f0] sm:$0xff] }
 0x16e   : > { %v1200_v29 = vadd.f32 %v2288_v37, %v967_v57  ;;  %1013 = vmatmul.f32.gmra.mxu1 %v292_v5  ;;  %v362_v5 = vld [vmem:[%s1772_s16 + $0x5f8] sm:$0xff] }
 0x170   : > { %v1074_v6 = vpop.f32.mrf.mxu3  ;;  %v2348_v4 = vpop.f32.mrf.mxu2  ;;  %v1367_v11 = vmax.f32 %v1200_v29, 0.0 }
 0x171   : > { %v2351_v56 = vadd.f32 %v1074_v6, %v842_v18  ;;  %v736_v19 = vpop.f32.mrf.mxu0  ;;  %v848_v18 = vadd.f32 %v2204_v53, %v2097_v60 }
 0x172   : > { %v737_v49 = vadd.f32 %v2204_v53, %v736_v19  ;;  %v2357_v33 = vmax.f32 %v1349_v9, %v1367_v11 }
 0x173   : > { %v969_v37 = vpop.f32.mrf.mxu1 }
 0x174   : > { %783 = vmatmul.f32.gmra.mxu0 %v294_v27  ;;  %v970_v21 = vadd.f32 %v969_v37, %v737_v49  ;;  %v300_v27 = vld [vmem:[%s1772_s16 + $0x408] sm:$0xff]  ;;  %v301_v37 = vld [vmem:[%s1772_s16 + $0x410] sm:$0xff] }
 0x175   : > { %1594 = vmatmul.msk.f32.gmra.mxu2 %vm427_vm0, %v305_v10  ;;  %1612 = vmatmul.msk.f32.gmra.mxu3 %vm427_vm0, %v359_v22  ;;  %v311_v10 = vld [vmem:[%s1772_s16 + $0x460] sm:$0xff]  ;;  %v365_v22 = vld [vmem:[%s1772_s16 + $0x610] sm:$0xff] }
 0x176   : > { %v1203_v1 = vadd.f32 %v2308_v0, %v970_v21  ;;  %1016 = vmatmul.f32.gmra.mxu1 %v295_v62  ;;  %v1155_v62 = vadd.f32 %v2073_v34, %v922_v63 }
 0x178   : > { %v1077_v26 = vpop.f32.mrf.mxu3  ;;  %v2368_v20 = vpop.f32.mrf.mxu2  ;;  %v1368_v2 = vmax.f32 %v1203_v1, 0.0  ;;  %v1352_v34 = vmax.f32 %v1155_v62, 0.0 }
 0x179   : > { %v2371_v46 = vadd.f32 %v1077_v26, %v845_v54  ;;  %v739_v14 = vpop.f32.mrf.mxu0 }
 0x17a   : > { %v740_v36 = vadd.f32 %v2204_v53, %v739_v14  ;;  %v2377_v44 = vmax.f32 %v1350_v17, %v1368_v2  ;;  %v303_v2 = vld [vmem:[%s1772_s16 + $0x420] sm:$0xff] }
 0x17b   : > { %v972_v0 = vpop.f32.mrf.mxu1 }
 0x17c   : > { %786 = vmatmul.f32.gmra.mxu0 %v297_v13  ;;  %v973_v57 = vadd.f32 %v972_v0, %v740_v36  ;;  %v314_v13 = vld [vmem:[%s1772_s16 + $0x478] sm:$0xff]  ;;  %v368_v36 = vld [vmem:[%s1772_s16 + $0x628] sm:$0xff] }
 0x17d   : > { %1595 = vmatmul.msk.f32.gmra.mxu2 %vm427_vm0, %v308_v42  ;;  %1613 = vmatmul.msk.f32.gmra.mxu3 %vm427_vm0, %v362_v5  ;;  %v304_v42 = vld [vmem:[%s1772_s16 + $0x428] sm:$0xff]  ;;  %v1158_v5 = vadd.f32 %v2086_v45, %v925_v15 }
 0x17e   : > { %v1206_v29 = vadd.f32 %v2328_v41, %v973_v57  ;;  %1019 = vmatmul.f32.gmra.mxu1 %v298_v31  ;;  %v854_v31 = vadd.f32 %v2204_v53, %v2123_v28 }
 0x17f   : > { %v1353_v45 = vmax.f32 %v1158_v5, 0.0  ;;  %v2719_v5 = vld [vmem:[#allocation3_spill] sm:$0xff] }
 0x180   : > { %v1080_v6 = vpop.f32.mrf.mxu3  ;;  %v2388_v9 = vpop.f32.mrf.mxu2  ;;  %v1369_v35 = vmax.f32 %v1206_v29, 0.0 }
 0x181   : > { %v2391_v11 = vadd.f32 %v1080_v6, %v848_v18  ;;  %v742_v19 = vpop.f32.mrf.mxu0 }
 0x182   : > { %v743_v49 = vadd.f32 %v2204_v53, %v742_v19  ;;  %v2397_v60 = vmax.f32 %v1351_v25, %v1369_v35  ;;  %v306_v25 = vld [vmem:[%s1772_s16 + $0x438] sm:$0xff]  ;;  %v317_v35 = vld [vmem:[%s1772_s16 + $0x490] sm:$0xff]  ;;  %v371_v19 = vld [vmem:[%s1772_s16 + $0x640] sm:$0xff] }
 0x183   : > { %v975_v41 = vpop.f32.mrf.mxu1 }
 0x184   : > { %789 = vmatmul.f32.gmra.mxu0 %v300_v27  ;;  %v976_v59 = vadd.f32 %v975_v41, %v743_v49  ;;  %v307_v27 = vld [vmem:[%s1772_s16 + $0x440] sm:$0xff] }
 0x185   : > { %1596 = vmatmul.msk.f32.gmra.mxu2 %vm427_vm0, %v311_v10  ;;  %1614 = vmatmul.msk.f32.gmra.mxu3 %vm427_vm0, %v365_v22  ;;  %v2715_v49 = vld [vmem:[#allocation2_spill] sm:$0xff]  ;;  %v2716_v22 = vld [vmem:[#allocation7_spill] sm:$0xff] }
 0x186   : > { %v1209_v21 = vadd.f32 %v2348_v4, %v976_v59  ;;  %1022 = vmatmul.f32.gmra.mxu1 %v301_v37  ;;  %v1161_v10 = vadd.f32 %v2715_v49, %v928_v32  ;;  %v698_v43 = vadd.f32 %v2204_v53, %v2716_v22  ;;  %v2717_v37 = vld [vmem:[#allocation5_spill] sm:$0xff]  ;;  %v312_v49 = vld [vmem:[%s1772_s16 + $0x468] sm:$0xff]  ;;  %v323_v22 = vld [vmem:[%s1772_s16 + $0x4c0] sm:$0xff] }
 0x187   : > { %v857_v62 = vadd.f32 %v2204_v53, %v2717_v37  ;;  %v313_v37 = vld [vmem:[%s1772_s16 + $0x470] sm:$0xff] }
 0x188   : > { %v1083_v54 = vpop.f32.mrf.mxu3  ;;  %v2408_v1 = vpop.f32.mrf.mxu2  ;;  %v1370_v26 = vmax.f32 %v1209_v21, 0.0  ;;  %v1354_v21 = vmax.f32 %v1161_v10, 0.0 }
 0x189   : > { %v2411_v17 = vadd.f32 %v1083_v54, %v851_v40  ;;  %v745_v47 = vpop.f32.mrf.mxu0  ;;  %v2718_v54 = vld [vmem:[#allocation8_spill] sm:$0xff] }
 0x18a   : > { %v746_v14 = vadd.f32 %v2204_v53, %v745_v47  ;;  %v2417_v12 = vmax.f32 %v1352_v34, %v1370_v26  ;;  %v931_v34 = vadd.f32 %v2718_v54, %v698_v43  ;;  %v377_v43 = vld [vmem:[%s1772_s16 + $0x670] sm:$0xff] }
 0x18b   : > { %v978_v4 = vpop.f32.mrf.mxu1 }
 0x18c   : > { %792 = vmatmul.f32.gmra.mxu0 %v303_v2  ;;  %v979_v0 = vadd.f32 %v978_v4, %v746_v14  ;;  %v309_v2 = vld [vmem:[%s1772_s16 + $0x450] sm:$0xff]  ;;  %v1164_v23 = vadd.f32 %v2719_v5, %v931_v34  ;;  %v2725_v34 = vld [vmem:[#allocation13_spill] sm:$0xff] }
 0x18d   : > { %1597 = vmatmul.msk.f32.gmra.mxu2 %vm427_vm0, %v314_v13  ;;  %1615 = vmatmul.msk.f32.gmra.mxu3 %vm427_vm0, %v368_v36  ;;  %v320_v13 = vld [vmem:[%s1772_s16 + $0x4a8] sm:$0xff]  ;;  %v374_v36 = vld [vmem:[%s1772_s16 + $0x658] sm:$0xff] }
 0x18e   : > { %v1212_v30 = vadd.f32 %v2368_v20, %v979_v0  ;;  %1025 = vmatmul.f32.gmra.mxu1 %v304_v42  ;;  %v310_v42 = vld [vmem:[%s1772_s16 + $0x458] sm:$0xff]  ;;  %v2720_v0 = vld [vmem:[#allocation11_spill] sm:$0xff] }
 0x190   : > { %v1086_v55 = vpop.f32.mrf.mxu3  ;;  %v2428_v57 = vpop.f32.mrf.mxu2  ;;  %v1371_v18 = vmax.f32 %v1212_v30, 0.0 }
 0x191   : > { %v2431_v29 = vadd.f32 %v1086_v55, %v854_v31  ;;  %v748_v6 = vpop.f32.mrf.mxu0  ;;  %v701_v31 = vadd.f32 %v2204_v53, %v2720_v0  ;;  %v2721_v55 = vld [vmem:[#allocation9_spill] sm:$0xff]  ;;  %v315_v0 = vld [vmem:[%s1772_s16 + $0x480] sm:$0xff] }
 0x192   : > { %v749_v63 = vadd.f32 %v2204_v53, %v748_v6  ;;  %v2437_v28 = vmax.f32 %v1353_v45, %v1371_v18  ;;  %v860_v45 = vadd.f32 %v2204_v53, %v2721_v55  ;;  %v380_v55 = vld [vmem:[%s1772_s16 + $0x688] sm:$0xff] }
 0x193   : > { %v981_v20 = vpop.f32.mrf.mxu1 }
 0x194   : > { %795 = vmatmul.f32.gmra.mxu0 %v306_v25  ;;  %v982_v41 = vadd.f32 %v981_v20, %v749_v63  ;;  %v1355_v25 = vmax.f32 %v1164_v23, 0.0  ;;  %v2722_v63 = vld [vmem:[#allocation12_spill] sm:$0xff] }
 0x195   : > { %1598 = vmatmul.msk.f32.gmra.mxu2 %vm427_vm0, %v317_v35  ;;  %1616 = vmatmul.msk.f32.gmra.mxu3 %vm427_vm0, %v371_v19  ;;  %v934_v35 = vadd.f32 %v2722_v63, %v701_v31  ;;  %v2728_v63 = vld [vmem:[#allocation19_spill] sm:$0xff] }
 0x196   : > { %v1215_v7 = vadd.f32 %v2388_v9, %v982_v41  ;;  %1028 = vmatmul.f32.gmra.mxu1 %v307_v27 }
 0x198   : > { %v1089_v59 = vpop.f32.mrf.mxu3  ;;  %v2448_v40 = vpop.f32.mrf.mxu2  ;;  %v1372_v15 = vmax.f32 %v1215_v7, 0.0 }
 0x199   : > { %v2451_v26 = vadd.f32 %v1089_v59, %v857_v62  ;;  %v751_v47 = vpop.f32.mrf.mxu0  ;;  %v2723_v62 = vld [vmem:[#allocation4_spill] sm:$0xff]  ;;  %v2724_v59 = vld [vmem:[#allocation15_spill] sm:$0xff] }
 0x19a   : > { %v752_v14 = vadd.f32 %v2204_v53, %v751_v47  ;;  %v2457_v4 = vmax.f32 %v1354_v21, %v1372_v15  ;;  %v1167_v7 = vadd.f32 %v2723_v62, %v934_v35  ;;  %v704_v21 = vadd.f32 %v2204_v53, %v2724_v59 }
 0x19b   : > { %v984_v9 = vpop.f32.mrf.mxu1  ;;  %v863_v15 = vadd.f32 %v2204_v53, %v2725_v34  ;;  %v707_v35 = vadd.f32 %v2204_v53, %v2728_v63 }
 0x19c   : > { %798 = vmatmul.f32.gmra.mxu0 %v309_v2  ;;  %v985_v30 = vadd.f32 %v984_v9, %v752_v14 }
 0x19d   : > { %1599 = vmatmul.msk.f32.gmra.mxu2 %vm427_vm0, %v320_v13  ;;  %1617 = vmatmul.msk.f32.gmra.mxu3 %vm427_vm0, %v374_v36  ;;  %v1356_v13 = vmax.f32 %v1167_v7, 0.0  ;;  %v2726_v36 = vld [vmem:[#allocation16_spill] sm:$0xff] }
 0x19e   : > { %v1218_v32 = vadd.f32 %v2408_v1, %v985_v30  ;;  %1031 = vmatmul.f32.gmra.mxu1 %v310_v42  ;;  %v937_v9 = vadd.f32 %v2726_v36, %v704_v21  ;;  %v326_v30 = vld [vmem:[%s1772_s16 + $0x4d8] sm:$0xff]  ;;  %v2731_v36 = vld [vmem:[#allocation10_spill] sm:$0xff] }
 0x1a0   : > { %v1092_v18 = vpop.f32.mrf.mxu3  ;;  %v2468_v6 = vpop.f32.mrf.mxu2  ;;  %v1373_v19 = vmax.f32 %v1218_v32, 0.0  ;;  %v316_v32 = vld [vmem:[%s1772_s16 + $0x488] sm:$0xff] }
 0x1a1   : > { %v2471_v20 = vadd.f32 %v1092_v18, %v860_v45  ;;  %v754_v27 = vpop.f32.mrf.mxu0  ;;  %v2727_v18 = vld [vmem:[#allocation6_spill] sm:$0xff] }
 0x1a2   : > { %v755_v10 = vadd.f32 %v2204_v53, %v754_v27  ;;  %v2477_v41 = vmax.f32 %v1355_v25, %v1373_v19  ;;  %v1170_v25 = vadd.f32 %v2727_v18, %v937_v9  ;;  %v2729_v27 = vld [vmem:[#allocation17_spill] sm:$0xff] }
 0x1a3   : > { %v987_v1 = vpop.f32.mrf.mxu1 }
 0x1a4   : > { %801 = vmatmul.f32.gmra.mxu0 %v312_v49  ;;  %v988_v54 = vadd.f32 %v987_v1, %v755_v10  ;;  %v866_v49 = vadd.f32 %v2204_v53, %v2729_v27  ;;  %v1357_v1 = vmax.f32 %v1170_v25, 0.0  ;;  %v2734_v25 = vld [vmem:[#allocation23_spill] sm:$0xff] }
 0x1a5   : > { %1600 = vmatmul.msk.f32.gmra.mxu2 %vm427_vm0, %v323_v22  ;;  %1618 = vmatmul.msk.f32.gmra.mxu3 %vm427_vm0, %v377_v43 }
 0x1a6   : > { %v1221_v47 = vadd.f32 %v2428_v57, %v988_v54  ;;  %1034 = vmatmul.f32.gmra.mxu1 %v313_v37  ;;  %v2730_v37 = vld [vmem:[#allocation20_spill] sm:$0xff]  ;;  %v318_v54 = vld [vmem:[%s1772_s16 + $0x498] sm:$0xff] }
 0x1a7   : > { %v940_v62 = vadd.f32 %v2730_v37, %v707_v35 }
 0x1a8   : > { %v1095_v2 = vpop.f32.mrf.mxu3  ;;  %v2488_v14 = vpop.f32.mrf.mxu2  ;;  %v1374_v42 = vmax.f32 %v1221_v47, 0.0  ;;  %v383_v47 = vld [vmem:[%s1772_s16 + $0x6a0] sm:$0xff] }
 0x1a9   : > { %v2491_v5 = vadd.f32 %v1095_v2, %v863_v15  ;;  %v757_v23 = vpop.f32.mrf.mxu0  ;;  %v329_v15 = vld [vmem:[%s1772_s16 + $0x4f0] sm:$0xff]  ;;  %v1173_v9 = vadd.f32 %v2731_v36, %v940_v62 }
 0x1aa   : > { %v758_v31 = vadd.f32 %v2204_v53, %v757_v23  ;;  %v2497_v45 = vmax.f32 %v1356_v13, %v1374_v42  ;;  %v319_v13 = vld [vmem:[%s1772_s16 + $0x4a0] sm:$0xff] }
 0x1ab   : > { %v990_v57 = vpop.f32.mrf.mxu1  ;;  %v2732_v42 = vld [vmem:[#allocation22_spill] sm:$0xff]  ;;  %v1358_v18 = vmax.f32 %v1173_v9, 0.0 }
 0x1ac   : > { %804 = vmatmul.f32.gmra.mxu0 %v315_v0  ;;  %v991_v19 = vadd.f32 %v990_v57, %v758_v31  ;;  %v710_v23 = vadd.f32 %v2204_v53, %v2732_v42  ;;  %v2733_v31 = vld [vmem:[#allocation21_spill] sm:$0xff] }
 0x1ad   : > { %1601 = vmatmul.msk.f32.gmra.mxu2 %vm427_vm0, %v326_v30  ;;  %1619 = vmatmul.msk.f32.gmra.mxu3 %vm427_vm0, %v380_v55  ;;  %v869_v30 = vadd.f32 %v2204_v53, %v2733_v31 }
 0x1ae   : > { %v1224_v10 = vadd.f32 %v2448_v40, %v991_v19  ;;  %1037 = vmatmul.f32.gmra.mxu1 %v316_v32  ;;  %v943_v63 = vadd.f32 %v2734_v25, %v710_v23  ;;  %v2738_v23 = vld [vmem:[#allocation26_spill] sm:$0xff] }
 0x1af   : > { %v335_v25 = vld [vmem:[%s1772_s16 + $0x520] sm:$0xff] }
 0x1b0   : > { %v1098_v22 = vpop.f32.mrf.mxu3  ;;  %v2508_v43 = vpop.f32.mrf.mxu2  ;;  %v1375_v7 = vmax.f32 %v1224_v10, 0.0 }
 0x1b1   : > { %v2511_v59 = vadd.f32 %v1098_v22, %v866_v49  ;;  %v760_v21 = vpop.f32.mrf.mxu0  ;;  %v321_v49 = vld [vmem:[%s1772_s16 + $0x4b0] sm:$0xff]  ;;  %v332_v22 = vld [vmem:[%s1772_s16 + $0x508] sm:$0xff] }
 0x1b2   : > { %v761_v34 = vadd.f32 %v2204_v53, %v760_v21  ;;  %v2517_v2 = vmax.f32 %v1357_v1, %v1375_v7  ;;  %v386_v1 = vld [vmem:[%s1772_s16 + $0x6b8] sm:$0xff]  ;;  %v2735_v7 = vld [vmem:[#allocation14_spill] sm:$0xff] }
 0x1b3   : > { %v993_v40 = vpop.f32.mrf.mxu1  ;;  %v1176_v21 = vadd.f32 %v2735_v7, %v943_v63 }
 0x1b4   : > { %807 = vmatmul.f32.gmra.mxu0 %v318_v54  ;;  %v994_v0 = vadd.f32 %v993_v40, %v761_v34  ;;  %v2736_v54 = vld [vmem:[#allocation25_spill] sm:$0xff] }
 0x1b5   : > { %1602 = vmatmul.msk.f32.gmra.mxu2 %vm427_vm0, %v329_v15  ;;  %1620 = vmatmul.msk.f32.gmra.mxu3 %vm427_vm0, %v383_v47  ;;  %v713_v34 = vadd.f32 %v2204_v53, %v2736_v54  ;;  %v2737_v47 = vld [vmem:[#allocation24_spill] sm:$0xff]  ;;  %v1359_v42 = vmax.f32 %v1176_v21, 0.0 }
 0x1b6   : > { %v1227_v55 = vadd.f32 %v2468_v6, %v994_v0  ;;  %1040 = vmatmul.f32.gmra.mxu1 %v319_v13  ;;  %v322_v6 = vld [vmem:[%s1772_s16 + $0x4b8] sm:$0xff]  ;;  %v872_v40 = vadd.f32 %v2204_v53, %v2737_v47  ;;  %v327_v47 = vld [vmem:[%s1772_s16 + $0x4e0] sm:$0xff] }
 0x1b7   : > { %v946_v0 = vadd.f32 %v2738_v23, %v713_v34 }
 0x1b8   : > { %v1101_v57 = vpop.f32.mrf.mxu3  ;;  %v1235_v32 = vpop.f32.mrf.mxu2  ;;  %v1376_v35 = vmax.f32 %v1227_v55, 0.0 }
 0x1b9   : > { %v2529_v19 = vadd.f32 %v1101_v57, %v869_v30  ;;  %v763_v27 = vpop.f32.mrf.mxu0  ;;  %v324_v57 = vld [vmem:[%s1772_s16 + $0x4c8] sm:$0xff] }
 0x1ba   : > { %v764_v10 = vadd.f32 %v2204_v53, %v763_v27  ;;  %v2535_v37 = vmax.f32 %v1358_v18, %v1376_v35  ;;  %v2739_v27 = vld [vmem:[#allocation18_spill] sm:$0xff] }
 0x1bb   : > { %v996_v62 = vpop.f32.mrf.mxu1 }
 0x1bc   : > { %810 = vmatmul.f32.gmra.mxu0 %v321_v49  ;;  %v997_v15 = vadd.f32 %v996_v62, %v764_v10  ;;  %v1179_v49 = vadd.f32 %v2739_v27, %v946_v0  ;;  %v331_v27 = vld [vmem:[%s1772_s16 + $0x500] sm:$0xff] }
 0x1bd   : > { %1603 = vmatmul.msk.f32.gmra.mxu2 %vm427_vm0, %v332_v22  ;;  %1621 = vmatmul.msk.f32.gmra.mxu3 %vm427_vm0, %v386_v1  ;;  %v2740_v22 = vld [vmem:[#allocation27_spill] sm:$0xff] }
 0x1be   : > { %v1230_v13 = vadd.f32 %v2488_v14, %v997_v15  ;;  %1043 = vmatmul.f32.gmra.mxu1 %v322_v6  ;;  %v325_v14 = vld [vmem:[%s1772_s16 + $0x4d0] sm:$0xff]  ;;  %v875_v1 = vadd.f32 %v2204_v53, %v2740_v22  ;;  %v1360_v21 = vmax.f32 %v1179_v49, 0.0 }
 0x1c0   : > { %v1104_v36 = vpop.f32.mrf.mxu3  ;;  %v1238_v9 = vpop.f32.mrf.mxu2  ;;  %v1377_v31 = vmax.f32 %v1230_v13, 0.0  ;;  %v338_v13 = vld [vmem:[%s1772_s16 + $0x538] sm:$0xff] }
 0x1c1   : > { %v2547_v30 = vadd.f32 %v1104_v36, %v872_v40  ;;  %v766_v55 = vpop.f32.mrf.mxu0 }
 0x1c2   : > { %v767_v18 = vadd.f32 %v2204_v53, %v766_v55  ;;  %v2552_v63 = vmax.f32 %v1359_v42, %v1377_v31 }
 0x1c3   : > { %v999_v35 = vpop.f32.mrf.mxu1 }
 0x1c4   : > { %813 = vmatmul.f32.gmra.mxu0 %v324_v57  ;;  %v1000_v10 = vadd.f32 %v999_v35, %v767_v18  ;;  %v330_v18 = vld [vmem:[%s1772_s16 + $0x4f8] sm:$0xff]  ;;  %v341_v35 = vld [vmem:[%s1772_s16 + $0x550] sm:$0xff] }
 0x1c5   : > { %1604 = vmatmul.msk.f32.gmra.mxu2 %vm427_vm0, %v335_v25 }
 0x1c6   : > { %v1233_v62 = vadd.f32 %v2508_v43, %v1000_v10  ;;  %1046 = vmatmul.f32.gmra.mxu1 %v325_v14  ;;  %v328_v43 = vld [vmem:[%s1772_s16 + $0x4e8] sm:$0xff]  ;;  %s1661_s16 = smul.u32 144, %s2742_s13 }
 0x1c8   : > { %v1107_v6 = vpop.f32.mrf.mxu3  ;;  %v1241_v7 = vpop.f32.mrf.mxu2  ;;  %v1378_v54 = vmax.f32 %v1233_v62, 0.0  ;;  %s2588_s21 = scalar_lea.vmem %s2688_s3, %s1661_s16 }
 0x1c9   : > { %v2560_v34 = vadd.f32 %v1107_v6, %v875_v1  ;;  %v769_v15 = vpop.f32.mrf.mxu0 }
 0x1ca   : > { %v770_v40 = vadd.f32 %v2204_v53, %v769_v15  ;;  %v2565_v36 = vmax.f32 %v1360_v21, %v1378_v54 }
 0x1cb   : > { %v1002_v42 = vpop.f32.mrf.mxu1 }
 0x1cc   : > { %816 = vmatmul.f32.gmra.mxu0 %v327_v47  ;;  %v1003_v23 = vadd.f32 %v1002_v42, %v770_v40 }
 0x1cd   : > { %1605 = vmatmul.msk.f32.gmra.mxu2 %vm427_vm0, %v338_v13 }
 0x1ce   : > { %v2569_v0 = vadd.f32 %v1235_v32, %v1003_v23  ;;  %1049 = vmatmul.f32.gmra.mxu1 %v328_v43 }
 0x1d0   : > { %v1244_v31 = vpop.f32.mrf.mxu2  ;;  %v1298_v55 = vpop.f32.mrf.mxu3 }
 0x1d1   : > { %v772_v57 = vpop.f32.mrf.mxu0 }
 0x1d2   : > { %v773_v25 = vadd.f32 %v2204_v53, %v772_v57 }
 0x1d3   : > { %v1005_v14 = vpop.f32.mrf.mxu1 }
 0x1d4   : > { %819 = vmatmul.f32.gmra.mxu0 %v330_v18  ;;  %v1006_v49 = vadd.f32 %v1005_v14, %v773_v25 }
 0x1d5   : > { %1606 = vmatmul.msk.f32.gmra.mxu2 %vm427_vm0, %v341_v35 }
 0x1d6   : > { %v2576_v10 = vadd.f32 %v1238_v9, %v1006_v49  ;;  %1052 = vmatmul.f32.gmra.mxu1 %v331_v27  ;;  %v1299_v9 = vadd.f32 %v1298_v55, %v2291_v48 }
 0x1d8   : > { %v1247_v32 = vpop.f32.mrf.mxu2  ;;  %v1301_v22 = vpop.f32.mrf.mxu3  ;;  %v1400_v25 = vmax.f32 %v1299_v9, 0.0 }
 0x1d9   : > { %v775_v1 = vpop.f32.mrf.mxu0  ;;  %v1302_v48 = vadd.f32 %v1301_v22, %v2311_v52 }
 0x1da   : > { %v776_v62 = vadd.f32 %v2204_v53, %v775_v1 }
 0x1db   : > { %v1008_v6 = vpop.f32.mrf.mxu1 }
 0x1dc   : > { %v1009_v21 = vadd.f32 %v1008_v6, %v776_v62 }
 0x1de   : > { %v2579_v54 = vadd.f32 %v1241_v7, %v1009_v21  ;;  %v1401_v21 = vmax.f32 %v1302_v48, 0.0 }
 0x1e0   : > { %v1250_v15 = vpop.f32.mrf.mxu2  ;;  %v1304_v47 = vpop.f32.mrf.mxu3 }
 0x1e1   : > { %v778_v40 = vpop.f32.mrf.mxu0 }
 0x1e2   : > { %v779_v13 = vadd.f32 %v2204_v53, %v778_v40 }
 0x1e3   : > { %v1011_v42 = vpop.f32.mrf.mxu1 }
 0x1e4   : > { %v1012_v43 = vadd.f32 %v1011_v42, %v779_v13 }
 0x1e6   : > { %v1245_v23 = vadd.f32 %v1244_v31, %v1012_v43 }
 0x1e8   : > { %v1253_v57 = vpop.f32.mrf.mxu2  ;;  %v1307_v18 = vpop.f32.mrf.mxu3  ;;  %v1382_v35 = vmax.f32 %v1245_v23, 0.0  ;;  %v1305_v23 = vadd.f32 %v1304_v47, %v2331_v3 }
 0x1e9   : > { %v781_v14 = vpop.f32.mrf.mxu0 }
 0x1ea   : > { %v782_v27 = vadd.f32 %v2204_v53, %v781_v14  ;;  %v1436_v7 = vmax.f32 %v1382_v35, %v1400_v25  ;;  %v1402_v35 = vmax.f32 %v1305_v23, 0.0 }
 0x1eb   : > { %v1014_v49 = vpop.f32.mrf.mxu1 }
 0x1ec   : > { %v1454_v31 = vmax.f32 %v2297_v8, %v1436_v7  ;;  %v1015_v55 = vadd.f32 %v1014_v49, %v782_v27 }
 0x1ee   : > { %1473 = vst.msk [vmem:[%s2588_s21 + $0x18] sm:$0xff] %vm1469_vm1, %v1454_v31  ;;  %v1248_v1 = vadd.f32 %v1247_v32, %v1015_v55  ;;  %v1308_v31 = vadd.f32 %v1307_v18, %v2351_v56 }
 0x1f0   : > { %v1256_v62 = vpop.f32.mrf.mxu2  ;;  %v1310_v6 = vpop.f32.mrf.mxu3  ;;  %v1383_v40 = vmax.f32 %v1248_v1, 0.0 }
 0x1f1   : > { %v784_v13 = vpop.f32.mrf.mxu0 }
 0x1f2   : > { %v785_v42 = vadd.f32 %v2204_v53, %v784_v13  ;;  %v1437_v9 = vmax.f32 %v1383_v40, %v1401_v21 }
 0x1f3   : > { %v1017_v43 = vpop.f32.mrf.mxu1 }
 0x1f4   : > { %v1455_v52 = vmax.f32 %v2317_v16, %v1437_v9  ;;  %v1018_v22 = vadd.f32 %v1017_v43, %v785_v42  ;;  %v1311_v43 = vadd.f32 %v1310_v6, %v2371_v46 }
 0x1f6   : > { %1474 = vst.msk [vmem:[%s2588_s21 + $0x20] sm:$0xff] %vm1469_vm1, %v1455_v52  ;;  %v1251_v8 = vadd.f32 %v1250_v15, %v1018_v22  ;;  %v1403_v15 = vmax.f32 %v1308_v31, 0.0 }
 0x1f8   : > { %v1259_v25 = vpop.f32.mrf.mxu2  ;;  %v1313_v32 = vpop.f32.mrf.mxu3  ;;  %v1384_v14 = vmax.f32 %v1251_v8, 0.0  ;;  %v2612_v8 = vld [vmem:[%s2687_s2] ss:$0 sm:$0xff] }
 0x1f9   : > { %v787_v27 = vpop.f32.mrf.mxu0 }
 0x1fa   : > { %v788_v7 = vadd.f32 %v2204_v53, %v787_v27  ;;  %v1438_v49 = vmax.f32 %v1384_v14, %v1402_v35 }
 0x1fb   : > { %v1020_v48 = vpop.f32.mrf.mxu1 }
 0x1fc   : > { %v1456_v3 = vmax.f32 %v2337_v24, %v1438_v49  ;;  %v1021_v47 = vadd.f32 %v1020_v48, %v788_v7 }
 0x1fe   : > { %1475 = vst.msk [vmem:[%s2588_s21 + $0x28] sm:$0xff] %vm1469_vm1, %v1456_v3  ;;  %v1254_v16 = vadd.f32 %v1253_v57, %v1021_v47  ;;  %v1404_v57 = vmax.f32 %v1311_v43, 0.0 }
 0x200   : > { %v1262_v55 = vpop.f32.mrf.mxu2  ;;  %v1385_v1 = vmax.f32 %v1254_v16, 0.0  ;;  %v1316_v40 = vpop.f32.mrf.mxu3 }
 0x201   : > { %v790_v21 = vpop.f32.mrf.mxu0 }
 0x202   : > { %v791_v13 = vadd.f32 %v2204_v53, %v790_v21  ;;  %v1439_v42 = vmax.f32 %v1385_v1, %v1403_v15  ;;  %v1317_v15 = vadd.f32 %v1316_v40, %v2411_v17 }
 0x203   : > { %v1023_v9 = vpop.f32.mrf.mxu1 }
 0x204   : > { %v1457_v56 = vmax.f32 %v2357_v33, %v1439_v42  ;;  %v1024_v18 = vadd.f32 %v1023_v9, %v791_v13  ;;  %v1314_v33 = vadd.f32 %v1313_v32, %v2391_v11 }
 0x206   : > { %1476 = vst.msk [vmem:[%s2588_s21 + $0x30] sm:$0xff] %vm1469_vm1, %v1457_v56  ;;  %v1257_v24 = vadd.f32 %v1256_v62, %v1024_v18  ;;  %v1405_v49 = vmax.f32 %v1314_v33, 0.0 }
 0x208   : > { %v1265_v23 = vpop.f32.mrf.mxu2  ;;  %v1386_v52 = vmax.f32 %v1257_v24, 0.0  ;;  %v1319_v46 = vpop.f32.mrf.mxu3 }
 0x209   : > { %v793_v22 = vpop.f32.mrf.mxu0  ;;  %v1320_v18 = vadd.f32 %v1319_v46, %v2431_v29 }
 0x20a   : > { %v794_v53 = vadd.f32 %v2612_v8, %v793_v22  ;;  %v1440_v35 = vmax.f32 %v1386_v52, %v1404_v57 }
 0x20b   : > { %v1026_v6 = vpop.f32.mrf.mxu1 }
 0x20c   : > { %v1458_v14 = vmax.f32 %v2377_v44, %v1440_v35  ;;  %v1027_v62 = vadd.f32 %v1026_v6, %v794_v53 }
 0x20e   : > { %1477 = vst.msk [vmem:[%s2588_s21 + $0x38] sm:$0xff] %vm1469_vm1, %v1458_v14  ;;  %v1260_v27 = vadd.f32 %v1259_v25, %v1027_v62  ;;  %v1406_v25 = vmax.f32 %v1317_v15, 0.0 }
 0x210   : > { %v1268_v7 = vpop.f32.mrf.mxu2  ;;  %v1387_v48 = vmax.f32 %v1260_v27, 0.0  ;;  %v1322_v1 = vpop.f32.mrf.mxu3 }
 0x211   : > { %v796_v31 = vpop.f32.mrf.mxu0  ;;  %v1323_v33 = vadd.f32 %v1322_v1, %v2451_v26 }
 0x212   : > { %v797_v3 = vadd.f32 %v2612_v8, %v796_v31  ;;  %v1441_v47 = vmax.f32 %v1387_v48, %v1405_v49 }
 0x213   : > { %v1029_v16 = vpop.f32.mrf.mxu1 }
 0x214   : > { %v1459_v11 = vmax.f32 %v2397_v60, %v1441_v47  ;;  %v1030_v32 = vadd.f32 %v1029_v16, %v797_v3 }
 0x216   : > { %1478 = vst.msk [vmem:[%s2588_s21 + $0x40] sm:$0xff] %vm1469_vm1, %v1459_v11  ;;  %v1263_v44 = vadd.f32 %v1262_v55, %v1030_v32  ;;  %v1407_v55 = vmax.f32 %v1320_v18, 0.0 }
 0x218   : > { %v1271_v21 = vpop.f32.mrf.mxu2  ;;  %v1388_v13 = vmax.f32 %v1263_v44, 0.0  ;;  %v1325_v24 = vpop.f32.mrf.mxu3 }
 0x219   : > { %v799_v42 = vpop.f32.mrf.mxu0  ;;  %v1326_v47 = vadd.f32 %v1325_v24, %v2471_v20 }
 0x21a   : > { %v800_v9 = vadd.f32 %v2612_v8, %v799_v42  ;;  %v1442_v43 = vmax.f32 %v1388_v13, %v1406_v25 }
 0x21b   : > { %v1032_v56 = vpop.f32.mrf.mxu1 }
 0x21c   : > { %v1460_v17 = vmax.f32 %v2417_v12, %v1442_v43  ;;  %v1033_v40 = vadd.f32 %v1032_v56, %v800_v9 }
 0x21e   : > { %1479 = vst.msk [vmem:[%s2588_s21 + $0x48] sm:$0xff] %vm1469_vm1, %v1460_v17  ;;  %v1266_v60 = vadd.f32 %v1265_v23, %v1033_v40  ;;  %v1408_v23 = vmax.f32 %v1323_v33, 0.0 }
 0x220   : > { %v1274_v57 = vpop.f32.mrf.mxu2  ;;  %v1389_v52 = vmax.f32 %v1266_v60, 0.0  ;;  %v1328_v49 = vpop.f32.mrf.mxu3 }
 0x221   : > { %v802_v22 = vpop.f32.mrf.mxu0  ;;  %v1329_v42 = vadd.f32 %v1328_v49, %v2491_v5 }
 0x222   : > { %v803_v53 = vadd.f32 %v2612_v8, %v802_v22  ;;  %v1443_v35 = vmax.f32 %v1389_v52, %v1407_v55 }
 0x223   : > { %v1035_v6 = vpop.f32.mrf.mxu1 }
 0x224   : > { %v1461_v29 = vmax.f32 %v2437_v28, %v1443_v35  ;;  %v1036_v46 = vadd.f32 %v1035_v6, %v803_v53 }
 0x226   : > { %1480 = vst.msk [vmem:[%s2588_s21 + $0x50] sm:$0xff] %vm1469_vm1, %v1461_v29  ;;  %v1269_v12 = vadd.f32 %v1268_v7, %v1036_v46  ;;  %v1409_v7 = vmax.f32 %v1326_v47, 0.0 }
 0x228   : > { %v1277_v14 = vpop.f32.mrf.mxu2  ;;  %v1390_v62 = vmax.f32 %v1269_v12, 0.0  ;;  %v1331_v25 = vpop.f32.mrf.mxu3 }
 0x229   : > { %v805_v27 = vpop.f32.mrf.mxu0  ;;  %v1332_v24 = vadd.f32 %v1331_v25, %v2511_v59  ;;  %v1380_v25 = vmax.f32 %v2576_v10, 0.0 }
 0x22a   : > { %v806_v48 = vadd.f32 %v2612_v8, %v805_v27  ;;  %v1444_v31 = vmax.f32 %v1390_v62, %v1408_v23 }
 0x22b   : > { %v1038_v3 = vpop.f32.mrf.mxu1 }
 0x22c   : > { %v1462_v26 = vmax.f32 %v2457_v4, %v1444_v31  ;;  %v1039_v16 = vadd.f32 %v1038_v3, %v806_v48  ;;  %v1379_v3 = vmax.f32 %v2569_v0, 0.0 }
 0x22e   : > { %1481 = vst.msk [vmem:[%s2588_s21 + $0x58] sm:$0xff] %vm1469_vm1, %v1462_v26  ;;  %v1272_v28 = vadd.f32 %v1271_v21, %v1039_v16  ;;  %v1410_v21 = vmax.f32 %v1329_v42, 0.0 }
 0x230   : > { %v1280_v15 = vpop.f32.mrf.mxu2  ;;  %v1391_v11 = vmax.f32 %v1272_v28, 0.0  ;;  %v1334_v52 = vpop.f32.mrf.mxu3 }
 0x231   : > { %v808_v32 = vpop.f32.mrf.mxu0  ;;  %v1335_v46 = vadd.f32 %v1334_v52, %v2529_v19 }
 0x232   : > { %v809_v1 = vadd.f32 %v2612_v8, %v808_v32  ;;  %v1445_v44 = vmax.f32 %v1391_v11, %v1409_v7 }
 0x233   : > { %v1041_v13 = vpop.f32.mrf.mxu1 }
 0x234   : > { %v1463_v20 = vmax.f32 %v2477_v41, %v1445_v44  ;;  %v1042_v9 = vadd.f32 %v1041_v13, %v809_v1 }
 0x236   : > { %1482 = vst.msk [vmem:[%s2588_s21 + $0x60] sm:$0xff] %vm1469_vm1, %v1463_v20  ;;  %v1275_v4 = vadd.f32 %v1274_v57, %v1042_v9  ;;  %v1411_v57 = vmax.f32 %v1332_v24, 0.0 }
 0x238   : > { %v1283_v43 = vpop.f32.mrf.mxu2  ;;  %v1392_v56 = vmax.f32 %v1275_v4, 0.0  ;;  %v1337_v23 = vpop.f32.mrf.mxu3 }
 0x239   : > { %v811_v18 = vpop.f32.mrf.mxu0  ;;  %v1338_v26 = vadd.f32 %v1337_v23, %v2547_v30 }
 0x23a   : > { %v812_v17 = vadd.f32 %v2612_v8, %v811_v18  ;;  %v1446_v40 = vmax.f32 %v1392_v56, %v1410_v21 }
 0x23b   : > { %v1044_v60 = vpop.f32.mrf.mxu1  ;;  %v1413_v32 = vmax.f32 %v1338_v26, 0.0 }
 0x23c   : > { %v1464_v5 = vmax.f32 %v2497_v45, %v1446_v40  ;;  %v1045_v55 = vadd.f32 %v1044_v60, %v812_v17 }
 0x23e   : > { %1483 = vst.msk [vmem:[%s2588_s21 + $0x68] sm:$0xff] %vm1469_vm1, %v1464_v5  ;;  %v1278_v41 = vadd.f32 %v1277_v14, %v1045_v55  ;;  %v1412_v14 = vmax.f32 %v1335_v46, 0.0 }
 0x240   : > { %v1286_v22 = vpop.f32.mrf.mxu2  ;;  %v1393_v53 = vmax.f32 %v1278_v41, 0.0  ;;  %v1340_v30 = vpop.f32.mrf.mxu3 }
 0x241   : > { %v814_v35 = vpop.f32.mrf.mxu0 }
 0x242   : > { %v815_v6 = vadd.f32 %v2612_v8, %v814_v35  ;;  %v1447_v33 = vmax.f32 %v1393_v53, %v1411_v57 }
 0x243   : > { %v1047_v29 = vpop.f32.mrf.mxu1 }
 0x244   : > { %v1465_v59 = vmax.f32 %v2517_v2, %v1447_v33  ;;  %v1048_v12 = vadd.f32 %v1047_v29, %v815_v6 }
 0x246   : > { %1484 = vst.msk [vmem:[%s2588_s21 + $0x70] sm:$0xff] %vm1469_vm1, %v1465_v59  ;;  %v1281_v45 = vadd.f32 %v1280_v15, %v1048_v12 }
 0x248   : > { %v1289_v62 = vpop.f32.mrf.mxu2  ;;  %v1394_v27 = vmax.f32 %v1281_v45, 0.0 }
 0x249   : > { %v1290_v49 = vadd.f32 %v1289_v62, %v2234_v50  ;;  %v817_v48 = vpop.f32.mrf.mxu0 }
 0x24a   : > { %v818_v31 = vadd.f32 %v2612_v8, %v817_v48  ;;  %v1448_v19 = vmax.f32 %v1394_v27, %v1412_v14 }
 0x24b   : > { %v1397_v47 = vmax.f32 %v1290_v49, 0.0  ;;  %v1050_v2 = vpop.f32.mrf.mxu1 }
 0x24c   : > { %v1466_v16 = vmax.f32 %v2535_v37, %v1448_v19  ;;  %v1051_v15 = vadd.f32 %v1050_v2, %v818_v31 }
 0x24d   : > { %v1433_v28 = vmax.f32 %v1379_v3, %v1397_v47 }
 0x24e   : > { %1485 = vst.msk [vmem:[%s2588_s21 + $0x78] sm:$0xff] %vm1469_vm1, %v1466_v16  ;;  %v1284_v50 = vadd.f32 %v1283_v43, %v1051_v15 }
 0x24f   : > { %v1451_v7 = vmax.f32 %v2240_v61, %v1433_v28  ;;  %v1341_v61 = vadd.f32 %v1340_v30, %v2560_v34  ;;  %v1381_v34 = vmax.f32 %v2579_v54, 0.0 }
 0x250   : > { %v1292_v11 = vpop.f32.mrf.mxu2  ;;  %v1395_v0 = vmax.f32 %v1284_v50, 0.0 }
 0x251   : > { %1470 = vst.msk [vmem:[%s2588_s21] sm:$0xff] %vm1469_vm1, %v1451_v7  ;;  %v1293_v1 = vadd.f32 %v1292_v11, %v2252_v58  ;;  %v820_v44 = vpop.f32.mrf.mxu0 }
 0x252   : > { %v821_v37 = vadd.f32 %v2612_v8, %v820_v44  ;;  %v1449_v13 = vmax.f32 %v1395_v0, %v1413_v32  ;;  %v1414_v8 = vmax.f32 %v1341_v61, 0.0 }
 0x253   : > { %v1398_v42 = vmax.f32 %v1293_v1, 0.0  ;;  %v1053_v20 = vpop.f32.mrf.mxu1 }
 0x254   : > { %v1467_v9 = vmax.f32 %v2552_v63, %v1449_v13  ;;  %v1054_v43 = vadd.f32 %v1053_v20, %v821_v37 }
 0x255   : > { %v1434_v4 = vmax.f32 %v1380_v25, %v1398_v42 }
 0x256   : > { %1486 = vst.msk [vmem:[%s2588_s21 + $0x80] sm:$0xff] %vm1469_vm1, %v1467_v9  ;;  %v1287_v21 = vadd.f32 %v1286_v22, %v1054_v43 }
 0x257   : > { %v1452_v58 = vmax.f32 %v2258_v38, %v1434_v4 }
 0x258   : > { %v1295_v56 = vpop.f32.mrf.mxu2  ;;  %v1396_v10 = vmax.f32 %v1287_v21, 0.0 }
 0x259   : > { %1471 = vst.msk [vmem:[%s2588_s21 + $0x8] sm:$0xff] %vm1469_vm1, %v1452_v58  ;;  %v1296_v18 = vadd.f32 %v1295_v56, %v2271_v39 }
 0x25a   : > { %v1450_v17 = vmax.f32 %v1396_v10, %v1414_v8 }
 0x25b   : > { %v1399_v63 = vmax.f32 %v1296_v18, 0.0 }
 0x25c   : > { %v1468_v40 = vmax.f32 %v2565_v36, %v1450_v17 }
 0x25d   : > { %v1435_v60 = vmax.f32 %v1381_v34, %v1399_v63 }
 0x25e   : > { %1487 = vst.msk [vmem:[%s2588_s21 + $0x88] sm:$0xff] %vm1469_vm1, %v1468_v40 }
 0x25f   : > { %v1453_v24 = vmax.f32 %v2277_v51, %v1435_v60 }
 0x261   : > { %1472 = vst.msk [vmem:[%s2588_s21 + $0x10] sm:$0xff] %vm1469_vm1, %v1453_v24 }
 0x262 PF: > { %s13_s12 = sadd.s32 1, %s1678_s12  }
 0x263   : > { %p10_p4 = scmp.ge.s32.totalorder %s13_s12, 4  }
 0x265   :  { %12 = sbr.rel (!%p10_p4) target bundleno = 1 (0x1), region = 62 }

// kernel: net_forward.5
= control target key start
LH: loop header
LB: loop body
LE: loop exit
PB: predicated region body
PF: predicated region fallthrough
CT: control target
= control target key end

     0   :  { %s818_s18 = smov 0   ;;  %s820_s19 = smov 0   ;;  %s1057_s0 = inlined_call_operand.vmem [shape: f32[8,9216], index: 0, kind: input, shape index: {}]   ;;  %s1058_s1 = inlined_call_operand.vmem [shape: f32[9216,128], index: 1, kind: input, shape index: {}]   ;;  %s1059_s2 = inlined_call_operand.vmem [shape: f32[1,128], index: 2, kind: input, shape index: {}]   ;;  %s1060_s3 = inlined_call_operand.vmem [shape: f32[128,10], index: 3, kind: input, shape index: {}]   ;;  %s1061_s4 = inlined_call_operand.vmem [shape: f32[1,10], index: 4, kind: input, shape index: {}]   ;;  %s1062_s5 = inlined_call_operand.vmem [shape: f32[8,10], index: 5, kind: output, shape index: {}]  }
   0x1   :  { %s822_s20 = smov 0  }
   0x2 LB: > { %s24_s21 = sadd.s32 1, %s781_s19  ;;  %p722_p0 = scmp.ge.s32.totalorder %s785_s20, 1  ;;  %s785_s20 = sphi %s822_s20, %s15_s20   ;;  %s781_s19 = sphi %s820_s19, %s1064_s19   ;;  %s777_s18 = sphi %s818_s18, %s1063_s18  }
   0x3   : > { %p25_p1 = scmp.ge.s32.totalorder %s24_s21, 9  ;;  %p217_p2 = scmp.lt.s32.totalorder %s785_s20, 10 }
   0x5   : > { %s1066_s21 = smov (%p25_p1, %s24_s21), 0  ;;  %p218_p3 = pnand %p722_p0, %p217_p2 }
   0x6   : > { %s723_s22 = sshll.u32 (!%p218_p3), %s777_s18, 3  ;;  %s725_s23 = sshll.u32 (!%p218_p3), %s777_s18, 7 }
   0x7   : > { %221 = sbr.rel (%p218_p3) target bundleno = 645 (0x285), region = 40  ;;  %p256_p4 = scmp.lt.s32.totalorder (!%p218_p3), %s723_s22, 71 }
   0x8   : > { %p264_p5 = scmp.lt.s32.totalorder (!%p218_p3), %s725_s23, 1151  ;;  %p727_p6 = scmp.ne.s32.totalorder (!%p218_p3), %s777_s18, 0 }
   0xc   : > { %s1068_s22 = smov (!%p256_p4, %s723_s22), 71  ;;  %s1070_s23 = smov (!%p264_p5, %s725_s23), 1151 }
   0xd   : > { %s724_s24 = sshll.u32 %s1068_s22, 3  ;;  %s726_s28 = sshll.u32 %s1070_s23, 3 }
   0xe   : > { %s843_s27 = scalar_lea.vmem %s1057_s0, %s724_s24  ;;  %s848_s6 = scalar_lea.vmem %s1058_s1, %s726_s28 }
   0xf   : > { %276 = sbr.rel (%p727_p6) target bundleno = 22 (0x16), region = 44 }
  0x14   : > { %v787_v0 = vmov 0.0  }
  0x15   : > { %277 = vst [vmem:[#allocation2] sm:$0xff] %v787_v0 }
  0x16 PF: > { %v302_v1 = vld [vmem:[%s848_s6 + $0x78] sm:$0xff]  ;;  %v301_v3 = vld [vmem:[%s848_s6 + $0x70] sm:$0xff]  ;;  %v300_v7 = vld [vmem:[%s848_s6 + $0x68] sm:$0xff]  ;;  %p728_p7 = scmp.ne.s32.totalorder %s777_s18, 8 }
  0x17   : > { %v334_v2 = vld [vmem:[%s848_s6 + $0x178] sm:$0xff]  ;;  %415 = vmatpush.msra.mxu0 %v302_v1  ;;  %v333_v5 = vld [vmem:[%s848_s6 + $0x170] sm:$0xff]  ;;  %v332_v9 = vld [vmem:[%s848_s6 + $0x168] sm:$0xff] }
  0x18   : > { %455 = vmatpush.msra.mxu2 %v334_v2  ;;  %v318_v4 = vld [vmem:[%s848_s6 + $0xf8] sm:$0xff]  ;;  %v317_v8 = vld [vmem:[%s848_s6 + $0xf0] sm:$0xff]  ;;  %v316_v11 = vld [vmem:[%s848_s6 + $0xe8] sm:$0xff] }
  0x19   : > { %v350_v6 = vld [vmem:[%s848_s6 + $0x1f8] sm:$0xff]  ;;  %435 = vmatpush.msra.mxu1 %v318_v4  ;;  %416 = vmatpush.msra.mxu0 %v301_v3  ;;  %v349_v10 = vld [vmem:[%s848_s6 + $0x1f0] sm:$0xff]  ;;  %v299_v12 = vld [vmem:[%s848_s6 + $0x60] sm:$0xff] }
  0x1a   : > { %475 = vmatpush.msra.mxu3 %v350_v6  ;;  %456 = vmatpush.msra.mxu2 %v333_v5  ;;  %v331_v13 = vld [vmem:[%s848_s6 + $0x160] sm:$0xff]  ;;  %v348_v14 = vld [vmem:[%s848_s6 + $0x1e8] sm:$0xff]  ;;  %v298_v17 = vld [vmem:[%s848_s6 + $0x58] sm:$0xff] }
  0x1b   : > { %436 = vmatpush.msra.mxu1 %v317_v8  ;;  %417 = vmatpush.msra.mxu0 %v300_v7  ;;  %v315_v15 = vld [vmem:[%s848_s6 + $0xe0] sm:$0xff]  ;;  %v330_v18 = vld [vmem:[%s848_s6 + $0x158] sm:$0xff]  ;;  %v297_v21 = vld [vmem:[%s848_s6 + $0x50] sm:$0xff] }
  0x1c   : > { %476 = vmatpush.msra.mxu3 %v349_v10  ;;  %457 = vmatpush.msra.mxu2 %v332_v9  ;;  %v347_v16 = vld [vmem:[%s848_s6 + $0x1e0] sm:$0xff]  ;;  %v314_v19 = vld [vmem:[%s848_s6 + $0xd8] sm:$0xff]  ;;  %v329_v22 = vld [vmem:[%s848_s6 + $0x150] sm:$0xff] }
  0x1d   : > { %437 = vmatpush.msra.mxu1 %v316_v11  ;;  %418 = vmatpush.msra.mxu0 %v299_v12  ;;  %v346_v20 = vld [vmem:[%s848_s6 + $0x1d8] sm:$0xff]  ;;  %v313_v23 = vld [vmem:[%s848_s6 + $0xd0] sm:$0xff]  ;;  %v296_v25 = vld [vmem:[%s848_s6 + $0x48] sm:$0xff] }
  0x1e   : > { %477 = vmatpush.msra.mxu3 %v348_v14  ;;  %458 = vmatpush.msra.mxu2 %v331_v13  ;;  %v345_v24 = vld [vmem:[%s848_s6 + $0x1d0] sm:$0xff]  ;;  %v328_v26 = vld [vmem:[%s848_s6 + $0x148] sm:$0xff]  ;;  %v295_v29 = vld [vmem:[%s848_s6 + $0x40] sm:$0xff] }
  0x1f   : > { %438 = vmatpush.msra.mxu1 %v315_v15  ;;  %419 = vmatpush.msra.mxu0 %v298_v17  ;;  %v312_v27 = vld [vmem:[%s848_s6 + $0xc8] sm:$0xff]  ;;  %v327_v30 = vld [vmem:[%s848_s6 + $0x140] sm:$0xff]  ;;  %v294_v33 = vld [vmem:[%s848_s6 + $0x38] sm:$0xff] }
  0x20   : > { %478 = vmatpush.msra.mxu3 %v347_v16  ;;  %459 = vmatpush.msra.mxu2 %v330_v18  ;;  %v344_v28 = vld [vmem:[%s848_s6 + $0x1c8] sm:$0xff]  ;;  %v311_v31 = vld [vmem:[%s848_s6 + $0xc0] sm:$0xff]  ;;  %v326_v34 = vld [vmem:[%s848_s6 + $0x138] sm:$0xff] }
  0x21   : > { %439 = vmatpush.msra.mxu1 %v314_v19  ;;  %420 = vmatpush.msra.mxu0 %v297_v21  ;;  %v343_v32 = vld [vmem:[%s848_s6 + $0x1c0] sm:$0xff]  ;;  %v310_v35 = vld [vmem:[%s848_s6 + $0xb8] sm:$0xff]  ;;  %v293_v37 = vld [vmem:[%s848_s6 + $0x30] sm:$0xff] }
  0x22   : > { %479 = vmatpush.msra.mxu3 %v346_v20  ;;  %460 = vmatpush.msra.mxu2 %v329_v22  ;;  %v342_v36 = vld [vmem:[%s848_s6 + $0x1b8] sm:$0xff]  ;;  %v325_v38 = vld [vmem:[%s848_s6 + $0x130] sm:$0xff]  ;;  %v292_v41 = vld [vmem:[%s848_s6 + $0x28] sm:$0xff] }
  0x23   : > { %440 = vmatpush.msra.mxu1 %v313_v23  ;;  %421 = vmatpush.msra.mxu0 %v296_v25  ;;  %v309_v39 = vld [vmem:[%s848_s6 + $0xb0] sm:$0xff]  ;;  %v324_v42 = vld [vmem:[%s848_s6 + $0x128] sm:$0xff]  ;;  %v291_v45 = vld [vmem:[%s848_s6 + $0x20] sm:$0xff] }
  0x24   : > { %480 = vmatpush.msra.mxu3 %v345_v24  ;;  %461 = vmatpush.msra.mxu2 %v328_v26  ;;  %v341_v40 = vld [vmem:[%s848_s6 + $0x1b0] sm:$0xff]  ;;  %v308_v43 = vld [vmem:[%s848_s6 + $0xa8] sm:$0xff]  ;;  %v323_v46 = vld [vmem:[%s848_s6 + $0x120] sm:$0xff] }
  0x25   : > { %441 = vmatpush.msra.mxu1 %v312_v27  ;;  %422 = vmatpush.msra.mxu0 %v295_v29  ;;  %v340_v44 = vld [vmem:[%s848_s6 + $0x1a8] sm:$0xff]  ;;  %v307_v47 = vld [vmem:[%s848_s6 + $0xa0] sm:$0xff]  ;;  %v290_v49 = vld [vmem:[%s848_s6 + $0x18] sm:$0xff] }
  0x26   : > { %481 = vmatpush.msra.mxu3 %v344_v28  ;;  %462 = vmatpush.msra.mxu2 %v327_v30  ;;  %v339_v48 = vld [vmem:[%s848_s6 + $0x1a0] sm:$0xff]  ;;  %v322_v50 = vld [vmem:[%s848_s6 + $0x118] sm:$0xff]  ;;  %v289_v53 = vld [vmem:[%s848_s6 + $0x10] sm:$0xff] }
  0x27   : > { %442 = vmatpush.msra.mxu1 %v311_v31  ;;  %423 = vmatpush.msra.mxu0 %v294_v33  ;;  %v306_v51 = vld [vmem:[%s848_s6 + $0x98] sm:$0xff]  ;;  %v321_v54 = vld [vmem:[%s848_s6 + $0x110] sm:$0xff]  ;;  %v288_v57 = vld [vmem:[%s848_s6 + $0x8] sm:$0xff] }
  0x28   : > { %482 = vmatpush.msra.mxu3 %v343_v32  ;;  %463 = vmatpush.msra.mxu2 %v326_v34  ;;  %v338_v52 = vld [vmem:[%s848_s6 + $0x198] sm:$0xff]  ;;  %v305_v55 = vld [vmem:[%s848_s6 + $0x90] sm:$0xff]  ;;  %v320_v58 = vld [vmem:[%s848_s6 + $0x108] sm:$0xff] }
  0x29   : > { %443 = vmatpush.msra.mxu1 %v310_v35  ;;  %424 = vmatpush.msra.mxu0 %v293_v37  ;;  %v337_v56 = vld [vmem:[%s848_s6 + $0x190] sm:$0xff]  ;;  %v304_v59 = vld [vmem:[%s848_s6 + $0x88] sm:$0xff]  ;;  %v287_v61 = vld [vmem:[%s848_s6] sm:$0xff] }
  0x2a   : > { %483 = vmatpush.msra.mxu3 %v342_v36  ;;  %464 = vmatpush.msra.mxu2 %v325_v38  ;;  %v336_v60 = vld [vmem:[%s848_s6 + $0x188] sm:$0xff]  ;;  %v319_v62 = vld [vmem:[%s848_s6 + $0x100] sm:$0xff]  ;;  %v366_v63 = vld [vmem:[%s848_s6 + $0x278] sm:$0xff] }
  0x2b   : > { %444 = vmatpush.msra.mxu1 %v309_v39  ;;  %425 = vmatpush.msra.mxu0 %v292_v41  ;;  %v398_v0 = vld [vmem:[%s848_s6 + $0x378] sm:$0xff]  ;;  %v303_v1 = vld [vmem:[%s848_s6 + $0x80] sm:$0xff]  ;;  %v365_v3 = vld [vmem:[%s848_s6 + $0x270] sm:$0xff] }
  0x2c   : > { %484 = vmatpush.msra.mxu3 %v341_v40  ;;  %465 = vmatpush.msra.mxu2 %v324_v42  ;;  %v335_v2 = vld [vmem:[%s848_s6 + $0x180] sm:$0xff]  ;;  %v382_v4 = vld [vmem:[%s848_s6 + $0x2f8] sm:$0xff]  ;;  %v397_v5 = vld [vmem:[%s848_s6 + $0x370] sm:$0xff] }
  0x2d   : > { %445 = vmatpush.msra.mxu1 %v308_v43  ;;  %426 = vmatpush.msra.mxu0 %v291_v45  ;;  %v414_v6 = vld [vmem:[%s848_s6 + $0x3f8] sm:$0xff]  ;;  %v364_v7 = vld [vmem:[%s848_s6 + $0x268] sm:$0xff]  ;;  %v381_v8 = vld [vmem:[%s848_s6 + $0x2f0] sm:$0xff] }
  0x2e   : > { %485 = vmatpush.msra.mxu3 %v340_v44  ;;  %466 = vmatpush.msra.mxu2 %v323_v46  ;;  %v396_v9 = vld [vmem:[%s848_s6 + $0x368] sm:$0xff]  ;;  %v413_v10 = vld [vmem:[%s848_s6 + $0x3f0] sm:$0xff]  ;;  %v363_v11 = vld [vmem:[%s848_s6 + $0x260] sm:$0xff] }
  0x2f   : > { %446 = vmatpush.msra.mxu1 %v307_v47  ;;  %427 = vmatpush.msra.mxu0 %v290_v49  ;;  %v380_v12 = vld [vmem:[%s848_s6 + $0x2e8] sm:$0xff]  ;;  %v395_v13 = vld [vmem:[%s848_s6 + $0x360] sm:$0xff]  ;;  %v362_v15 = vld [vmem:[%s848_s6 + $0x258] sm:$0xff] }
  0x30   : > { %486 = vmatpush.msra.mxu3 %v339_v48  ;;  %467 = vmatpush.msra.mxu2 %v322_v50  ;;  %v412_v14 = vld [vmem:[%s848_s6 + $0x3e8] sm:$0xff]  ;;  %v379_v16 = vld [vmem:[%s848_s6 + $0x2e0] sm:$0xff]  ;;  %v394_v17 = vld [vmem:[%s848_s6 + $0x358] sm:$0xff] }
  0x31   : > { %447 = vmatpush.msra.mxu1 %v306_v51  ;;  %428 = vmatpush.msra.mxu0 %v289_v53  ;;  %v411_v18 = vld [vmem:[%s848_s6 + $0x3e0] sm:$0xff]  ;;  %v361_v19 = vld [vmem:[%s848_s6 + $0x250] sm:$0xff]  ;;  %v378_v20 = vld [vmem:[%s848_s6 + $0x2d8] sm:$0xff] }
  0x32   : > { %487 = vmatpush.msra.mxu3 %v338_v52  ;;  %468 = vmatpush.msra.mxu2 %v321_v54  ;;  %v393_v21 = vld [vmem:[%s848_s6 + $0x350] sm:$0xff]  ;;  %v410_v22 = vld [vmem:[%s848_s6 + $0x3d8] sm:$0xff]  ;;  %v360_v23 = vld [vmem:[%s848_s6 + $0x248] sm:$0xff] }
  0x33   : > { %448 = vmatpush.msra.mxu1 %v305_v55  ;;  %429 = vmatpush.msra.mxu0 %v288_v57  ;;  %v377_v24 = vld [vmem:[%s848_s6 + $0x2d0] sm:$0xff]  ;;  %v392_v25 = vld [vmem:[%s848_s6 + $0x348] sm:$0xff]  ;;  %v359_v27 = vld [vmem:[%s848_s6 + $0x240] sm:$0xff] }
  0x34   : > { %488 = vmatpush.msra.mxu3 %v337_v56  ;;  %469 = vmatpush.msra.mxu2 %v320_v58  ;;  %v409_v26 = vld [vmem:[%s848_s6 + $0x3d0] sm:$0xff]  ;;  %v376_v28 = vld [vmem:[%s848_s6 + $0x2c8] sm:$0xff]  ;;  %v391_v29 = vld [vmem:[%s848_s6 + $0x340] sm:$0xff] }
  0x35   : > { %449 = vmatpush.msra.mxu1 %v304_v59  ;;  %430 = vmatpush.msra.mxu0 %v287_v61  ;;  %v408_v30 = vld [vmem:[%s848_s6 + $0x3c8] sm:$0xff]  ;;  %v358_v31 = vld [vmem:[%s848_s6 + $0x238] sm:$0xff]  ;;  %v375_v32 = vld [vmem:[%s848_s6 + $0x2c0] sm:$0xff] }
  0x36   : > { %489 = vmatpush.msra.mxu3 %v336_v60  ;;  %470 = vmatpush.msra.mxu2 %v319_v62  ;;  %v390_v33 = vld [vmem:[%s848_s6 + $0x338] sm:$0xff]  ;;  %v407_v34 = vld [vmem:[%s848_s6 + $0x3c0] sm:$0xff]  ;;  %v357_v35 = vld [vmem:[%s848_s6 + $0x230] sm:$0xff] }
  0x37   : > { %495 = vmatpush.msrb.mxu0 %v366_v63  ;;  %450 = vmatpush.msra.mxu1 %v303_v1  ;;  %v374_v36 = vld [vmem:[%s848_s6 + $0x2b8] sm:$0xff]  ;;  %v389_v37 = vld [vmem:[%s848_s6 + $0x330] sm:$0xff]  ;;  %v356_v39 = vld [vmem:[%s848_s6 + $0x228] sm:$0xff] }
  0x38   : > { %535 = vmatpush.msrb.mxu2 %v398_v0  ;;  %490 = vmatpush.msra.mxu3 %v335_v2  ;;  %v406_v38 = vld [vmem:[%s848_s6 + $0x3b8] sm:$0xff]  ;;  %v373_v40 = vld [vmem:[%s848_s6 + $0x2b0] sm:$0xff]  ;;  %v388_v41 = vld [vmem:[%s848_s6 + $0x328] sm:$0xff] }
  0x39   : > { %496 = vmatpush.msrb.mxu0 %v365_v3  ;;  %515 = vmatpush.msrb.mxu1 %v382_v4  ;;  %v405_v42 = vld [vmem:[%s848_s6 + $0x3b0] sm:$0xff]  ;;  %v355_v44 = vld [vmem:[%s848_s6 + $0x220] sm:$0xff]  ;;  %v372_v45 = vld [vmem:[%s848_s6 + $0x2a8] sm:$0xff] }
  0x3a   : > { %536 = vmatpush.msrb.mxu2 %v397_v5  ;;  %555 = vmatpush.msrb.mxu3 %v414_v6  ;;  %v281_v43 = vld [vmem:[%s843_s27 + $0x10] sm:$0xff]  ;;  %v387_v46 = vld [vmem:[%s848_s6 + $0x320] sm:$0xff]  ;;  %v404_v47 = vld [vmem:[%s848_s6 + $0x3a8] sm:$0xff] }
  0x3b   : > { %497 = vmatpush.msrb.mxu0 %v364_v7  ;;  %516 = vmatpush.msrb.mxu1 %v381_v8  ;;  %v279_v48 = vld [vmem:[%s843_s27] sm:$0xff]  ;;  %v282_v49 = vld [vmem:[%s843_s27 + $0x18] sm:$0xff]  ;;  %v280_v54 = vld [vmem:[%s843_s27 + $0x8] sm:$0xff] }
  0x3c   : > { %537 = vmatpush.msrb.mxu2 %v396_v9  ;;  %556 = vmatpush.msrb.mxu3 %v413_v10  ;;  %v354_v50 = vld [vmem:[%s848_s6 + $0x218] sm:$0xff]  ;;  %v371_v51 = vld [vmem:[%s848_s6 + $0x2a0] sm:$0xff]  ;;  %v353_v55 = vld [vmem:[%s848_s6 + $0x210] sm:$0xff] }
  0x3d   : > { %498 = vmatpush.msrb.mxu0 %v363_v11  ;;  %517 = vmatpush.msrb.mxu1 %v380_v12  ;;  %v386_v52 = vld [vmem:[%s848_s6 + $0x318] sm:$0xff]  ;;  %v403_v53 = vld [vmem:[%s848_s6 + $0x3a0] sm:$0xff]  ;;  %v385_v57 = vld [vmem:[%s848_s6 + $0x310] sm:$0xff] }
  0x3e   : > { %538 = vmatpush.msrb.mxu2 %v395_v13  ;;  %557 = vmatpush.msrb.mxu3 %v412_v14  ;;  %v370_v56 = vld [vmem:[%s848_s6 + $0x298] sm:$0xff]  ;;  %v352_v59 = vld [vmem:[%s848_s6 + $0x208] sm:$0xff]  ;;  %v369_v60 = vld [vmem:[%s848_s6 + $0x290] sm:$0xff] }
  0x3f   : > { %499 = vmatpush.msrb.mxu0 %v362_v15  ;;  %518 = vmatpush.msrb.mxu1 %v379_v16  ;;  %v402_v58 = vld [vmem:[%s848_s6 + $0x398] sm:$0xff]  ;;  %v384_v61 = vld [vmem:[%s848_s6 + $0x308] sm:$0xff]  ;;  %v401_v62 = vld [vmem:[%s848_s6 + $0x390] sm:$0xff] }
  0x40   : > { %539 = vmatpush.msrb.mxu2 %v394_v17  ;;  %558 = vmatpush.msrb.mxu3 %v411_v18  ;;  %v351_v63 = vld [vmem:[%s848_s6 + $0x200] sm:$0xff]  ;;  %v368_v0 = vld [vmem:[%s848_s6 + $0x288] sm:$0xff]  ;;  %v285_v4 = vld [vmem:[%s843_s27 + $0x30] sm:$0xff] }
  0x41   : > { %500 = vmatpush.msrb.mxu0 %v361_v19  ;;  %519 = vmatpush.msrb.mxu1 %v378_v20  ;;  %v383_v1 = vld [vmem:[%s848_s6 + $0x300] sm:$0xff]  ;;  %v400_v2 = vld [vmem:[%s848_s6 + $0x388] sm:$0xff]  ;;  %v286_v8 = vld [vmem:[%s843_s27 + $0x38] sm:$0xff] }
  0x42   : > { %540 = vmatpush.msrb.mxu2 %v393_v21  ;;  %559 = vmatpush.msrb.mxu3 %v410_v22  ;;  %v283_v3 = vld [vmem:[%s843_s27 + $0x20] sm:$0xff]  ;;  %v284_v7 = vld [vmem:[%s843_s27 + $0x28] sm:$0xff] }
  0x43   : > { %501 = vmatpush.msrb.mxu0 %v360_v23  ;;  %520 = vmatpush.msrb.mxu1 %v377_v24  ;;  %v367_v5 = vld [vmem:[%s848_s6 + $0x280] sm:$0xff] }
  0x44   : > { %541 = vmatpush.msrb.mxu2 %v392_v25  ;;  %560 = vmatpush.msrb.mxu3 %v409_v26  ;;  %v399_v6 = vld [vmem:[%s848_s6 + $0x380] sm:$0xff] }
  0x45   : > { %502 = vmatpush.msrb.mxu0 %v359_v27  ;;  %521 = vmatpush.msrb.mxu1 %v376_v28  ;;  %v278_v22 = vld [vmem:[#allocation2] sm:$0xff] }
  0x46   : > { %542 = vmatpush.msrb.mxu2 %v391_v29  ;;  %561 = vmatpush.msrb.mxu3 %v408_v30 }
  0x47   : > { %503 = vmatpush.msrb.mxu0 %v358_v31  ;;  %522 = vmatpush.msrb.mxu1 %v375_v32 }
  0x48   : > { %543 = vmatpush.msrb.mxu2 %v390_v33  ;;  %562 = vmatpush.msrb.mxu3 %v407_v34 }
  0x49   : > { %504 = vmatpush.msrb.mxu0 %v357_v35  ;;  %523 = vmatpush.msrb.mxu1 %v374_v36 }
  0x4a   : > { %544 = vmatpush.msrb.mxu2 %v389_v37  ;;  %563 = vmatpush.msrb.mxu3 %v406_v38 }
  0x4b   : > { %505 = vmatpush.msrb.mxu0 %v356_v39  ;;  %524 = vmatpush.msrb.mxu1 %v373_v40 }
  0x4c   : > { %545 = vmatpush.msrb.mxu2 %v388_v41  ;;  %564 = vmatpush.msrb.mxu3 %v405_v42 }
  0x4d   : > { %471 = vmatmul.f32.vlgmr.msra.gmra.mxu2 %v281_v43  ;;  %506 = vmatpush.msrb.mxu0 %v355_v44 }
  0x4e   : > { %525 = vmatpush.msrb.mxu1 %v372_v45  ;;  %546 = vmatpush.msrb.mxu2 %v387_v46 }
  0x4f   : > { %565 = vmatpush.msrb.mxu3 %v404_v47  ;;  %431 = vmatmul.f32.vlgmr.msra.gmra.mxu0 %v279_v48 }
  0x50   : > { %491 = vmatmul.f32.vlgmr.msra.gmra.mxu3 %v282_v49  ;;  %507 = vmatpush.msrb.mxu0 %v354_v50 }
  0x51   : > { %526 = vmatpush.msrb.mxu1 %v371_v51  ;;  %547 = vmatpush.msrb.mxu2 %v386_v52 }
  0x52   : > { %566 = vmatpush.msrb.mxu3 %v403_v53  ;;  %451 = vmatmul.f32.vlgmr.msra.gmra.mxu1 %v280_v54 }
  0x53   : > { %508 = vmatpush.msrb.mxu0 %v353_v55  ;;  %527 = vmatpush.msrb.mxu1 %v370_v56 }
  0x54   : > { %548 = vmatpush.msrb.mxu2 %v385_v57  ;;  %567 = vmatpush.msrb.mxu3 %v402_v58 }
  0x55   : > { %509 = vmatpush.msrb.mxu0 %v352_v59  ;;  %528 = vmatpush.msrb.mxu1 %v369_v60 }
  0x56   : > { %549 = vmatpush.msrb.mxu2 %v384_v61  ;;  %568 = vmatpush.msrb.mxu3 %v401_v62 }
  0x57   : > { %510 = vmatpush.msrb.mxu0 %v351_v63  ;;  %529 = vmatpush.msrb.mxu1 %v368_v0 }
  0x58   : > { %550 = vmatpush.msrb.mxu2 %v383_v1  ;;  %569 = vmatpush.msrb.mxu3 %v400_v2 }
  0x59   : > { %511 = vmatmul.f32.vlgmr.msrb.gmra.mxu0 %v283_v3  ;;  %551 = vmatmul.f32.vlgmr.msrb.gmra.mxu2 %v285_v4 }
  0x5a   : > { %530 = vmatpush.msrb.mxu1 %v367_v5  ;;  %570 = vmatpush.msrb.mxu3 %v399_v6 }
  0x5b   : > { %531 = vmatmul.f32.vlgmr.msrb.gmra.mxu1 %v284_v7  ;;  %571 = vmatmul.f32.vlgmr.msrb.gmra.mxu3 %v286_v8 }
  0xcc   : > { %v432_v9 = vpop.f32.mrf.mxu0 }
  0xcf   : > { %v452_v10 = vpop.f32.mrf.mxu1 }
  0xd0   : > { %v453_v11 = vadd.f32 %v452_v10, %v432_v9  ;;  %v472_v12 = vpop.f32.mrf.mxu2 }
  0xd2   : > { %v473_v13 = vadd.f32 %v472_v12, %v453_v11 }
  0xd3   : > { %v492_v14 = vpop.f32.mrf.mxu3 }
  0xd4   : > { %v493_v15 = vadd.f32 %v492_v14, %v473_v13 }
  0xd6   : > { %v512_v16 = vpop.f32.mrf.mxu0 }
  0xd7   : > { %v513_v17 = vadd.f32 %v512_v16, %v493_v15 }
  0xd8   : > { %v532_v18 = vpop.f32.mrf.mxu1 }
  0xd9   : > { %v533_v19 = vadd.f32 %v532_v18, %v513_v17 }
  0xdc   : > { %v552_v20 = vpop.f32.mrf.mxu2 }
  0xdd   : > { %v553_v21 = vadd.f32 %v552_v20, %v533_v19 }
  0xde   : > { %v572_v23 = vpop.f32.mrf.mxu3 }
  0xdf   : > { %v573_v24 = vadd.f32 %v572_v23, %v553_v21  ;;  %580 = sbr.rel (%p728_p7) target bundleno = 645 (0x285), region = 48 }
  0xe1   : > { %v575_v25 = vadd.f32 %v573_v24, %v278_v22 }
  0xe3   : > { %576 = vst [vmem:[#allocation2] sm:$0xff] %v575_v25 }
  0xe4   : > { %v603_v26 = vld [vmem:[%s1060_s3 + $0x78] sm:$0xff]  ;;  %v602_v27 = vld [vmem:[%s1060_s3 + $0x70] sm:$0xff]  ;;  %v601_v28 = vld [vmem:[%s1060_s3 + $0x68] sm:$0xff]  ;;  %vm628_vm0 = vcmask 80896  }
  0xe5   : > { %608 = vmatpush.msra.mxu0 %v603_v26  ;;  %v600_v29 = vld [vmem:[%s1060_s3 + $0x60] sm:$0xff]  ;;  %v599_v30 = vld [vmem:[%s1060_s3 + $0x58] sm:$0xff]  ;;  %v598_v31 = vld [vmem:[%s1060_s3 + $0x50] sm:$0xff] }
  0xe6   : > { %v597_v32 = vld [vmem:[%s1060_s3 + $0x48] sm:$0xff]  ;;  %v596_v33 = vld [vmem:[%s1060_s3 + $0x40] sm:$0xff]  ;;  %v595_v34 = vld [vmem:[%s1060_s3 + $0x38] sm:$0xff] }
  0xe7   : > { %609 = vmatpush.msra.mxu0 %v602_v27  ;;  %v594_v35 = vld [vmem:[%s1060_s3 + $0x30] sm:$0xff]  ;;  %v593_v36 = vld [vmem:[%s1060_s3 + $0x28] sm:$0xff]  ;;  %v592_v37 = vld [vmem:[%s1060_s3 + $0x20] sm:$0xff] }
  0xe8   : > { %v757_v38 = vld [vmem:[%s1059_s2] ss:$0 sm:$0xff]  ;;  %v591_v40 = vld [vmem:[%s1060_s3 + $0x18] sm:$0xff]  ;;  %v590_v41 = vld [vmem:[%s1060_s3 + $0x10] sm:$0xff] }
  0xe9   : > { %610 = vmatpush.msra.mxu0 %v601_v28  ;;  %v589_v43 = vld [vmem:[%s1060_s3 + $0x8] sm:$0xff]  ;;  %v588_v44 = vld [vmem:[%s1060_s3] sm:$0xff] }
  0xea   : > { %v581_v39 = vld [vmem:[#allocation2] sm:$0xff] }
  0xeb   : > { %611 = vmatpush.msra.mxu0 %v600_v29  ;;  %v586_v42 = vadd.f32 %v757_v38, %v581_v39  ;;  %v758_v46 = vld [vmem:[%s1061_s4] ss:$0 sm:$0xff] }
  0xed   : > { %612 = vmatpush.msra.mxu0 %v599_v30  ;;  %v587_v45 = vmax.f32 %v586_v42, 0.0 }
  0xef   : > { %613 = vmatpush.msra.mxu0 %v598_v31 }
  0xf1   : > { %614 = vmatpush.msra.mxu0 %v597_v32 }
  0xf3   : > { %615 = vmatpush.msra.mxu0 %v596_v33 }
  0xf5   : > { %616 = vmatpush.msra.mxu0 %v595_v34 }
  0xf7   : > { %617 = vmatpush.msra.mxu0 %v594_v35 }
  0xf9   : > { %618 = vmatpush.msra.mxu0 %v593_v36 }
  0xfb   : > { %619 = vmatpush.msra.mxu0 %v592_v37 }
  0xfd   : > { %620 = vmatpush.msra.mxu0 %v591_v40 }
  0xff   : > { %621 = vmatpush.msra.mxu0 %v590_v41 }
 0x101   : > { %622 = vmatpush.msra.mxu0 %v589_v43 }
 0x103   : > { %623 = vmatpush.msra.mxu0 %v588_v44 }
 0x104   : > { %624 = vmatmul.f32.vlgmr.msra.gmra.mxu0 %v587_v45 }
 0x181   : > { %v625_v47 = vpop.f32.mrf.mxu0 }
 0x182   : > { %v626_v48 = vadd.f32 %v758_v46, %v625_v47 }
 0x184   : > { %v629_v49 = vsel %vm628_vm0, %v626_v48, -inf }
 0x185   : > { %630 = vmax.xlane.f32.xlu0 %v629_v49 }
 0x1f8   : > { %v631_v50 = vpop.xlane.xlu0 %630 }
 0x1f9   : > { %v632_v51 = vsub.f32 %v626_v48, %v631_v50 }
 0x1fb   : > { %v633_v52 = vmul.f32 1.442695, %v632_v51 }
 0x1fd   : > { %759 = vpow2.f32 %v633_v52 }
 0x203   : > { %v760_v53 = vpop.eup %759 }
 0x204   : > { %v635_v54 = vsel %vm628_vm0, %v760_v53, 0.0 }
 0x205   : > { %636 = vadd.xlane.f32.xlu0 %v635_v54 }
 0x278   : > { %v637_v55 = vpop.xlane.xlu0 %636 }
 0x279   : > { %761 = vlog2.f32 %v637_v55 }
 0x27f   : > { %v762_v56 = vpop.eup %761 }
 0x280   : > { %v639_v57 = vmul.f32 0.6931472, %v762_v56 }
 0x282   : > { %v640_v58 = vsub.f32 %v632_v51, %v639_v57 }
 0x284   : > { %641 = vst.msk [vmem:[%s1062_s5] sm:$0xff] %vm628_vm0, %v640_v58 }
 0x285 PF: > { %s15_s20 = sadd.s32 1, %s785_s20   ;;  %s1063_s18 = smov %s781_s19 }
 0x286   : > { %p12_p8 = scmp.ge.s32.totalorder %s15_s20, 11   ;;  %s1064_s19 = smov %s1066_s21 }
 0x288   :  { %14 = sbr.rel (!%p12_p8) target bundleno = 2 (0x2), region = 81 }

</bundles_post_ra>
